<compile_context>
chip_gen: v7x
topology: tpu7x:2x2x1
jax: 0.10.0
libtpu: 0.0.40
codegen_flags: <defaults>
</compile_context>

<pallas_src>
import functools

import numpy as np
import jax
import jax.numpy as jnp
from jax.experimental import pallas as pl
from jax.experimental.pallas import tpu as pltpu


_MS_KERNELS = [(3, 50), (5, 25), (7, 15), (10, 10), (15, 3)]
_BN_EPS = 1e-5

# Abramowitz & Stegun 7.1.26 erf approximation (|err| <= 1.5e-7); uses only
# exp / divide / where, all of which lower cleanly in Mosaic.
_ERF_A = (0.254829592, -0.284496736, 1.421413741, -1.453152027, 1.061405429)
_ERF_P = 0.3275911


def _erf(z):
    az = jnp.abs(z)
    t = 1.0 / (1.0 + _ERF_P * az)
    poly = t * (_ERF_A[0] + t * (_ERF_A[1] + t * (_ERF_A[2]
              + t * (_ERF_A[3] + t * _ERF_A[4]))))
    y = 1.0 - poly * jnp.exp(-az * az)
    return jnp.where(z < 0, -y, y)


def _gelu(x):
    # exact (erf-based) GELU, matching torch.nn.GELU() up to ~1e-7
    return 0.5 * x * (1.0 + _erf(x * np.float32(1.0 / np.sqrt(2.0))))


# ---------------------------------------------------------------------------
# Trace-time weight folding (per-parameter work, not per-activation).
# ---------------------------------------------------------------------------
def _branch_grid(kh, kw):
    gy = np.arange(-(kh - 1) // 2, (kh - 1) // 2 + 1)
    gx = np.arange(-(kw - 1) // 2, (kw - 1) // 2 + 1)
    yy, xx = np.meshgrid(gy, gx, indexing="ij")
    return yy.reshape(-1), xx.reshape(-1)           # tap order p = i*kw + j


def _branch_scatter(kh, kw, h, w):
    """(kh*kw, h*w) 0/1 map: tap p -> absolute pixel it samples (all-zero row if OOB)."""
    yy, xx = _branch_grid(kh, kw)
    valid = (yy >= 0) & (yy < h) & (xx >= 0) & (xx < w)
    P = np.zeros((kh * kw, h * w), np.float32)
    P[np.arange(kh * kw)[valid], (yy[valid] * w + xx[valid])] = 1.0
    return P


def _bn_fold(params, prefix):
    s = params[prefix + "_gamma"] / jnp.sqrt(params[prefix + "_var"] + _BN_EPS)
    t = params[prefix + "_beta"] - params[prefix + "_mean"] * s
    return s, t


def _prepare_fused_params(params, c, h, w):
    L = h * w
    # --- collapse the 5 zero-offset deformable branches into one (c, c, L) map ---
    wms = jnp.zeros((c, c, L), jnp.float32)
    ms_bias = jnp.zeros((c,), jnp.float32)
    for i, (kh, kw) in enumerate(_MS_KERNELS):
        # reproduces the weight.view(oc,-1) vs (tap, channel) flat-index mismatch
        w_eff = params["ms_w"][i].reshape(c, kh * kw, c)          # (oc, p, ch)
        P = jnp.asarray(_branch_scatter(kh, kw, h, w))            # (p, l)
        wms = wms + jnp.einsum("opc,pl->ocl", w_eff, P)
        ms_bias = ms_bias + params["ms_b"][i]
    s1, t1 = _bn_fold(params, "bn1")
    wms_s = wms * s1[:, None, None]
    b1s = ms_bias * s1 + t1

    # --- branch2: 1x1 conv with BN folded in ---
    s2, t2 = _bn_fold(params, "bn2")
    w2s = params["conv2_w"].reshape(c, c) * s2[:, None]
    b2s = params["conv2_b"] * s2 + t2

    # --- attention projections ---
    wq = params["in_proj_w"][0:c]
    wk = params["in_proj_w"][c:2 * c]
    wv = params["in_proj_w"][2 * c:3 * c]
    bq = params["in_proj_b"][0:c]
    bk = params["in_proj_b"][c:2 * c]
    bv = params["in_proj_b"][2 * c:3 * c]
    wo = params["out_proj_w"]
    bo = params["out_proj_b"]

    # --- final BatchNorm2d (inference) ---
    sf, tf = _bn_fold(params, "bnf")

    # Fuse branch2 / q / k / v projections into one stacked matmul operand.
    w_big = jnp.concatenate([w2s, wq, wk, wv], axis=0)              # (4c, c)
    b_big = jnp.concatenate([b2s, bq, bk, bv], axis=0)[:, None]     # (4c, 1)
    vecs = jnp.stack([b1s, bo, sf, tf], axis=1)                     # (c, 4)
    return wms_s, w_big, b_big, wo, vecs


# ---------------------------------------------------------------------------
# The single fused kernel: one grid step == one batch element, (c, L) layout.
# ---------------------------------------------------------------------------
def _fused_block_kernel(x_ref, wms_ref, wbig_ref, bbig_ref, wo_ref, vec_ref,
                        o_ref, *, nh, hd):
    c = x_ref.shape[1]
    L = x_ref.shape[2]
    x = x_ref[0]                                                    # (c, L)

    # ---- branch1: MultiScaleConv (zero-offset deformable) + BN + GELU -------
    # spatially constant per the reference semantics -> a (c, 1) column
    prod = wms_ref[...] * x[None, :, :]                             # (c, c, L)
    msf = jnp.sum(jnp.sum(prod, axis=2), axis=1, keepdims=True)     # (c, 1)
    br1 = _gelu(msf + vec_ref[:, 0:1])                              # (c, 1)

    # ---- fused branch2 (1x1 conv + BN) and q/k/v projections: one matmul ----
    big = jnp.dot(wbig_ref[...], x,
                  preferred_element_type=jnp.float32) + bbig_ref[...]  # (4c, L)
    br2 = _gelu(big[0:c])                                           # (c, L)
    q = big[c:2 * c]                                                # (c, L)
    k = big[2 * c:3 * c]                                            # (c, L)
    v = big[3 * c:4 * c]                                            # (c, L)

    # ---- multi-head self-attention (inference: no dropout) ------------------
    wo = wo_ref[...]
    qT = q.T                                                        # (L, c), one transpose
    scale = np.float32(1.0 / np.sqrt(hd))

    att = jnp.zeros((c, L), jnp.float32)
    for hh in range(nh):                                            # heads, lane-dense (L, L)
        sl = slice(hh * hd, (hh + 1) * hd)
        s = jnp.dot(qT[:, sl], k[sl, :],
                    preferred_element_type=jnp.float32) * scale     # (L, L)
        s = s - jnp.max(s, axis=1, keepdims=True)
        p = jnp.exp(s)
        p = p * pl.reciprocal(jnp.sum(p, axis=1, keepdims=True), approx=True)
        # oh[d, l] = sum_m v_head[d, m] * p[l, m]
        oh = jax.lax.dot_general(v[sl, :], p, (((1,), (1,)), ((), ())),
                                 preferred_element_type=jnp.float32)  # (hd, L)
        att = att + jnp.dot(wo[:, sl], oh, preferred_element_type=jnp.float32)
    att = att + vec_ref[:, 1:2]

    # ---- residual add + final BatchNorm2d (inference) -----------------------
    out = br1 + br2 + att + x
    o_ref[0] = out * vec_ref[:, 2:3] + vec_ref[:, 3:4]


def residual_financial_block_forward(x, params):
    b, c, h, w = x.shape
    assert c % 8 == 0, "channels must be divisible by num_heads=8"
    L = h * w
    nh, hd = 8, c // 8

    wms_s, w_big, b_big, wo, vecs = _prepare_fused_params(params, c, h, w)
    x_bcl = x.reshape(b, c, L)

    kern = functools.partial(_fused_block_kernel, nh=nh, hd=hd)
    out = pl.pallas_call(
        kern,
        out_shape=jax.ShapeDtypeStruct((b, c, L), jnp.float32),
        grid_spec=pltpu.PrefetchScalarGridSpec(
            num_scalar_prefetch=0,
            grid=(b,),
            in_specs=[
                pl.BlockSpec((1, c, L), lambda i: (i, 0, 0)),   # x, per batch element
                pl.BlockSpec((c, c, L), lambda i: (0, 0, 0)),   # collapsed multi-scale map
                pl.BlockSpec((4 * c, c), lambda i: (0, 0)),     # [w2s; wq; wk; wv] stacked
                pl.BlockSpec((4 * c, 1), lambda i: (0, 0)),     # stacked biases
                pl.BlockSpec((c, c), lambda i: (0, 0)),         # attention out-projection
                pl.BlockSpec((c, 4), lambda i: (0, 0)),         # [b1s, bo, bn_scale, bn_shift]
            ],
            out_specs=pl.BlockSpec((1, c, L), lambda i: (i, 0, 0)),
        ),
        compiler_params=pltpu.CompilerParams(
            dimension_semantics=("parallel",)),
    )(x_bcl, wms_s, w_big, b_big, wo, vecs)
    return out.reshape(b, c, h, w)


# ---------------------------------------------------------------------------
# Deterministic parameter init (shapes follow the PyTorch __init__; BN running
# stats randomized so the inference-BN folding is actually exercised).
# ---------------------------------------------------------------------------
def init_params(key, c):
    ki = iter(jax.random.split(key, 28))
    p = {"ms_w": [], "ms_b": []}
    for (kh, kw) in _MS_KERNELS:
        bound = float(np.sqrt(6.0 / (c * kh * kw)))
        p["ms_w"].append(jax.random.uniform(next(ki), (c, c, kh, kw), jnp.float32,
                                            -bound, bound))
        p["ms_b"].append(jax.random.uniform(next(ki), (c,), jnp.float32, -0.1, 0.1))

    def bn(prefix):
        p[prefix + "_gamma"] = jax.random.uniform(next(ki), (c,), jnp.float32, 0.5, 1.5)
        p[prefix + "_beta"] = jax.random.uniform(next(ki), (c,), jnp.float32, -0.5, 0.5)
        p[prefix + "_mean"] = jax.random.uniform(next(ki), (c,), jnp.float32, -0.5, 0.5)
        p[prefix + "_var"] = jax.random.uniform(next(ki), (c,), jnp.float32, 0.5, 1.5)

    bn("bn1")
    b2 = float(1.0 / np.sqrt(c))
    p["conv2_w"] = jax.random.uniform(next(ki), (c, c, 1, 1), jnp.float32, -b2, b2)
    p["conv2_b"] = jax.random.uniform(next(ki), (c,), jnp.float32, -b2, b2)
    bn("bn2")
    b_in = float(np.sqrt(6.0 / (4 * c)))
    p["in_proj_w"] = jax.random.uniform(next(ki), (3 * c, c), jnp.float32, -b_in, b_in)
    p["in_proj_b"] = jax.random.uniform(next(ki), (3 * c,), jnp.float32, -0.1, 0.1)
    b_out = float(1.0 / np.sqrt(c))
    p["out_proj_w"] = jax.random.uniform(next(ki), (c, c), jnp.float32, -b_out, b_out)
    p["out_proj_b"] = jax.random.uniform(next(ki), (c,), jnp.float32, -0.1, 0.1)
    bn("bnf")
    return p


# ---------------------------------------------------------------------------
# Pure-JAX reference mirroring the PyTorch forward (inference mode), used to
# validate the in-kernel folding.
# ---------------------------------------------------------------------------
def reference_forward(x, params):
    b, c, h, w = x.shape
    L = h * w
    nh, hd = 8, c // 8

    def bn(y, prefix):
        s = params[prefix + "_gamma"] / jnp.sqrt(params[prefix + "_var"] + _BN_EPS)
        t = params[prefix + "_beta"] - params[prefix + "_mean"] * s
        return y * s[None, :, None, None] + t[None, :, None, None]

    def gelu(y):
        return jax.nn.gelu(y, approximate=False)

    # branch1: MultiScaleConv with reference deform_conv2d (zero offsets) semantics
    ms = jnp.zeros((b, c), jnp.float32)
    for i, (kh, kw) in enumerate(_MS_KERNELS):
        w_eff = params["ms_w"][i].reshape(c, kh * kw, c)            # (oc, p, ch)
        yy, xx = _branch_grid(kh, kw)
        mask = ((yy >= 0) & (yy < h) & (xx >= 0) & (xx < w)).astype(np.float32)
        samp = x[:, :, np.clip(yy, 0, h - 1), np.clip(xx, 0, w - 1)]  # (b, c, P)
        samp = samp * jnp.asarray(mask)[None, None, :]
        ms = ms + jnp.einsum("opc,bcp->bo", w_eff, samp) + params["ms_b"][i][None, :]
    br1 = gelu(bn(jnp.broadcast_to(ms[:, :, None, None], (b, c, h, w)), "bn1"))

    # branch2: 1x1 conv + BN + GELU
    y2 = jnp.einsum("oc,bchw->bohw", params["conv2_w"].reshape(c, c), x) \
        + params["conv2_b"][None, :, None, None]
    br2 = gelu(bn(y2, "bn2"))

    # self-attention (PyTorch MultiheadAttention, eval: no dropout)
    flat = jnp.transpose(x.reshape(b, c, L), (2, 0, 1))             # (L, b, c)
    qkv = flat @ params["in_proj_w"].T + params["in_proj_b"]
    q, k, v = qkv[..., :c], qkv[..., c:2 * c], qkv[..., 2 * c:]

    def heads(t):
        return jnp.transpose(t.reshape(L, b, nh, hd), (1, 2, 0, 3))  # (b, nh, L, hd)

    qh, kk, vv = heads(q), heads(k), heads(v)
    s = jnp.einsum("bnld,bnmd->bnlm", qh, kk) / np.sqrt(hd)
    p_att = jax.nn.softmax(s, axis=-1)
    ah = jnp.einsum("bnlm,bnmd->bnld", p_att, vv)
    a2 = jnp.transpose(ah, (2, 0, 1, 3)).reshape(L, b, c)
    a2 = a2 @ params["out_proj_w"].T + params["out_proj_b"]
    att = jnp.transpose(a2, (1, 2, 0)).reshape(b, c, h, w)

    out = br1 + br2 + att + x            # shortcut == Identity (input_dim == channels)
    return bn(out, "bnf")


if __name__ == "__main__":
    key = jax.random.PRNGKey(0)
    k_x, k_p = jax.random.split(key)
    b, c, h, w = 2, 16, 8, 16            # channels=16 -> 8 heads x head_dim 2; L = 128 lanes
    x = jax.random.normal(k_x, (b, c, h, w), jnp.float32)
    params = init_params(k_p, c)

    fwd = jax.jit(residual_financial_block_forward)
    out = jax.block_until_ready(fwd(x, params))

    ref = reference_forward(x, params)
    np.testing.assert_allclose(np.asarray(out), np.asarray(ref), rtol=1e-2, atol=1e-2)
    print("KERNEL_OK")
</pallas_src>

<mosaic_0001>
module attributes {stable_mosaic.version = 11 : i64} {
  func.func @_fused_block_kernel(%arg0: i32, %arg1: memref<1x16x128xf32, #tpu.memory_space<vmem>>, %arg2: memref<16x16x128xf32, #tpu.memory_space<vmem>>, %arg3: memref<64x16xf32, #tpu.memory_space<vmem>>, %arg4: memref<64x1xf32, #tpu.memory_space<vmem>>, %arg5: memref<16x16xf32, #tpu.memory_space<vmem>>, %arg6: memref<16x4xf32, #tpu.memory_space<vmem>>, %arg7: memref<1x16x128xf32, #tpu.memory_space<vmem>>) attributes {dimension_semantics = [#tpu.dimension_semantics<parallel>], iteration_bounds = array<i64: 2>, scalar_prefetch = 0 : i64, scratch_operands = 0 : i64, tpu.core_type = #tpu.core_type<tc>, window_params = [{transform_indices = @transform_0, window_bounds = array<i64: 1, 16, 128>}, {pipeline_mode = #tpu.pipeline_mode<synchronous>, transform_indices = @transform_1, window_bounds = array<i64: 16, 16, 128>}, {pipeline_mode = #tpu.pipeline_mode<synchronous>, transform_indices = @transform_2, window_bounds = array<i64: 64, 16>}, {pipeline_mode = #tpu.pipeline_mode<synchronous>, transform_indices = @transform_3, window_bounds = array<i64: 64, 1>}, {pipeline_mode = #tpu.pipeline_mode<synchronous>, transform_indices = @transform_4, window_bounds = array<i64: 16, 16>}, {pipeline_mode = #tpu.pipeline_mode<synchronous>, transform_indices = @transform_5, window_bounds = array<i64: 16, 4>}, {transform_indices = @transform_6, window_bounds = array<i64: 1, 16, 128>}]} {
    %c0 = arith.constant 0 : index
    %c0_0 = arith.constant 0 : index
    %c0_1 = arith.constant 0 : index
    %0 = vector.load %arg1[%c0, %c0_0, %c0_1] : memref<1x16x128xf32, #tpu.memory_space<vmem>>, vector<1x16x128xf32>
    %1 = vector.shape_cast %0 : vector<1x16x128xf32> to vector<16x128xf32>
    %c0_2 = arith.constant 0 : index
    %c0_3 = arith.constant 0 : index
    %c0_4 = arith.constant 0 : index
    %2 = vector.load %arg2[%c0_2, %c0_3, %c0_4] : memref<16x16x128xf32, #tpu.memory_space<vmem>>, vector<16x16x128xf32>
    %3 = vector.shape_cast %1 : vector<16x128xf32> to vector<1x16x128xf32>
    %4 = vector.broadcast %3 : vector<1x16x128xf32> to vector<16x16x128xf32>
    %5 = arith.mulf %2, %4 : vector<16x16x128xf32>
    %cst = arith.constant dense<0.000000e+00> : vector<16x16xf32>
    %6 = vector.multi_reduction <add>, %5, %cst [2] : vector<16x16x128xf32> to vector<16x16xf32>
    %cst_5 = arith.constant dense<0.000000e+00> : vector<16xf32>
    %7 = vector.multi_reduction <add>, %6, %cst_5 [1] : vector<16x16xf32> to vector<16xf32>
    %8 = vector.shape_cast %7 : vector<16xf32> to vector<16x1xf32>
    %c0_6 = arith.constant 0 : index
    %c0_7 = arith.constant 0 : index
    %9 = vector.load %arg6[%c0_6, %c0_7] : memref<16x4xf32, #tpu.memory_space<vmem>>, vector<16x1xf32>
    %10 = arith.addf %8, %9 : vector<16x1xf32>
    %cst_8 = arith.constant 5.000000e-01 : f32
    %11 = vector.broadcast %cst_8 : f32 to vector<16x1xf32>
    %12 = arith.mulf %11, %10 : vector<16x1xf32>
    %cst_9 = arith.constant 0.707106769 : f32
    %13 = vector.broadcast %cst_9 : f32 to vector<16x1xf32>
    %14 = arith.mulf %10, %13 : vector<16x1xf32>
    %15 = math.absf %14 : vector<16x1xf32>
    %cst_10 = arith.constant 0.327591091 : f32
    %16 = vector.broadcast %cst_10 : f32 to vector<16x1xf32>
    %17 = arith.mulf %16, %15 : vector<16x1xf32>
    %cst_11 = arith.constant 1.000000e+00 : f32
    %18 = vector.broadcast %cst_11 : f32 to vector<16x1xf32>
    %19 = arith.addf %18, %17 : vector<16x1xf32>
    %cst_12 = arith.constant 1.000000e+00 : f32
    %20 = vector.broadcast %cst_12 : f32 to vector<16x1xf32>
    %21 = arith.divf %20, %19 : vector<16x1xf32>
    %cst_13 = arith.constant 1.06140542 : f32
    %22 = vector.broadcast %cst_13 : f32 to vector<16x1xf32>
    %23 = arith.mulf %21, %22 : vector<16x1xf32>
    %cst_14 = arith.constant -1.45315206 : f32
    %24 = vector.broadcast %cst_14 : f32 to vector<16x1xf32>
    %25 = arith.addf %24, %23 : vector<16x1xf32>
    %26 = arith.mulf %21, %25 : vector<16x1xf32>
    %cst_15 = arith.constant 1.42141378 : f32
    %27 = vector.broadcast %cst_15 : f32 to vector<16x1xf32>
    %28 = arith.addf %27, %26 : vector<16x1xf32>
    %29 = arith.mulf %21, %28 : vector<16x1xf32>
    %cst_16 = arith.constant -0.284496725 : f32
    %30 = vector.broadcast %cst_16 : f32 to vector<16x1xf32>
    %31 = arith.addf %30, %29 : vector<16x1xf32>
    %32 = arith.mulf %21, %31 : vector<16x1xf32>
    %cst_17 = arith.constant 0.254829586 : f32
    %33 = vector.broadcast %cst_17 : f32 to vector<16x1xf32>
    %34 = arith.addf %33, %32 : vector<16x1xf32>
    %35 = arith.mulf %21, %34 : vector<16x1xf32>
    %cst_18 = arith.constant 0.000000e+00 : f32
    %36 = vector.broadcast %cst_18 : f32 to vector<16x1xf32>
    %37 = arith.subf %36, %15 : vector<16x1xf32>
    %38 = arith.mulf %37, %15 : vector<16x1xf32>
    %39 = math.exp %38 : vector<16x1xf32>
    %40 = arith.mulf %35, %39 : vector<16x1xf32>
    %cst_19 = arith.constant 1.000000e+00 : f32
    %41 = vector.broadcast %cst_19 : f32 to vector<16x1xf32>
    %42 = arith.subf %41, %40 : vector<16x1xf32>
    %cst_20 = arith.constant 0.000000e+00 : f32
    %43 = vector.broadcast %cst_20 : f32 to vector<16x1xf32>
    %44 = arith.cmpf olt, %14, %43 : vector<16x1xf32>
    %cst_21 = arith.constant 0.000000e+00 : f32
    %45 = vector.broadcast %cst_21 : f32 to vector<16x1xf32>
    %46 = arith.subf %45, %42 : vector<16x1xf32>
    %47 = arith.select %44, %46, %42 : vector<16x1xi1>, vector<16x1xf32>
    %cst_22 = arith.constant 1.000000e+00 : f32
    %48 = vector.broadcast %cst_22 : f32 to vector<16x1xf32>
    %49 = arith.addf %48, %47 : vector<16x1xf32>
    %50 = arith.mulf %12, %49 : vector<16x1xf32>
    %c0_23 = arith.constant 0 : index
    %c0_24 = arith.constant 0 : index
    %51 = vector.load %arg3[%c0_23, %c0_24] : memref<64x16xf32, #tpu.memory_space<vmem>>, vector<64x16xf32>
    %cst_25 = arith.constant dense<0.000000e+00> : vector<64x128xf32>
    %52 = tpu.matmul %51, %1, %cst_25 {dimension_numbers = #tpu.dot_dimension_numbers<[1], [0], [0], [1], [0, 0, 1, 1], [], []>} : vector<64x16xf32>, vector<16x128xf32>, vector<64x128xf32> -> vector<64x128xf32>
    %c0_26 = arith.constant 0 : index
    %c0_27 = arith.constant 0 : index
    %53 = vector.load %arg4[%c0_26, %c0_27] : memref<64x1xf32, #tpu.memory_space<vmem>>, vector<64x1xf32>
    %54 = vector.broadcast %53 : vector<64x1xf32> to vector<64x128xf32>
    %55 = arith.addf %52, %54 : vector<64x128xf32>
    %56 = vector.extract_strided_slice %55 {offsets = [0, 0], sizes = [16, 128], strides = [1, 1]} : vector<64x128xf32> to vector<16x128xf32>
    %cst_28 = arith.constant 5.000000e-01 : f32
    %57 = vector.broadcast %cst_28 : f32 to vector<16x128xf32>
    %58 = arith.mulf %57, %56 : vector<16x128xf32>
    %cst_29 = arith.constant 0.707106769 : f32
    %59 = vector.broadcast %cst_29 : f32 to vector<16x128xf32>
    %60 = arith.mulf %56, %59 : vector<16x128xf32>
    %61 = math.absf %60 : vector<16x128xf32>
    %cst_30 = arith.constant 0.327591091 : f32
    %62 = vector.broadcast %cst_30 : f32 to vector<16x128xf32>
    %63 = arith.mulf %62, %61 : vector<16x128xf32>
    %cst_31 = arith.constant 1.000000e+00 : f32
    %64 = vector.broadcast %cst_31 : f32 to vector<16x128xf32>
    %65 = arith.addf %64, %63 : vector<16x128xf32>
    %cst_32 = arith.constant 1.000000e+00 : f32
    %66 = vector.broadcast %cst_32 : f32 to vector<16x128xf32>
    %67 = arith.divf %66, %65 : vector<16x128xf32>
    %cst_33 = arith.constant 1.06140542 : f32
    %68 = vector.broadcast %cst_33 : f32 to vector<16x128xf32>
    %69 = arith.mulf %67, %68 : vector<16x128xf32>
    %cst_34 = arith.constant -1.45315206 : f32
    %70 = vector.broadcast %cst_34 : f32 to vector<16x128xf32>
    %71 = arith.addf %70, %69 : vector<16x128xf32>
    %72 = arith.mulf %67, %71 : vector<16x128xf32>
    %cst_35 = arith.constant 1.42141378 : f32
    %73 = vector.broadcast %cst_35 : f32 to vector<16x128xf32>
    %74 = arith.addf %73, %72 : vector<16x128xf32>
    %75 = arith.mulf %67, %74 : vector<16x128xf32>
    %cst_36 = arith.constant -0.284496725 : f32
    %76 = vector.broadcast %cst_36 : f32 to vector<16x128xf32>
    %77 = arith.addf %76, %75 : vector<16x128xf32>
    %78 = arith.mulf %67, %77 : vector<16x128xf32>
    %cst_37 = arith.constant 0.254829586 : f32
    %79 = vector.broadcast %cst_37 : f32 to vector<16x128xf32>
    %80 = arith.addf %79, %78 : vector<16x128xf32>
    %81 = arith.mulf %67, %80 : vector<16x128xf32>
    %cst_38 = arith.constant 0.000000e+00 : f32
    %82 = vector.broadcast %cst_38 : f32 to vector<16x128xf32>
    %83 = arith.subf %82, %61 : vector<16x128xf32>
    %84 = arith.mulf %83, %61 : vector<16x128xf32>
    %85 = math.exp %84 : vector<16x128xf32>
    %86 = arith.mulf %81, %85 : vector<16x128xf32>
    %cst_39 = arith.constant 1.000000e+00 : f32
    %87 = vector.broadcast %cst_39 : f32 to vector<16x128xf32>
    %88 = arith.subf %87, %86 : vector<16x128xf32>
    %cst_40 = arith.constant 0.000000e+00 : f32
    %89 = vector.broadcast %cst_40 : f32 to vector<16x128xf32>
    %90 = arith.cmpf olt, %60, %89 : vector<16x128xf32>
    %cst_41 = arith.constant 0.000000e+00 : f32
    %91 = vector.broadcast %cst_41 : f32 to vector<16x128xf32>
    %92 = arith.subf %91, %88 : vector<16x128xf32>
    %93 = arith.select %90, %92, %88 : vector<16x128xi1>, vector<16x128xf32>
    %cst_42 = arith.constant 1.000000e+00 : f32
    %94 = vector.broadcast %cst_42 : f32 to vector<16x128xf32>
    %95 = arith.addf %94, %93 : vector<16x128xf32>
    %96 = arith.mulf %58, %95 : vector<16x128xf32>
    %97 = vector.extract_strided_slice %55 {offsets = [16, 0], sizes = [16, 128], strides = [1, 1]} : vector<64x128xf32> to vector<16x128xf32>
    %98 = vector.extract_strided_slice %55 {offsets = [32, 0], sizes = [16, 128], strides = [1, 1]} : vector<64x128xf32> to vector<16x128xf32>
    %99 = vector.extract_strided_slice %55 {offsets = [48, 0], sizes = [16, 128], strides = [1, 1]} : vector<64x128xf32> to vector<16x128xf32>
    %c0_43 = arith.constant 0 : index
    %c0_44 = arith.constant 0 : index
    %100 = vector.load %arg5[%c0_43, %c0_44] : memref<16x16xf32, #tpu.memory_space<vmem>>, vector<16x16xf32>
    %101 = tpu.transpose %97, [1, 0] : vector<16x128xf32> -> vector<128x16xf32>
    %cst_45 = arith.constant 0.000000e+00 : f32
    %102 = vector.broadcast %cst_45 : f32 to vector<16x128xf32>
    %103 = vector.extract_strided_slice %101 {offsets = [0, 0], sizes = [128, 2], strides = [1, 1]} : vector<128x16xf32> to vector<128x2xf32>
    %104 = vector.extract_strided_slice %98 {offsets = [0, 0], sizes = [2, 128], strides = [1, 1]} : vector<16x128xf32> to vector<2x128xf32>
    %cst_46 = arith.constant dense<0.000000e+00> : vector<128x128xf32>
    %105 = tpu.matmul %103, %104, %cst_46 {dimension_numbers = #tpu.dot_dimension_numbers<[1], [0], [0], [1], [0, 0, 1, 1], [], []>} : vector<128x2xf32>, vector<2x128xf32>, vector<128x128xf32> -> vector<128x128xf32>
    %cst_47 = arith.constant 0.707106769 : f32
    %106 = vector.broadcast %cst_47 : f32 to vector<128x128xf32>
    %107 = arith.mulf %105, %106 : vector<128x128xf32>
    %cst_48 = arith.constant dense<0xFF800000> : vector<128xf32>
    %108 = vector.multi_reduction <maximumf>, %107, %cst_48 [1] : vector<128x128xf32> to vector<128xf32>
    %109 = vector.shape_cast %108 : vector<128xf32> to vector<128x1xf32>
    %110 = vector.broadcast %109 : vector<128x1xf32> to vector<128x128xf32>
    %111 = arith.subf %107, %110 : vector<128x128xf32>
    %112 = math.exp %111 : vector<128x128xf32>
    %cst_49 = arith.constant dense<0.000000e+00> : vector<128xf32>
    %113 = vector.multi_reduction <add>, %112, %cst_49 [1] : vector<128x128xf32> to vector<128xf32>
    %114 = vector.shape_cast %113 : vector<128xf32> to vector<128x1xf32>
    %115 = tpu.reciprocal %114 {approx = true} : vector<128x1xf32> -> vector<128x1xf32>
    %116 = vector.broadcast %115 : vector<128x1xf32> to vector<128x128xf32>
    %117 = arith.mulf %112, %116 : vector<128x128xf32>
    %118 = vector.extract_strided_slice %99 {offsets = [0, 0], sizes = [2, 128], strides = [1, 1]} : vector<16x128xf32> to vector<2x128xf32>
    %cst_50 = arith.constant dense<0.000000e+00> : vector<2x128xf32>
    %119 = tpu.matmul %118, %117, %cst_50 {dimension_numbers = #tpu.dot_dimension_numbers<[1], [1], [0], [0], [0, 0, 1, 0], [], []>} : vector<2x128xf32>, vector<128x128xf32>, vector<2x128xf32> -> vector<2x128xf32>
    %120 = vector.extract_strided_slice %100 {offsets = [0, 0], sizes = [16, 2], strides = [1, 1]} : vector<16x16xf32> to vector<16x2xf32>
    %cst_51 = arith.constant dense<0.000000e+00> : vector<16x128xf32>
    %121 = tpu.matmul %120, %119, %cst_51 {dimension_numbers = #tpu.dot_dimension_numbers<[1], [0], [0], [1], [0, 0, 1, 1], [], []>} : vector<16x2xf32>, vector<2x128xf32>, vector<16x128xf32> -> vector<16x128xf32>
    %122 = arith.addf %102, %121 : vector<16x128xf32>
    %123 = vector.extract_strided_slice %101 {offsets = [0, 2], sizes = [128, 2], strides = [1, 1]} : vector<128x16xf32> to vector<128x2xf32>
    %124 = vector.extract_strided_slice %98 {offsets = [2, 0], sizes = [2, 128], strides = [1, 1]} : vector<16x128xf32> to vector<2x128xf32>
    %cst_52 = arith.constant dense<0.000000e+00> : vector<128x128xf32>
    %125 = tpu.matmul %123, %124, %cst_52 {dimension_numbers = #tpu.dot_dimension_numbers<[1], [0], [0], [1], [0, 0, 1, 1], [], []>} : vector<128x2xf32>, vector<2x128xf32>, vector<128x128xf32> -> vector<128x128xf32>
    %cst_53 = arith.constant 0.707106769 : f32
    %126 = vector.broadcast %cst_53 : f32 to vector<128x128xf32>
    %127 = arith.mulf %125, %126 : vector<128x128xf32>
    %cst_54 = arith.constant dense<0xFF800000> : vector<128xf32>
    %128 = vector.multi_reduction <maximumf>, %127, %cst_54 [1] : vector<128x128xf32> to vector<128xf32>
    %129 = vector.shape_cast %128 : vector<128xf32> to vector<128x1xf32>
    %130 = vector.broadcast %129 : vector<128x1xf32> to vector<128x128xf32>
    %131 = arith.subf %127, %130 : vector<128x128xf32>
    %132 = math.exp %131 : vector<128x128xf32>
    %cst_55 = arith.constant dense<0.000000e+00> : vector<128xf32>
    %133 = vector.multi_reduction <add>, %132, %cst_55 [1] : vector<128x128xf32> to vector<128xf32>
    %134 = vector.shape_cast %133 : vector<128xf32> to vector<128x1xf32>
    %135 = tpu.reciprocal %134 {approx = true} : vector<128x1xf32> -> vector<128x1xf32>
    %136 = vector.broadcast %135 : vector<128x1xf32> to vector<128x128xf32>
    %137 = arith.mulf %132, %136 : vector<128x128xf32>
    %138 = vector.extract_strided_slice %99 {offsets = [2, 0], sizes = [2, 128], strides = [1, 1]} : vector<16x128xf32> to vector<2x128xf32>
    %cst_56 = arith.constant dense<0.000000e+00> : vector<2x128xf32>
    %139 = tpu.matmul %138, %137, %cst_56 {dimension_numbers = #tpu.dot_dimension_numbers<[1], [1], [0], [0], [0, 0, 1, 0], [], []>} : vector<2x128xf32>, vector<128x128xf32>, vector<2x128xf32> -> vector<2x128xf32>
    %140 = vector.extract_strided_slice %100 {offsets = [0, 2], sizes = [16, 2], strides = [1, 1]} : vector<16x16xf32> to vector<16x2xf32>
    %cst_57 = arith.constant dense<0.000000e+00> : vector<16x128xf32>
    %141 = tpu.matmul %140, %139, %cst_57 {dimension_numbers = #tpu.dot_dimension_numbers<[1], [0], [0], [1], [0, 0, 1, 1], [], []>} : vector<16x2xf32>, vector<2x128xf32>, vector<16x128xf32> -> vector<16x128xf32>
    %142 = arith.addf %122, %141 : vector<16x128xf32>
    %143 = vector.extract_strided_slice %101 {offsets = [0, 4], sizes = [128, 2], strides = [1, 1]} : vector<128x16xf32> to vector<128x2xf32>
    %144 = vector.extract_strided_slice %98 {offsets = [4, 0], sizes = [2, 128], strides = [1, 1]} : vector<16x128xf32> to vector<2x128xf32>
    %cst_58 = arith.constant dense<0.000000e+00> : vector<128x128xf32>
    %145 = tpu.matmul %143, %144, %cst_58 {dimension_numbers = #tpu.dot_dimension_numbers<[1], [0], [0], [1], [0, 0, 1, 1], [], []>} : vector<128x2xf32>, vector<2x128xf32>, vector<128x128xf32> -> vector<128x128xf32>
    %cst_59 = arith.constant 0.707106769 : f32
    %146 = vector.broadcast %cst_59 : f32 to vector<128x128xf32>
    %147 = arith.mulf %145, %146 : vector<128x128xf32>
    %cst_60 = arith.constant dense<0xFF800000> : vector<128xf32>
    %148 = vector.multi_reduction <maximumf>, %147, %cst_60 [1] : vector<128x128xf32> to vector<128xf32>
    %149 = vector.shape_cast %148 : vector<128xf32> to vector<128x1xf32>
    %150 = vector.broadcast %149 : vector<128x1xf32> to vector<128x128xf32>
    %151 = arith.subf %147, %150 : vector<128x128xf32>
    %152 = math.exp %151 : vector<128x128xf32>
    %cst_61 = arith.constant dense<0.000000e+00> : vector<128xf32>
    %153 = vector.multi_reduction <add>, %152, %cst_61 [1] : vector<128x128xf32> to vector<128xf32>
    %154 = vector.shape_cast %153 : vector<128xf32> to vector<128x1xf32>
    %155 = tpu.reciprocal %154 {approx = true} : vector<128x1xf32> -> vector<128x1xf32>
    %156 = vector.broadcast %155 : vector<128x1xf32> to vector<128x128xf32>
    %157 = arith.mulf %152, %156 : vector<128x128xf32>
    %158 = vector.extract_strided_slice %99 {offsets = [4, 0], sizes = [2, 128], strides = [1, 1]} : vector<16x128xf32> to vector<2x128xf32>
    %cst_62 = arith.constant dense<0.000000e+00> : vector<2x128xf32>
    %159 = tpu.matmul %158, %157, %cst_62 {dimension_numbers = #tpu.dot_dimension_numbers<[1], [1], [0], [0], [0, 0, 1, 0], [], []>} : vector<2x128xf32>, vector<128x128xf32>, vector<2x128xf32> -> vector<2x128xf32>
    %160 = vector.extract_strided_slice %100 {offsets = [0, 4], sizes = [16, 2], strides = [1, 1]} : vector<16x16xf32> to vector<16x2xf32>
    %cst_63 = arith.constant dense<0.000000e+00> : vector<16x128xf32>
    %161 = tpu.matmul %160, %159, %cst_63 {dimension_numbers = #tpu.dot_dimension_numbers<[1], [0], [0], [1], [0, 0, 1, 1], [], []>} : vector<16x2xf32>, vector<2x128xf32>, vector<16x128xf32> -> vector<16x128xf32>
    %162 = arith.addf %142, %161 : vector<16x128xf32>
    %163 = vector.extract_strided_slice %101 {offsets = [0, 6], sizes = [128, 2], strides = [1, 1]} : vector<128x16xf32> to vector<128x2xf32>
    %164 = vector.extract_strided_slice %98 {offsets = [6, 0], sizes = [2, 128], strides = [1, 1]} : vector<16x128xf32> to vector<2x128xf32>
    %cst_64 = arith.constant dense<0.000000e+00> : vector<128x128xf32>
    %165 = tpu.matmul %163, %164, %cst_64 {dimension_numbers = #tpu.dot_dimension_numbers<[1], [0], [0], [1], [0, 0, 1, 1], [], []>} : vector<128x2xf32>, vector<2x128xf32>, vector<128x128xf32> -> vector<128x128xf32>
    %cst_65 = arith.constant 0.707106769 : f32
    %166 = vector.broadcast %cst_65 : f32 to vector<128x128xf32>
    %167 = arith.mulf %165, %166 : vector<128x128xf32>
    %cst_66 = arith.constant dense<0xFF800000> : vector<128xf32>
    %168 = vector.multi_reduction <maximumf>, %167, %cst_66 [1] : vector<128x128xf32> to vector<128xf32>
    %169 = vector.shape_cast %168 : vector<128xf32> to vector<128x1xf32>
    %170 = vector.broadcast %169 : vector<128x1xf32> to vector<128x128xf32>
    %171 = arith.subf %167, %170 : vector<128x128xf32>
    %172 = math.exp %171 : vector<128x128xf32>
    %cst_67 = arith.constant dense<0.000000e+00> : vector<128xf32>
    %173 = vector.multi_reduction <add>, %172, %cst_67 [1] : vector<128x128xf32> to vector<128xf32>
    %174 = vector.shape_cast %173 : vector<128xf32> to vector<128x1xf32>
    %175 = tpu.reciprocal %174 {approx = true} : vector<128x1xf32> -> vector<128x1xf32>
    %176 = vector.broadcast %175 : vector<128x1xf32> to vector<128x128xf32>
    %177 = arith.mulf %172, %176 : vector<128x128xf32>
    %178 = vector.extract_strided_slice %99 {offsets = [6, 0], sizes = [2, 128], strides = [1, 1]} : vector<16x128xf32> to vector<2x128xf32>
    %cst_68 = arith.constant dense<0.000000e+00> : vector<2x128xf32>
    %179 = tpu.matmul %178, %177, %cst_68 {dimension_numbers = #tpu.dot_dimension_numbers<[1], [1], [0], [0], [0, 0, 1, 0], [], []>} : vector<2x128xf32>, vector<128x128xf32>, vector<2x128xf32> -> vector<2x128xf32>
    %180 = vector.extract_strided_slice %100 {offsets = [0, 6], sizes = [16, 2], strides = [1, 1]} : vector<16x16xf32> to vector<16x2xf32>
    %cst_69 = arith.constant dense<0.000000e+00> : vector<16x128xf32>
    %181 = tpu.matmul %180, %179, %cst_69 {dimension_numbers = #tpu.dot_dimension_numbers<[1], [0], [0], [1], [0, 0, 1, 1], [], []>} : vector<16x2xf32>, vector<2x128xf32>, vector<16x128xf32> -> vector<16x128xf32>
    %182 = arith.addf %162, %181 : vector<16x128xf32>
    %183 = vector.extract_strided_slice %101 {offsets = [0, 8], sizes = [128, 2], strides = [1, 1]} : vector<128x16xf32> to vector<128x2xf32>
    %184 = vector.extract_strided_slice %98 {offsets = [8, 0], sizes = [2, 128], strides = [1, 1]} : vector<16x128xf32> to vector<2x128xf32>
    %cst_70 = arith.constant dense<0.000000e+00> : vector<128x128xf32>
    %185 = tpu.matmul %183, %184, %cst_70 {dimension_numbers = #tpu.dot_dimension_numbers<[1], [0], [0], [1], [0, 0, 1, 1], [], []>} : vector<128x2xf32>, vector<2x128xf32>, vector<128x128xf32> -> vector<128x128xf32>
    %cst_71 = arith.constant 0.707106769 : f32
    %186 = vector.broadcast %cst_71 : f32 to vector<128x128xf32>
    %187 = arith.mulf %185, %186 : vector<128x128xf32>
    %cst_72 = arith.constant dense<0xFF800000> : vector<128xf32>
    %188 = vector.multi_reduction <maximumf>, %187, %cst_72 [1] : vector<128x128xf32> to vector<128xf32>
    %189 = vector.shape_cast %188 : vector<128xf32> to vector<128x1xf32>
    %190 = vector.broadcast %189 : vector<128x1xf32> to vector<128x128xf32>
    %191 = arith.subf %187, %190 : vector<128x128xf32>
    %192 = math.exp %191 : vector<128x128xf32>
    %cst_73 = arith.constant dense<0.000000e+00> : vector<128xf32>
    %193 = vector.multi_reduction <add>, %192, %cst_73 [1] : vector<128x128xf32> to vector<128xf32>
    %194 = vector.shape_cast %193 : vector<128xf32> to vector<128x1xf32>
    %195 = tpu.reciprocal %194 {approx = true} : vector<128x1xf32> -> vector<128x1xf32>
    %196 = vector.broadcast %195 : vector<128x1xf32> to vector<128x128xf32>
    %197 = arith.mulf %192, %196 : vector<128x128xf32>
    %198 = vector.extract_strided_slice %99 {offsets = [8, 0], sizes = [2, 128], strides = [1, 1]} : vector<16x128xf32> to vector<2x128xf32>
    %cst_74 = arith.constant dense<0.000000e+00> : vector<2x128xf32>
    %199 = tpu.matmul %198, %197, %cst_74 {dimension_numbers = #tpu.dot_dimension_numbers<[1], [1], [0], [0], [0, 0, 1, 0], [], []>} : vector<2x128xf32>, vector<128x128xf32>, vector<2x128xf32> -> vector<2x128xf32>
    %200 = vector.extract_strided_slice %100 {offsets = [0, 8], sizes = [16, 2], strides = [1, 1]} : vector<16x16xf32> to vector<16x2xf32>
    %cst_75 = arith.constant dense<0.000000e+00> : vector<16x128xf32>
    %201 = tpu.matmul %200, %199, %cst_75 {dimension_numbers = #tpu.dot_dimension_numbers<[1], [0], [0], [1], [0, 0, 1, 1], [], []>} : vector<16x2xf32>, vector<2x128xf32>, vector<16x128xf32> -> vector<16x128xf32>
    %202 = arith.addf %182, %201 : vector<16x128xf32>
    %203 = vector.extract_strided_slice %101 {offsets = [0, 10], sizes = [128, 2], strides = [1, 1]} : vector<128x16xf32> to vector<128x2xf32>
    %204 = vector.extract_strided_slice %98 {offsets = [10, 0], sizes = [2, 128], strides = [1, 1]} : vector<16x128xf32> to vector<2x128xf32>
    %cst_76 = arith.constant dense<0.000000e+00> : vector<128x128xf32>
    %205 = tpu.matmul %203, %204, %cst_76 {dimension_numbers = #tpu.dot_dimension_numbers<[1], [0], [0], [1], [0, 0, 1, 1], [], []>} : vector<128x2xf32>, vector<2x128xf32>, vector<128x128xf32> -> vector<128x128xf32>
    %cst_77 = arith.constant 0.707106769 : f32
    %206 = vector.broadcast %cst_77 : f32 to vector<128x128xf32>
    %207 = arith.mulf %205, %206 : vector<128x128xf32>
    %cst_78 = arith.constant dense<0xFF800000> : vector<128xf32>
    %208 = vector.multi_reduction <maximumf>, %207, %cst_78 [1] : vector<128x128xf32> to vector<128xf32>
    %209 = vector.shape_cast %208 : vector<128xf32> to vector<128x1xf32>
    %210 = vector.broadcast %209 : vector<128x1xf32> to vector<128x128xf32>
    %211 = arith.subf %207, %210 : vector<128x128xf32>
    %212 = math.exp %211 : vector<128x128xf32>
    %cst_79 = arith.constant dense<0.000000e+00> : vector<128xf32>
    %213 = vector.multi_reduction <add>, %212, %cst_79 [1] : vector<128x128xf32> to vector<128xf32>
    %214 = vector.shape_cast %213 : vector<128xf32> to vector<128x1xf32>
    %215 = tpu.reciprocal %214 {approx = true} : vector<128x1xf32> -> vector<128x1xf32>
    %216 = vector.broadcast %215 : vector<128x1xf32> to vector<128x128xf32>
    %217 = arith.mulf %212, %216 : vector<128x128xf32>
    %218 = vector.extract_strided_slice %99 {offsets = [10, 0], sizes = [2, 128], strides = [1, 1]} : vector<16x128xf32> to vector<2x128xf32>
    %cst_80 = arith.constant dense<0.000000e+00> : vector<2x128xf32>
    %219 = tpu.matmul %218, %217, %cst_80 {dimension_numbers = #tpu.dot_dimension_numbers<[1], [1], [0], [0], [0, 0, 1, 0], [], []>} : vector<2x128xf32>, vector<128x128xf32>, vector<2x128xf32> -> vector<2x128xf32>
    %220 = vector.extract_strided_slice %100 {offsets = [0, 10], sizes = [16, 2], strides = [1, 1]} : vector<16x16xf32> to vector<16x2xf32>
    %cst_81 = arith.constant dense<0.000000e+00> : vector<16x128xf32>
    %221 = tpu.matmul %220, %219, %cst_81 {dimension_numbers = #tpu.dot_dimension_numbers<[1], [0], [0], [1], [0, 0, 1, 1], [], []>} : vector<16x2xf32>, vector<2x128xf32>, vector<16x128xf32> -> vector<16x128xf32>
    %222 = arith.addf %202, %221 : vector<16x128xf32>
    %223 = vector.extract_strided_slice %101 {offsets = [0, 12], sizes = [128, 2], strides = [1, 1]} : vector<128x16xf32> to vector<128x2xf32>
    %224 = vector.extract_strided_slice %98 {offsets = [12, 0], sizes = [2, 128], strides = [1, 1]} : vector<16x128xf32> to vector<2x128xf32>
    %cst_82 = arith.constant dense<0.000000e+00> : vector<128x128xf32>
    %225 = tpu.matmul %223, %224, %cst_82 {dimension_numbers = #tpu.dot_dimension_numbers<[1], [0], [0], [1], [0, 0, 1, 1], [], []>} : vector<128x2xf32>, vector<2x128xf32>, vector<128x128xf32> -> vector<128x128xf32>
    %cst_83 = arith.constant 0.707106769 : f32
    %226 = vector.broadcast %cst_83 : f32 to vector<128x128xf32>
    %227 = arith.mulf %225, %226 : vector<128x128xf32>
    %cst_84 = arith.constant dense<0xFF800000> : vector<128xf32>
    %228 = vector.multi_reduction <maximumf>, %227, %cst_84 [1] : vector<128x128xf32> to vector<128xf32>
    %229 = vector.shape_cast %228 : vector<128xf32> to vector<128x1xf32>
    %230 = vector.broadcast %229 : vector<128x1xf32> to vector<128x128xf32>
    %231 = arith.subf %227, %230 : vector<128x128xf32>
    %232 = math.exp %231 : vector<128x128xf32>
    %cst_85 = arith.constant dense<0.000000e+00> : vector<128xf32>
    %233 = vector.multi_reduction <add>, %232, %cst_85 [1] : vector<128x128xf32> to vector<128xf32>
    %234 = vector.shape_cast %233 : vector<128xf32> to vector<128x1xf32>
    %235 = tpu.reciprocal %234 {approx = true} : vector<128x1xf32> -> vector<128x1xf32>
    %236 = vector.broadcast %235 : vector<128x1xf32> to vector<128x128xf32>
    %237 = arith.mulf %232, %236 : vector<128x128xf32>
    %238 = vector.extract_strided_slice %99 {offsets = [12, 0], sizes = [2, 128], strides = [1, 1]} : vector<16x128xf32> to vector<2x128xf32>
    %cst_86 = arith.constant dense<0.000000e+00> : vector<2x128xf32>
    %239 = tpu.matmul %238, %237, %cst_86 {dimension_numbers = #tpu.dot_dimension_numbers<[1], [1], [0], [0], [0, 0, 1, 0], [], []>} : vector<2x128xf32>, vector<128x128xf32>, vector<2x128xf32> -> vector<2x128xf32>
    %240 = vector.extract_strided_slice %100 {offsets = [0, 12], sizes = [16, 2], strides = [1, 1]} : vector<16x16xf32> to vector<16x2xf32>
    %cst_87 = arith.constant dense<0.000000e+00> : vector<16x128xf32>
    %241 = tpu.matmul %240, %239, %cst_87 {dimension_numbers = #tpu.dot_dimension_numbers<[1], [0], [0], [1], [0, 0, 1, 1], [], []>} : vector<16x2xf32>, vector<2x128xf32>, vector<16x128xf32> -> vector<16x128xf32>
    %242 = arith.addf %222, %241 : vector<16x128xf32>
    %243 = vector.extract_strided_slice %101 {offsets = [0, 14], sizes = [128, 2], strides = [1, 1]} : vector<128x16xf32> to vector<128x2xf32>
    %244 = vector.extract_strided_slice %98 {offsets = [14, 0], sizes = [2, 128], strides = [1, 1]} : vector<16x128xf32> to vector<2x128xf32>
    %cst_88 = arith.constant dense<0.000000e+00> : vector<128x128xf32>
    %245 = tpu.matmul %243, %244, %cst_88 {dimension_numbers = #tpu.dot_dimension_numbers<[1], [0], [0], [1], [0, 0, 1, 1], [], []>} : vector<128x2xf32>, vector<2x128xf32>, vector<128x128xf32> -> vector<128x128xf32>
    %cst_89 = arith.constant 0.707106769 : f32
    %246 = vector.broadcast %cst_89 : f32 to vector<128x128xf32>
    %247 = arith.mulf %245, %246 : vector<128x128xf32>
    %cst_90 = arith.constant dense<0xFF800000> : vector<128xf32>
    %248 = vector.multi_reduction <maximumf>, %247, %cst_90 [1] : vector<128x128xf32> to vector<128xf32>
    %249 = vector.shape_cast %248 : vector<128xf32> to vector<128x1xf32>
    %250 = vector.broadcast %249 : vector<128x1xf32> to vector<128x128xf32>
    %251 = arith.subf %247, %250 : vector<128x128xf32>
    %252 = math.exp %251 : vector<128x128xf32>
    %cst_91 = arith.constant dense<0.000000e+00> : vector<128xf32>
    %253 = vector.multi_reduction <add>, %252, %cst_91 [1] : vector<128x128xf32> to vector<128xf32>
    %254 = vector.shape_cast %253 : vector<128xf32> to vector<128x1xf32>
    %255 = tpu.reciprocal %254 {approx = true} : vector<128x1xf32> -> vector<128x1xf32>
    %256 = vector.broadcast %255 : vector<128x1xf32> to vector<128x128xf32>
    %257 = arith.mulf %252, %256 : vector<128x128xf32>
    %258 = vector.extract_strided_slice %99 {offsets = [14, 0], sizes = [2, 128], strides = [1, 1]} : vector<16x128xf32> to vector<2x128xf32>
    %cst_92 = arith.constant dense<0.000000e+00> : vector<2x128xf32>
    %259 = tpu.matmul %258, %257, %cst_92 {dimension_numbers = #tpu.dot_dimension_numbers<[1], [1], [0], [0], [0, 0, 1, 0], [], []>} : vector<2x128xf32>, vector<128x128xf32>, vector<2x128xf32> -> vector<2x128xf32>
    %260 = vector.extract_strided_slice %100 {offsets = [0, 14], sizes = [16, 2], strides = [1, 1]} : vector<16x16xf32> to vector<16x2xf32>
    %cst_93 = arith.constant dense<0.000000e+00> : vector<16x128xf32>
    %261 = tpu.matmul %260, %259, %cst_93 {dimension_numbers = #tpu.dot_dimension_numbers<[1], [0], [0], [1], [0, 0, 1, 1], [], []>} : vector<16x2xf32>, vector<2x128xf32>, vector<16x128xf32> -> vector<16x128xf32>
    %262 = arith.addf %242, %261 : vector<16x128xf32>
    %c0_94 = arith.constant 0 : index
    %c1 = arith.constant 1 : index
    %263 = vector.load %arg6[%c0_94, %c1] : memref<16x4xf32, #tpu.memory_space<vmem>>, vector<16x1xf32>
    %264 = vector.broadcast %263 : vector<16x1xf32> to vector<16x128xf32>
    %265 = arith.addf %262, %264 : vector<16x128xf32>
    %266 = vector.broadcast %50 : vector<16x1xf32> to vector<16x128xf32>
    %267 = arith.addf %266, %96 : vector<16x128xf32>
    %268 = arith.addf %267, %265 : vector<16x128xf32>
    %269 = arith.addf %268, %1 : vector<16x128xf32>
    %c0_95 = arith.constant 0 : index
    %c2 = arith.constant 2 : index
    %270 = vector.load %arg6[%c0_95, %c2] : memref<16x4xf32, #tpu.memory_space<vmem>>, vector<16x1xf32>
    %271 = vector.broadcast %270 : vector<16x1xf32> to vector<16x128xf32>
    %272 = arith.mulf %269, %271 : vector<16x128xf32>
    %c0_96 = arith.constant 0 : index
    %c3 = arith.constant 3 : index
    %273 = vector.load %arg6[%c0_96, %c3] : memref<16x4xf32, #tpu.memory_space<vmem>>, vector<16x1xf32>
    %274 = vector.broadcast %273 : vector<16x1xf32> to vector<16x128xf32>
    %275 = arith.addf %272, %274 : vector<16x128xf32>
    %c0_97 = arith.constant 0 : index
    %c0_98 = arith.constant 0 : index
    %c0_99 = arith.constant 0 : index
    %276 = vector.load %arg7[%c0_97, %c0_98, %c0_99] : memref<1x16x128xf32, #tpu.memory_space<vmem>>, vector<1x16x128xf32>
    %277 = vector.shape_cast %276 : vector<1x16x128xf32> to vector<16x128xf32>
    %278 = vector.shape_cast %275 : vector<16x128xf32> to vector<1x16x128xf32>
    tpu.vector_store %arg7[%c0_97, %c0_98, %c0_99], %278 {strides = array<i32>} : memref<1x16x128xf32, #tpu.memory_space<vmem>>, vector<1x16x128xf32>,
    return
  }
  func.func @transform_0(%arg0: i32) -> (i32, i32, i32) {
    %c0_i32 = arith.constant 0 : i32
    %c0_i32_0 = arith.constant 0 : i32
    %c0_i32_1 = arith.constant 0 : i32
    return %arg0, %c0_i32, %c0_i32_0 : i32, i32, i32
  }
  func.func @transform_1(%arg0: i32) -> (i32, i32, i32) {
    %c0_i32 = arith.constant 0 : i32
    %c0_i32_0 = arith.constant 0 : i32
    %c0_i32_1 = arith.constant 0 : i32
    %c0_i32_2 = arith.constant 0 : i32
    return %c0_i32, %c0_i32_0, %c0_i32_1 : i32, i32, i32
  }
  func.func @transform_2(%arg0: i32) -> (i32, i32) {
    %c0_i32 = arith.constant 0 : i32
    %c0_i32_0 = arith.constant 0 : i32
    %c0_i32_1 = arith.constant 0 : i32
    return %c0_i32, %c0_i32_0 : i32, i32
  }
  func.func @transform_3(%arg0: i32) -> (i32, i32) {
    %c0_i32 = arith.constant 0 : i32
    %c0_i32_0 = arith.constant 0 : i32
    %c0_i32_1 = arith.constant 0 : i32
    return %c0_i32, %c0_i32_0 : i32, i32
  }
  func.func @transform_4(%arg0: i32) -> (i32, i32) {
    %c0_i32 = arith.constant 0 : i32
    %c0_i32_0 = arith.constant 0 : i32
    %c0_i32_1 = arith.constant 0 : i32
    return %c0_i32, %c0_i32_0 : i32, i32
  }
  func.func @transform_5(%arg0: i32) -> (i32, i32) {
    %c0_i32 = arith.constant 0 : i32
    %c0_i32_0 = arith.constant 0 : i32
    %c0_i32_1 = arith.constant 0 : i32
    return %c0_i32, %c0_i32_0 : i32, i32
  }
  func.func @transform_6(%arg0: i32) -> (i32, i32, i32) {
    %c0_i32 = arith.constant 0 : i32
    %c0_i32_0 = arith.constant 0 : i32
    %c0_i32_1 = arith.constant 0 : i32
    return %arg0, %c0_i32, %c0_i32_0 : i32, i32, i32
  }
}

</mosaic_0001>

<bundles_post_ra>
// kernel: residual_financial_block_forward.1
= control target key start
LH: loop header
LB: loop body
LE: loop exit
PB: predicated region body
PF: predicated region fallthrough
CT: control target
= control target key end

     0   :  { %s7124_s21 = smov 0   ;;  %s9086_s0 = inlined_call_operand.vmem [shape: f32[2,16,128], index: 0, kind: input, shape index: {}]   ;;  %s9087_s1 = inlined_call_operand.vmem [shape: f32[16,16,128], index: 1, kind: input, shape index: {}]   ;;  %s9088_s2 = inlined_call_operand.vmem [shape: f32[64,16], index: 2, kind: input, shape index: {}]   ;;  %s9089_s3 = inlined_call_operand.vmem [shape: f32[64,1], index: 3, kind: input, shape index: {}]   ;;  %s9090_s4 = inlined_call_operand.vmem [shape: f32[16,16], index: 4, kind: input, shape index: {}]   ;;  %s9091_s5 = inlined_call_operand.vmem [shape: f32[16,4], index: 5, kind: input, shape index: {}]   ;;  %s9092_s6 = inlined_call_operand.vmem [shape: f32[2,16,128], index: 6, kind: output, shape index: {}]  }
   0x1 LB: > { %s5262_s22 = sadd.s32 4294967295, %s7073_s21   ;;  %p5266_p0 = scmp.ge.s32.totalorder %s7073_s21, 1  ;;  %s7073_s21 = sphi %s7124_s21, %s16_s21  }
   0x2   : > { %p212_p1 = scmp.lt.s32.totalorder %s7073_s21, 3 }
   0x4   : > { %p213_p2 = pnand %p5266_p0, %p212_p1 }
   0x6   : > { %216 = sbr.rel (%p213_p2) target bundleno = 4662 (0x1236), region = 44 }
   0xd   : > { %p242_p3 = scmp.lt.s32.totalorder %s5262_s22, 1  ;;  %vm585_vm0 = vcmask 130048   ;;  %v650_v0 = vld [vmem:[%s9088_s2] sm:$0xff]  ;;  %v9093_v1 = vmov 0   ;;  %v660_v2 = vld [vmem:[%s9089_s3 + $0x10] sm:$0xff]  ;;  %v661_v3 = vld [vmem:[%s9089_s3 + $0x18] sm:$0xff] }
   0xe   : > { %5753 = vmatprep.mubr.msk.f32.mxu0 %vm585_vm0, %v650_v0  ;;  %6525 = vset.pattern.permute.xlu0 %v9093_v1  ;;  %v662_v7 = vld [vmem:[%s9089_s3 + $0x20] sm:$0xff]  ;;  %v651_v8 = vld [vmem:[%s9088_s2 + $0x8] sm:$0xff]  ;;  %v652_v9 = vld [vmem:[%s9088_s2 + $0x10] sm:$0xff]  ;;  %vm972_vm1 = vcmask 1041408   ;;  %vm923_vm2 = vcmask 15360   ;;  %s7076_s28 = smov 126  }
   0xf   : > { %s9139_s22 = smov (!%p242_p3, %s5262_s22), 1  ;;  %678 = vperm.xlu0 %6525, %v660_v2   ;;  %v653_v10 = vld [vmem:[%s9088_s2 + $0x18] sm:$0xff]  ;;  %v654_v11 = vld [vmem:[%s9088_s2 + $0x20] sm:$0xff]  ;;  %v655_v12 = vld [vmem:[%s9088_s2 + $0x28] sm:$0xff]  ;;  %s7078_s10 = smov 122   ;;  %vm7079_vm3 = vmmov 0  }
  0x10   : > { %s5441_s27 = sshll.u32 %s9139_s22, 4  ;;  %v656_v26 = vld [vmem:[%s9088_s2 + $0x30] sm:$0xff]  ;;  %v657_v27 = vld [vmem:[%s9088_s2 + $0x38] sm:$0xff]  ;;  %s7081_s13 = smov 124   ;;  %vm425_vm4 = vcmask 130112   ;;  %vm562_vm5 = vcmask 1041409  }
  0x11   : > { %s7151_s8 = scalar_lea.vmem %s9086_s0, %s5441_s27  ;;  %s7082_s14 = smov 120   ;;  %vm564_vm6 = vcmask 1042434   ;;  %vm566_vm7 = vcmask 1043459   ;;  %vm568_vm8 = vcmask 1044484   ;;  %vm570_vm9 = vcmask 1045509  }
  0x12   : > { %v252_v4 = vld [vmem:[%s7151_s8] sm:$0xff]  ;;  %v253_v5 = vld [vmem:[%s7151_s8 + $0x8] sm:$0xff]  ;;  %s7083_s25 = smov 118   ;;  %s7084_s26 = smov 116   ;;  %vm572_vm10 = vcmask 1046534   ;;  %vm574_vm11 = vcmask 1047559  }
  0x13   : > { %v6293_v6 = vpack.c.bf16 %v253_v5, %v252_v4  ;;  %683 = vperm.xlu0 %6525, %v661_v3   ;;  %s7085_s9 = smov 114   ;;  %s251_s23 = scalar_lea.vmem %s9092_s6, %s5441_s27 }
  0x15   : > { %6294 = vmatprep.subr.bf16.mxu0 %v6293_v6 }
  0x16   : > { %6296 = vmatpush3.bf16.msra.mxu0 %v6293_v6 }
  0x17   : > { %688 = vperm.xlu0 %6525, %v662_v7  }
  0x19   : > { %5754 = vmatmul.mubr.msk.f32.vlgmr.msra.gmra.mrb[0].mxu0 %vm585_vm0, %v651_v8 }
  0x1a   : > { %5756 = vmatprep.mubr.msk.f32.mxu0 %vm585_vm0, %v652_v9 }
  0x1d   : > { %5757 = vmatmul.mubr.msk.f32.gmra.mrb[2].mxu0 %vm585_vm0, %v653_v10 }
  0x1e   : > { %5759 = vmatprep.mubr.msk.f32.mxu0 %vm585_vm0, %v654_v11 }
  0x21   : > { %5760 = vmatmul.mubr.msk.f32.gmra.mrb[4].mxu0 %vm585_vm0, %v655_v12 }
  0x22   : > { %5762 = vmatprep.mubr.msk.f32.mxu0 %vm585_vm0, %v656_v26 }
  0x25   : > { %5763 = vmatmul.mubr.msk.f32.gmra.mrb[6].mxu0 %vm585_vm0, %v657_v27 }
  0x8e   : > { %v679_v13 = vpop.permute.xlu0 %678 }
  0x92   : > { %v684_v16 = vpop.permute.xlu0 %683 }
  0x96   : > { %v689_v21 = vpop.permute.xlu0 %688 }
  0xec   : > { %v7178_v14 = vpop.f32.mrb[0].mxu0 }
  0xed   : > { %9110 = vst [vmem:[#allocation2_spill] sm:$0xff] %v7178_v14  ;;  %v7180_v15 = vpop.f32.mrb[1].mxu0 }
  0xee   : > { %9111 = vst [vmem:[#allocation3_spill] sm:$0xff] %v7180_v15 }
  0xf0   : > { %v5758_v17 = vpop.f32.mrb[2].mxu0 }
  0xf1   : > { %v806_v18 = vpop.f32.mrb[3].mxu0  ;;  %v812_v23 = vadd.f32 %v5758_v17, %v684_v16 }
  0xf2   : > { %v807_v19 = vadd.f32 %v806_v18, %v679_v13 }
  0xf4   : > { %v7182_v20 = vpop.f32.mrb[4].mxu0  ;;  %891 = vxpose.xlu1.b32.start [1/2] (short) %v807_v19, 128 }
  0xf5   : > { %9112 = vst [vmem:[#allocation4_spill] sm:$0xff] %v7182_v20  ;;  %v816_v22 = vpop.f32.mrb[5].mxu0 }
  0xf6   : > { %v7184_v24 = vadd.f32 %v816_v22, %v689_v21 }
  0xf8   : > { %5765 = vmatprep.subr.msk.mxu1 %vm972_vm1, %v7184_v24  ;;  %892 = vxpose.xlu1.b32.end [2/2] (short) %v812_v23, 128  ;;  %v1383_v25 = vrot.slane %v7184_v24, 2  ;;  %v7306_v52 = vpop.f32.mrb[6].mxu0 }
  0xf9   : > { %5766 = vmatpush3.msk.msra.mxu1 %vm972_vm1, %v7184_v24  ;;  %9116 = vst [vmem:[#allocation8_spill] sm:$0xff] %v7306_v52  ;;  %v7308_v54 = vpop.f32.mrb[7].mxu0 }
  0xfa   : > { %5826 = vmatprep.subr.msk.mxu0 %vm972_vm1, %v1383_v25 }
  0xfb   : > { %5827 = vmatpush3.msk.msra.mxu0 %vm972_vm1, %v1383_v25 }
 0x116   : > { %6526 = vset.pattern.permute.xlu1 %v9093_v1 }
 0x174   : > { %v7202_v28 = vpop.trf.xlu1 }
 0x175   : > { %5767 = vmatprep.mubr.msk.f32.mxu1 %vm923_vm2, %v7202_v28  ;;  %1351 = vrot.lane.b32.xlu1 %v7202_v28, %s7076_s28 }
 0x178   : > { %v7208_v29 = vpop.trf.xlu1 }
 0x179   : > { %5768 = vmatmul.mubr.msk.f32.vlgmr.msra.gmra.mrb[0].mxu1 %vm923_vm2, %v7208_v29  ;;  %1353 = vrot.lane.b32.xlu0 %v7208_v29, %s7076_s28 }
 0x17c   : > { %v7214_v30 = vpop.trf.xlu1 }
 0x17d   : > { %5770 = vmatprep.mubr.msk.f32.mxu1 %vm923_vm2, %v7214_v30  ;;  %1355 = vrot.lane.b32.xlu0 %v7214_v30, %s7076_s28 }
 0x180   : > { %v7220_v31 = vpop.trf.xlu1 }
 0x181   : > { %5771 = vmatmul.mubr.msk.f32.gmra.mrb[2].mxu1 %vm923_vm2, %v7220_v31  ;;  %1357 = vrot.lane.b32.xlu0 %v7220_v31, %s7076_s28 }
 0x184   : > { %v7226_v32 = vpop.trf.xlu1 }
 0x185   : > { %1359 = vrot.lane.b32.xlu0 %v7226_v32, %s7076_s28  ;;  %5773 = vmatprep.mubr.msk.f32.mxu1 %vm923_vm2, %v7226_v32 }
 0x188   : > { %v7232_v33 = vpop.trf.xlu1 }
 0x189   : > { %1361 = vrot.lane.b32.xlu0 %v7232_v33, %s7076_s28  ;;  %5774 = vmatmul.mubr.msk.f32.gmra.mrb[4].mxu1 %vm923_vm2, %v7232_v33 }
 0x18c   : > { %v7238_v34 = vpop.trf.xlu1 }
 0x18d   : > { %1363 = vrot.lane.b32.xlu0 %v7238_v34, %s7076_s28  ;;  %5776 = vmatprep.mubr.msk.f32.mxu1 %vm923_vm2, %v7238_v34 }
 0x190   : > { %v7244_v35 = vpop.trf.xlu1 }
 0x191   : > { %1365 = vrot.lane.b32.xlu0 %v7244_v35, %s7076_s28  ;;  %5777 = vmatmul.mubr.msk.f32.gmra.mrb[6].mxu1 %vm923_vm2, %v7244_v35 }
 0x194   : > { %v7250_v36 = vpop.trf.xlu1 }
 0x195   : > { %1367 = vrot.lane.b32.xlu0 %v7250_v36, %s7076_s28  ;;  %5779 = vmatprep.mubr.msk.f32.mxu1 %vm923_vm2, %v7250_v36 }
 0x198   : > { %v7256_v37 = vpop.trf.xlu1 }
 0x199   : > { %1369 = vrot.lane.b32.xlu0 %v7256_v37, %s7076_s28  ;;  %5780 = vmatmul.mubr.msk.f32.gmra.mrb[8].mxu1 %vm923_vm2, %v7256_v37 }
 0x19c   : > { %v7262_v38 = vpop.trf.xlu1 }
 0x19d   : > { %1371 = vrot.lane.b32.xlu0 %v7262_v38, %s7076_s28  ;;  %5782 = vmatprep.mubr.msk.f32.mxu1 %vm923_vm2, %v7262_v38 }
 0x1a0   : > { %v7268_v39 = vpop.trf.xlu1 }
 0x1a1   : > { %1373 = vrot.lane.b32.xlu0 %v7268_v39, %s7076_s28  ;;  %5783 = vmatmul.mubr.msk.f32.gmra.mrb[10].mxu1 %vm923_vm2, %v7268_v39 }
 0x1a4   : > { %v7274_v40 = vpop.trf.xlu1 }
 0x1a5   : > { %9113 = vst [vmem:[#allocation5_spill] sm:$0xff] %v7274_v40  ;;  %1375 = vrot.lane.b32.xlu0 %v7274_v40, %s7076_s28  ;;  %5785 = vmatprep.mubr.msk.f32.mxu1 %vm923_vm2, %v7274_v40 }
 0x1a8   : > { %v7280_v41 = vpop.trf.xlu1 }
 0x1a9   : > { %1377 = vrot.lane.b32.xlu0 %v7280_v41, %s7076_s28  ;;  %5786 = vmatmul.mubr.msk.f32.gmra.mrb[12].mxu1 %vm923_vm2, %v7280_v41 }
 0x1ac   : > { %v7286_v42 = vpop.trf.xlu1 }
 0x1ad   : > { %9114 = vst [vmem:[#allocation6_spill] sm:$0xff] %v7286_v42  ;;  %1379 = vrot.lane.b32.xlu0 %v7286_v42, %s7076_s28  ;;  %5788 = vmatprep.mubr.msk.f32.mxu1 %vm923_vm2, %v7286_v42 }
 0x1b0   : > { %v7292_v43 = vpop.trf.xlu1 }
 0x1b1   : > { %9115 = vst [vmem:[#allocation7_spill] sm:$0xff] %v7292_v43  ;;  %1381 = vrot.lane.b32.xlu0 %v7292_v43, %s7076_s28  ;;  %5789 = vmatmul.mubr.msk.f32.gmra.mrb[14].mxu1 %vm923_vm2, %v7292_v43 }
 0x1e7   : > { %v1352_v44 = vpop.permute.xlu1 %1351 }
 0x1e8   : > { %5828 = vmatprep.mubr.msk.f32.mxu0 %vm923_vm2, %v1352_v44 }
 0x1eb   : > { %v1354_v45 = vpop.permute.xlu0 %1353 }
 0x1ec   : > { %5829 = vmatmul.mubr.msk.f32.vlgmr.msra.gmra.mrb[8].mxu0 %vm923_vm2, %v1354_v45 }
 0x1ef   : > { %v1356_v46 = vpop.permute.xlu0 %1355 }
 0x1f0   : > { %5831 = vmatprep.mubr.msk.f32.mxu0 %vm923_vm2, %v1356_v46 }
 0x1f3   : > { %v1358_v47 = vpop.permute.xlu0 %1357 }
 0x1f4   : > { %5832 = vmatmul.mubr.msk.f32.gmra.mrb[10].mxu0 %vm923_vm2, %v1358_v47 }
 0x1f7   : > { %v1360_v48 = vpop.permute.xlu0 %1359 }
 0x1f8   : > { %5834 = vmatprep.mubr.msk.f32.mxu0 %vm923_vm2, %v1360_v48 }
 0x1fb   : > { %v1362_v49 = vpop.permute.xlu0 %1361 }
 0x1fc   : > { %5835 = vmatmul.mubr.msk.f32.gmra.mrb[12].mxu0 %vm923_vm2, %v1362_v49 }
 0x1ff   : > { %v1364_v50 = vpop.permute.xlu0 %1363 }
 0x200   : > { %5837 = vmatprep.mubr.msk.f32.mxu0 %vm923_vm2, %v1364_v50 }
 0x203   : > { %v1366_v51 = vpop.permute.xlu0 %1365 }
 0x204   : > { %5838 = vmatmul.mubr.msk.f32.gmra.mrb[14].mxu0 %vm923_vm2, %v1366_v51 }
 0x207   : > { %v1368_v53 = vpop.permute.xlu0 %1367 }
 0x208   : > { %5840 = vmatprep.mubr.msk.f32.mxu0 %vm923_vm2, %v1368_v53 }
 0x20b   : > { %v1370_v55 = vpop.permute.xlu0 %1369 }
 0x20c   : > { %5841 = vmatmul.mubr.msk.f32.gmra.mrb[16].mxu0 %vm923_vm2, %v1370_v55 }
 0x20f   : > { %v1372_v56 = vpop.permute.xlu0 %1371 }
 0x210   : > { %5843 = vmatprep.mubr.msk.f32.mxu0 %vm923_vm2, %v1372_v56 }
 0x213   : > { %v1374_v57 = vpop.permute.xlu0 %1373 }
 0x214   : > { %5844 = vmatmul.mubr.msk.f32.gmra.mrb[18].mxu0 %vm923_vm2, %v1374_v57 }
 0x217   : > { %v1376_v58 = vpop.permute.xlu0 %1375 }
 0x218   : > { %5846 = vmatprep.mubr.msk.f32.mxu0 %vm923_vm2, %v1376_v58 }
 0x21b   : > { %v1378_v59 = vpop.permute.xlu0 %1377 }
 0x21c   : > { %5847 = vmatmul.mubr.msk.f32.gmra.mrb[20].mxu0 %vm923_vm2, %v1378_v59 }
 0x21f   : > { %v1380_v60 = vpop.permute.xlu0 %1379 }
 0x220   : > { %5849 = vmatprep.mubr.msk.f32.mxu0 %vm923_vm2, %v1380_v60 }
 0x223   : > { %v1382_v61 = vpop.permute.xlu0 %1381 }
 0x224   : > { %5850 = vmatmul.mubr.msk.f32.gmra.mrb[22].mxu0 %vm923_vm2, %v1382_v61 }
 0x24c   : > { %v5769_v62 = vpop.f32.mrb[0].mxu1 }
 0x24d   : > { %v1042_v63 = vpop.f32.mrb[1].mxu1  ;;  %v7321_v2 = vmul.f32 0.70710677, %v5769_v62 }
 0x24e   : > { %v7318_v0 = vmul.f32 0.70710677, %v1042_v63 }
 0x250   : > { %1137 = vmax.xlane.f32.xlu0 %v7318_v0 }
 0x254   : > { %v5772_v3 = vpop.f32.mrb[2].mxu1  ;;  %1139 = vmax.xlane.f32.xlu0 %v7321_v2 }
 0x255   : > { %v1052_v4 = vpop.f32.mrb[3].mxu1  ;;  %v7347_v47 = vmul.f32 0.70710677, %v5772_v3 }
 0x256   : > { %v7324_v5 = vmul.f32 0.70710677, %v1052_v4 }
 0x258   : > { %1141 = vmax.xlane.f32.xlu0 %v7324_v5 }
 0x25c   : > { %v5775_v6 = vpop.f32.mrb[4].mxu1 }
 0x25d   : > { %v1062_v7 = vpop.f32.mrb[5].mxu1  ;;  %v7355_v51 = vmul.f32 0.70710677, %v5775_v6 }
 0x25e   : > { %v7359_v55 = vmul.f32 0.70710677, %v1062_v7 }
 0x264   : > { %v5778_v8 = vpop.f32.mrb[6].mxu1 }
 0x265   : > { %v1072_v9 = vpop.f32.mrb[7].mxu1  ;;  %v7367_v59 = vmul.f32 0.70710677, %v5778_v8 }
 0x266   : > { %v7371_v61 = vmul.f32 0.70710677, %v1072_v9 }
 0x26c   : > { %v5781_v10 = vpop.f32.mrb[8].mxu1 }
 0x26d   : > { %v1082_v11 = vpop.f32.mrb[9].mxu1  ;;  %v7379_v4 = vmul.f32 0.70710677, %v5781_v10 }
 0x26e   : > { %v7383_v7 = vmul.f32 0.70710677, %v1082_v11 }
 0x274   : > { %v5784_v12 = vpop.f32.mrb[10].mxu1 }
 0x275   : > { %v1092_v13 = vpop.f32.mrb[11].mxu1 }
 0x276   : > { %v7395_v11 = vmul.f32 0.70710677, %v1092_v13 }
 0x27c   : > { %v7327_v16 = vpop.f32.mrb[12].mxu1 }
 0x27d   : > { %v7329_v17 = vpop.f32.mrb[13].mxu1 }
 0x284   : > { %v7331_v18 = vpop.f32.mrb[14].mxu1 }
 0x285   : > { %v7333_v19 = vpop.f32.mrb[15].mxu1 }
 0x2bf   : > { %v5830_v21 = vpop.f32.mrb[8].mxu0 }
 0x2c0   : > { %v7335_v22 = vmul.f32 0.70710677, %v5830_v21  ;;  %v1484_v23 = vpop.f32.mrb[9].mxu0 }
 0x2c1   : > { %v7337_v25 = vmul.f32 0.70710677, %v1484_v23 }
 0x2c2   : > { %1581 = vmax.xlane.f32.xlu1 %v7335_v22 }
 0x2c3   : > { %1579 = vmax.xlane.f32.xlu0 %v7337_v25 }
 0x2c7   : > { %v5833_v26 = vpop.f32.mrb[10].mxu0 }
 0x2c8   : > { %v7341_v27 = vmul.f32 0.70710677, %v5833_v26  ;;  %v1494_v44 = vpop.f32.mrb[11].mxu0  ;;  %v7391_v26 = vmul.f32 0.70710677, %v5784_v12 }
 0x2c9   : > { %v7344_v45 = vmul.f32 0.70710677, %v1494_v44 }
 0x2ca   : > { %1585 = vmax.xlane.f32.xlu0 %v7341_v27 }
 0x2ce   : > { %1583 = vmax.xlane.f32.xlu0 %v7344_v45 }
 0x2cf   : > { %v5836_v46 = vpop.f32.mrb[12].mxu0 }
 0x2d0   : > { %v7349_v48 = vmul.f32 0.70710677, %v5836_v46  ;;  %v1504_v49 = vpop.f32.mrb[13].mxu0 }
 0x2d1   : > { %v7353_v50 = vmul.f32 0.70710677, %v1504_v49 }
 0x2d2   : > { %1143 = vmax.xlane.f32.xlu0 %v7347_v47  ;;  %1589 = vmax.xlane.f32.xlu1 %v7349_v48 }
 0x2d6   : > { %1147 = vmax.xlane.f32.xlu1 %v7355_v51  ;;  %1587 = vmax.xlane.f32.xlu0 %v7353_v50 }
 0x2d7   : > { %v5839_v53 = vpop.f32.mrb[14].mxu0 }
 0x2d8   : > { %v7361_v56 = vmul.f32 0.70710677, %v5839_v53  ;;  %v1514_v57 = vpop.f32.mrb[15].mxu0 }
 0x2d9   : > { %v7365_v58 = vmul.f32 0.70710677, %v1514_v57  ;;  %v7405_v57 = vmul.f32 0.70710677, %v7327_v16 }
 0x2da   : > { %1145 = vmax.xlane.f32.xlu0 %v7359_v55  ;;  %1593 = vmax.xlane.f32.xlu1 %v7361_v56 }
 0x2dd   : > { %v1138_v8 = vpop.xlane.xlu0 %1137 }
 0x2de   : > { %1151 = vmax.xlane.f32.xlu1 %v7367_v59  ;;  %1591 = vmax.xlane.f32.xlu0 %v7365_v58  ;;  %v1169_v12 = vsub.f32 %v7318_v0, %v1138_v8  ;;  %v7420_v8 = vmul.f32 0.70710677, %v7331_v18 }
 0x2df   : > { %v5842_v60 = vpop.f32.mrb[16].mxu0 }
 0x2e0   : > { %v7373_v62 = vmul.f32 0.70710677, %v5842_v60  ;;  %v1524_v63 = vpop.f32.mrb[17].mxu0  ;;  %v1185_v13 = vmul.f32 1.442695, %v1169_v12 }
 0x2e1   : > { %v7377_v3 = vmul.f32 0.70710677, %v1524_v63  ;;  %v1140_v10 = vpop.xlane.xlu0 %1139 }
 0x2e2   : > { %1149 = vmax.xlane.f32.xlu0 %v7371_v61  ;;  %1597 = vmax.xlane.f32.xlu1 %v7373_v62  ;;  %6533 = vpow2.f32 %v1185_v13 }
 0x2e5   : > { %v1142_v60 = vpop.xlane.xlu0 %1141 }
 0x2e6   : > { %1155 = vmax.xlane.f32.xlu1 %v7379_v4  ;;  %1595 = vmax.xlane.f32.xlu0 %v7377_v3  ;;  %v1171_v63 = vsub.f32 %v7324_v5, %v1142_v60  ;;  %v7425_v5 = vmul.f32 0.70710677, %v7333_v19  ;;  %v1170_v60 = vsub.f32 %v7321_v2, %v1140_v10 }
 0x2e7   : > { %v5845_v6 = vpop.f32.mrb[18].mxu0 }
 0x2e8   : > { %v7385_v9 = vmul.f32 0.70710677, %v5845_v6  ;;  %v1534_v21 = vpop.f32.mrb[19].mxu0  ;;  %v1189_v16 = vmul.f32 1.442695, %v1171_v63 }
 0x2e9   : > { %v7389_v23 = vmul.f32 0.70710677, %v1534_v21  ;;  %v7411_v21 = vmul.f32 0.70710677, %v7329_v17 }
 0x2ea   : > { %1153 = vmax.xlane.f32.xlu0 %v7383_v7  ;;  %1601 = vmax.xlane.f32.xlu1 %v7385_v9  ;;  %6535 = vpow2.f32 %v1189_v16  ;;  %v1187_v16 = vmul.f32 1.442695, %v1170_v60 }
 0x2ec   : > { %v7428_v17 = vpop.eup %6533 }
 0x2ee   : > { %1159 = vmax.xlane.f32.xlu1 %v7391_v26  ;;  %1599 = vmax.xlane.f32.xlu0 %v7389_v23 }
 0x2ef   : > { %v5848_v44 = vpop.f32.mrb[20].mxu0 }
 0x2f0   : > { %v7397_v46 = vmul.f32 0.70710677, %v5848_v44  ;;  %v1544_v49 = vpop.f32.mrb[21].mxu0 }
 0x2f1   : > { %v7401_v53 = vmul.f32 0.70710677, %v1544_v49 }
 0x2f2   : > { %1157 = vmax.xlane.f32.xlu0 %v7395_v11  ;;  %1605 = vmax.xlane.f32.xlu1 %v7397_v46 }
 0x2f4   : > { %v7431_v12 = vpop.eup %6535 }
 0x2f6   : > { %1163 = vmax.xlane.f32.xlu1 %v7405_v57  ;;  %1603 = vmax.xlane.f32.xlu0 %v7401_v53 }
 0x2f7   : > { %v5851_v6 = vpop.f32.mrb[22].mxu0 }
 0x2f8   : > { %v7413_v44 = vmul.f32 0.70710677, %v5851_v6  ;;  %v1554_v49 = vpop.f32.mrb[23].mxu0 }
 0x2f9   : > { %v7417_v0 = vmul.f32 0.70710677, %v1554_v49 }
 0x2fa   : > { %1161 = vmax.xlane.f32.xlu0 %v7411_v21  ;;  %1609 = vmax.xlane.f32.xlu1 %v7413_v44 }
 0x2fe   : > { %1167 = vmax.xlane.f32.xlu1 %v7420_v8  ;;  %1607 = vmax.xlane.f32.xlu0 %v7417_v0 }
 0x302   : > { %1165 = vmax.xlane.f32.xlu0 %v7425_v5 }
 0x306   : > { %1217 = vadd.xlane.f32.xlu0 %v7428_v17 }
 0x30a   : > { %1221 = vadd.xlane.f32.xlu0 %v7431_v12 }
 0x34f   : > { %v1582_v18 = vpop.xlane.xlu1 %1581 }
 0x350   : > { %v1612_v13 = vsub.f32 %v7335_v22, %v1582_v18  ;;  %v1580_v63 = vpop.xlane.xlu0 %1579 }
 0x351   : > { %v1611_v6 = vsub.f32 %v7337_v25, %v1580_v63 }
 0x352   : > { %v1629_v19 = vmul.f32 1.442695, %v1612_v13 }
 0x353   : > { %v1627_v49 = vmul.f32 1.442695, %v1611_v6 }
 0x354   : > { %6537 = vpow2.f32 %v1629_v19 }
 0x355   : > { %6539 = vpow2.f32 %v1627_v49 }
 0x356   : > { %6541 = vpow2.f32 %v1187_v16 }
 0x357   : > { %v1586_v1 = vpop.xlane.xlu0 %1585 }
 0x358   : > { %v1614_v15 = vsub.f32 %v7341_v27, %v1586_v1 }
 0x35a   : > { %v1633_v14 = vmul.f32 1.442695, %v1614_v15 }
 0x35b   : > { %v1584_v52 = vpop.xlane.xlu0 %1583 }
 0x35c   : > { %6543 = vpow2.f32 %v1633_v14  ;;  %v1613_v6 = vsub.f32 %v7344_v45, %v1584_v52 }
 0x35e   : > { %v7438_v20 = vpop.eup %6537 }
 0x35f   : > { %v7440_v2 = vpop.eup %6539  ;;  %v1144_v22 = vpop.xlane.xlu0 %1143  ;;  %1661 = vadd.xlane.f32.xlu1 %v7438_v20 }
 0x360   : > { %v1590_v10 = vpop.xlane.xlu1 %1589  ;;  %v1172_v25 = vsub.f32 %v7347_v47, %v1144_v22  ;;  %1659 = vadd.xlane.f32.xlu0 %v7440_v2  ;;  %v7446_v60 = vpop.eup %6541 }
 0x361   : > { %v1616_v18 = vsub.f32 %v7349_v48, %v1590_v10  ;;  %v1631_v10 = vmul.f32 1.442695, %v1613_v6 }
 0x362   : > { %v1191_v1 = vmul.f32 1.442695, %v1172_v25 }
 0x363   : > { %v1588_v27 = vpop.xlane.xlu0 %1587  ;;  %1219 = vadd.xlane.f32.xlu1 %v7446_v60  ;;  %v1637_v14 = vmul.f32 1.442695, %v1616_v18 }
 0x364   : > { %v1148_v15 = vpop.xlane.xlu1 %1147  ;;  %6545 = vpow2.f32 %v1191_v1  ;;  %v1615_v45 = vsub.f32 %v7353_v50, %v1588_v27 }
 0x365   : > { %v1174_v13 = vsub.f32 %v7355_v51, %v1148_v15  ;;  %6547 = vpow2.f32 %v1637_v14 }
 0x366   : > { %v7450_v63 = vpop.eup %6543 }
 0x367   : > { %v1195_v47 = vmul.f32 1.442695, %v1174_v13  ;;  %v1146_v19 = vpop.xlane.xlu0 %1145  ;;  %1665 = vadd.xlane.f32.xlu1 %v7450_v63 }
 0x368   : > { %v1594_v48 = vpop.xlane.xlu1 %1593  ;;  %v1173_v49 = vsub.f32 %v7359_v55, %v1146_v19  ;;  %v1635_v19 = vmul.f32 1.442695, %v1615_v45 }
 0x369   : > { %v1618_v16 = vsub.f32 %v7361_v56, %v1594_v48  ;;  %6549 = vpow2.f32 %v1195_v47 }
 0x36a   : > { %v1193_v22 = vmul.f32 1.442695, %v1173_v49 }
 0x36b   : > { %v1592_v18 = vpop.xlane.xlu0 %1591  ;;  %v1641_v51 = vmul.f32 1.442695, %v1618_v16 }
 0x36c   : > { %v1152_v25 = vpop.xlane.xlu1 %1151  ;;  %6551 = vpow2.f32 %v1193_v22 }
 0x36d   : > { %v1176_v1 = vsub.f32 %v7367_v59, %v1152_v25  ;;  %6553 = vpow2.f32 %v1631_v10 }
 0x36e   : > { %v7457_v52 = vpop.eup %6545  ;;  %6555 = vpow2.f32 %v1641_v51 }
 0x36f   : > { %v1199_v15 = vmul.f32 1.442695, %v1176_v1  ;;  %v1150_v14 = vpop.xlane.xlu0 %1149  ;;  %1223 = vadd.xlane.f32.xlu1 %v7457_v52  ;;  %v7463_v6 = vpop.eup %6547 }
 0x370   : > { %v1598_v13 = vpop.xlane.xlu1 %1597  ;;  %v1175_v55 = vsub.f32 %v7371_v61, %v1150_v14  ;;  %v9096_v61 = vmov 0.0|0.0  }
 0x371   : > { %v1620_v56 = vsub.f32 %v7373_v62, %v1598_v13  ;;  %6557 = vpow2.f32 %v1199_v15  ;;  %6321 = vmatprep.subr.bf16.mxu0 %v9096_v61  ;;  %6297 = vmatprep.subr.bf16.mxu1 %v9096_v61  ;;  %v1617_v62 = vsub.f32 %v7365_v58, %v1592_v18 }
 0x372   : > { %v1197_v47 = vmul.f32 1.442695, %v1175_v55 }
 0x373   : > { %v1596_v48 = vpop.xlane.xlu0 %1595  ;;  %1669 = vadd.xlane.f32.xlu1 %v7463_v6  ;;  %v1645_v50 = vmul.f32 1.442695, %v1620_v56  ;;  %v7467_v49 = vpop.eup %6549  ;;  %v1639_v14 = vmul.f32 1.442695, %v1617_v62 }
 0x374   : > { %v1156_v59 = vpop.xlane.xlu1 %1155  ;;  %6559 = vpow2.f32 %v1197_v47  ;;  %v1619_v56 = vsub.f32 %v7377_v3, %v1596_v48 }
 0x375   : > { %v1178_v27 = vsub.f32 %v7379_v4, %v1156_v59  ;;  %6561 = vpow2.f32 %v1635_v19 }
 0x376   : > { %v7469_v16 = vpop.eup %6551  ;;  %6563 = vpow2.f32 %v1645_v50 }
 0x377   : > { %v1203_v22 = vmul.f32 1.442695, %v1178_v27  ;;  %v1154_v10 = vpop.xlane.xlu0 %1153  ;;  %1227 = vadd.xlane.f32.xlu1 %v7467_v49  ;;  %1225 = vadd.xlane.f32.xlu0 %v7469_v16  ;;  %v7478_v1 = vpop.eup %6553 }
 0x378   : > { %v1602_v25 = vpop.xlane.xlu1 %1601  ;;  %v1177_v4 = vsub.f32 %v7383_v7, %v1154_v10  ;;  %v7480_v45 = vpop.eup %6555  ;;  %v1643_v10 = vmul.f32 1.442695, %v1619_v56 }
 0x379   : > { %v1622_v51 = vsub.f32 %v7385_v9, %v1602_v25  ;;  %6565 = vpow2.f32 %v1203_v22 }
 0x37a   : > { %v1201_v15 = vmul.f32 1.442695, %v1177_v4 }
 0x37b   : > { %v1600_v18 = vpop.xlane.xlu0 %1599  ;;  %1673 = vadd.xlane.f32.xlu1 %v7480_v45  ;;  %1663 = vadd.xlane.f32.xlu0 %v7478_v1  ;;  %v1649_v13 = vmul.f32 1.442695, %v1622_v51  ;;  %v7485_v7 = vpop.eup %6557 }
 0x37c   : > { %v1160_v58 = vpop.xlane.xlu1 %1159  ;;  %6567 = vpow2.f32 %v1201_v15  ;;  %v1621_v51 = vsub.f32 %v7389_v23, %v1600_v18 }
 0x37d   : > { %v1180_v55 = vsub.f32 %v7391_v26, %v1160_v58  ;;  %6569 = vpow2.f32 %v1639_v14 }
 0x37e   : > { %v7487_v9 = vpop.eup %6559  ;;  %6571 = vpow2.f32 %v1649_v13 }
 0x37f   : > { %v1207_v47 = vmul.f32 1.442695, %v1180_v55  ;;  %v1158_v19 = vpop.xlane.xlu0 %1157  ;;  %1231 = vadd.xlane.f32.xlu1 %v7485_v7  ;;  %1229 = vadd.xlane.f32.xlu0 %v7487_v9  ;;  %v7494_v26 = vpop.eup %6561 }
 0x380   : > { %v1606_v59 = vpop.xlane.xlu1 %1605  ;;  %v1179_v50 = vsub.f32 %v7395_v11, %v1158_v19  ;;  %v7496_v62 = vpop.eup %6563  ;;  %v1647_v19 = vmul.f32 1.442695, %v1621_v51 }
 0x381   : > { %v1624_v27 = vsub.f32 %v7397_v46, %v1606_v59  ;;  %6573 = vpow2.f32 %v1207_v47 }
 0x382   : > { %v1205_v22 = vmul.f32 1.442695, %v1179_v50 }
 0x383   : > { %v1604_v48 = vpop.xlane.xlu0 %1603  ;;  %1677 = vadd.xlane.f32.xlu1 %v7496_v62  ;;  %1667 = vadd.xlane.f32.xlu0 %v7494_v26  ;;  %v1653_v25 = vmul.f32 1.442695, %v1624_v27  ;;  %v7501_v11 = vpop.eup %6565 }
 0x384   : > { %v1164_v3 = vpop.xlane.xlu1 %1163  ;;  %6575 = vpow2.f32 %v1205_v22  ;;  %v1623_v23 = vsub.f32 %v7401_v53, %v1604_v48 }
 0x385   : > { %v1182_v4 = vsub.f32 %v7405_v57, %v1164_v3  ;;  %6577 = vpow2.f32 %v1643_v10 }
 0x386   : > { %v7503_v46 = vpop.eup %6567  ;;  %6579 = vpow2.f32 %v1653_v25  ;;  %v1651_v22 = vmul.f32 1.442695, %v1623_v23  ;;  %v7566_v23 = vld [vmem:[%s9090_s4 + $0x8] sm:$0xff] }
 0x387   : > { %v1211_v15 = vmul.f32 1.442695, %v1182_v4  ;;  %v1162_v14 = vpop.xlane.xlu0 %1161  ;;  %1235 = vadd.xlane.f32.xlu1 %v7501_v11  ;;  %1233 = vadd.xlane.f32.xlu0 %v7503_v46  ;;  %v7510_v57 = vpop.eup %6569 }
 0x388   : > { %v1610_v58 = vpop.xlane.xlu1 %1609  ;;  %v1181_v13 = vsub.f32 %v7411_v21, %v1162_v14  ;;  %v7512_v56 = vpop.eup %6571 }
 0x389   : > { %v1626_v55 = vsub.f32 %v7413_v44, %v1610_v58  ;;  %6581 = vpow2.f32 %v1211_v15 }
 0x38a   : > { %v1209_v47 = vmul.f32 1.442695, %v1181_v13 }
 0x38b   : > { %1681 = vadd.xlane.f32.xlu1 %v7512_v56  ;;  %1671 = vadd.xlane.f32.xlu0 %v7510_v57  ;;  %v1608_v59 = vpop.xlane.xlu0 %1607  ;;  %v1657_v50 = vmul.f32 1.442695, %v1626_v55  ;;  %v7518_v44 = vpop.eup %6573 }
 0x38c   : > { %v1168_v18 = vpop.xlane.xlu1 %1167  ;;  %6583 = vpow2.f32 %v1209_v47 }
 0x38d   : > { %v1184_v21 = vsub.f32 %v7420_v8, %v1168_v18  ;;  %6585 = vpow2.f32 %v1647_v19  ;;  %v1625_v8 = vsub.f32 %v7417_v0, %v1608_v59  ;;  %v7559_v19 = vld [vmem:[%s9090_s4] sm:$0xff]  ;;  %v664_v18 = vld [vmem:[%s9089_s3 + $0x30] sm:$0xff]  ;;  %v9094_v59 = vmov 0.0  }
 0x38e   : > { %v7520_v27 = vpop.eup %6575  ;;  %6587 = vpow2.f32 %v1657_v50  ;;  %5823 = vmatprep.mubr.msk.f32.mxu1 %vm7079_vm3, %v9094_v59  ;;  %5884 = vmatprep.mubr.msk.f32.mxu0 %vm7079_vm3, %v9094_v59 }
 0x38f   : > { %1239 = vadd.xlane.f32.xlu1 %v7518_v44  ;;  %1237 = vadd.xlane.f32.xlu0 %v7520_v27  ;;  %v1166_v53 = vpop.xlane.xlu0 %1165  ;;  %v1215_v10 = vmul.f32 1.442695, %v1184_v21  ;;  %v7525_v48 = vpop.eup %6577  ;;  %6589 = vpow2.f32 %v1651_v22 }
 0x390   : > { %v1183_v3 = vsub.f32 %v7425_v5, %v1166_v53  ;;  %v7527_v25 = vpop.eup %6579  ;;  %v1655_v5 = vmul.f32 1.442695, %v1625_v8 }
 0x391   : > { %6591 = vpow2.f32 %v1215_v10 }
 0x392   : > { %v1213_v4 = vmul.f32 1.442695, %v1183_v3 }
 0x393   : > { %1685 = vadd.xlane.f32.xlu1 %v7527_v25  ;;  %1675 = vadd.xlane.f32.xlu0 %v7525_v48  ;;  %v7532_v51 = vpop.eup %6581  ;;  %v1218_v50 = vpop.xlane.xlu0 %1217 }
 0x394   : > { %6593 = vpow2.f32 %v1213_v4 }
 0x395   : > { %6595 = vpow2.f32 %v1655_v5 }
 0x396   : > { %v7534_v15 = vpop.eup %6583 }
 0x397   : > { %1243 = vadd.xlane.f32.xlu1 %v7532_v51  ;;  %1241 = vadd.xlane.f32.xlu0 %v7534_v15  ;;  %v7538_v14 = vpop.eup %6585  ;;  %v1222_v21 = vpop.xlane.xlu0 %1221 }
 0x398   : > { %v7540_v58 = vpop.eup %6587 }
 0x399   : > { %v7544_v0 = vpop.eup %6589 }
 0x39b   : > { %1689 = vadd.xlane.f32.xlu1 %v7540_v58  ;;  %1679 = vadd.xlane.f32.xlu0 %v7538_v14  ;;  %v7546_v13 = vpop.eup %6591 }
 0x39e   : > { %v7550_v55 = vpop.eup %6593 }
 0x39f   : > { %1247 = vadd.xlane.f32.xlu1 %v7546_v13  ;;  %1683 = vadd.xlane.f32.xlu0 %v7544_v0  ;;  %v7553_v47 = vpop.eup %6595 }
 0x3a3   : > { %1245 = vadd.xlane.f32.xlu0 %v7550_v55 }
 0x3a7   : > { %1687 = vadd.xlane.f32.xlu0 %v7553_v47 }
 0x3b0   : > { %1798 = vrot.lane.b32.xlu1 %v7559_v19, %s7076_s28 }
 0x3b4   : > { %1800 = vrot.lane.b32.xlu1 %v7566_v23, %s7076_s28 }
 0x3b8   : > { %2500 = vrot.lane.b32.xlu1 %v7208_v29, %s7078_s10 }
 0x3bc   : > { %2504 = vrot.lane.b32.xlu1 %v7220_v31, %s7078_s10 }
 0x3bd   : > { %698 = vperm.xlu0 %6525, %v664_v18  }
 0x3c0   : > { %2508 = vrot.lane.b32.xlu1 %v7232_v33, %s7078_s10 }
 0x3c1   : > { %2498 = vrot.lane.b32.xlu0 %v7202_v28, %s7078_s10 }
 0x3c4   : > { %2512 = vrot.lane.b32.xlu1 %v7244_v35, %s7078_s10 }
 0x3c5   : > { %2502 = vrot.lane.b32.xlu0 %v7214_v30, %s7078_s10 }
 0x3c8   : > { %2516 = vrot.lane.b32.xlu1 %v7256_v37, %s7078_s10 }
 0x3c9   : > { %2506 = vrot.lane.b32.xlu0 %v7226_v32, %s7078_s10 }
 0x3cc   : > { %2520 = vrot.lane.b32.xlu1 %v7268_v39, %s7078_s10 }
 0x3cd   : > { %2510 = vrot.lane.b32.xlu0 %v7238_v34, %s7078_s10 }
 0x3d0   : > { %2524 = vrot.lane.b32.xlu1 %v7280_v41, %s7078_s10 }
 0x3d1   : > { %2514 = vrot.lane.b32.xlu0 %v7250_v36, %s7078_s10 }
 0x3d4   : > { %2528 = vrot.lane.b32.xlu1 %v7292_v43, %s7078_s10 }
 0x3d5   : > { %2518 = vrot.lane.b32.xlu0 %v7262_v38, %s7078_s10 }
 0x3d9   : > { %2522 = vrot.lane.b32.xlu0 %v7274_v40, %s7078_s10 }
 0x3dd   : > { %2526 = vrot.lane.b32.xlu0 %v7286_v42, %s7078_s10 }
 0x3ec   : > { %v1662_v22 = vpop.xlane.xlu1 %1661 }
 0x3ed   : > { %6597 = vrcp.f32 %v1662_v22  ;;  %v1660_v53 = vpop.xlane.xlu0 %1659 }
 0x3ee   : > { %6599 = vrcp.f32 %v1660_v53  ;;  %v9117_v53 = vmov 0.0|0.0  }
 0x3ef   : > { %6601 = vrcp.f32 %v1218_v50 }
 0x3f0   : > { %v1220_v10 = vpop.xlane.xlu1 %1219 }
 0x3f1   : > { %6603 = vrcp.f32 %v1220_v10 }
 0x3f2   : > { %6605 = vrcp.f32 %v1222_v21 }
 0x3f4   : > { %v1666_v4 = vpop.xlane.xlu1 %1665 }
 0x3f7   : > { %v6598_v3 = vpop.eup %6597 }
 0x3f8   : > { %v6600_v8 = vpop.eup %6599  ;;  %v1708_v5 = vmul.f32 %v6598_v3, %v7438_v20 }
 0x3f9   : > { %v6602_v18 = vpop.eup %6601  ;;  %v1707_v59 = vmul.f32 %v6600_v8, %v7440_v2 }
 0x3fa   : > { %v1265_v43 = vmul.f32 %v6602_v18, %v7428_v17 }
 0x3fb   : > { %v6604_v61 = vpop.eup %6603  ;;  %v6322_v42 = vpack.c.bf16 %v1708_v5, %v1707_v59 }
 0x3fc   : > { %v1224_v40 = vpop.xlane.xlu1 %1223  ;;  %v1266_v22 = vmul.f32 %v6604_v61, %v7446_v60  ;;  %v6606_v2 = vpop.eup %6605 }
 0x3fd   : > { %6607 = vrcp.f32 %v1224_v40  ;;  %6323 = vmatpush3.bf16.xpose.msra.mxu0 %v6322_v42  ;;  %v1267_v60 = vmul.f32 %v6606_v2, %v7431_v12 }
 0x3fe   : > { %v6298_v50 = vpack.c.bf16 %v1266_v22, %v1265_v43  ;;  %6324 = vmatprep.subr.bf16.mxu0 %v9117_v53 }
 0x400   : > { %v1670_v10 = vpop.xlane.xlu1 %1669  ;;  %6299 = vmatpush3.bf16.xpose.msra.mxu1 %v6298_v50 }
 0x401   : > { %6300 = vmatprep.subr.bf16.mxu1 %v9117_v53 }
 0x404   : > { %v1228_v20 = vpop.xlane.xlu1 %1227  ;;  %v1226_v3 = vpop.xlane.xlu0 %1225 }
 0x405   : > { %6609 = vrcp.f32 %v1228_v20 }
 0x406   : > { %6611 = vrcp.f32 %v1226_v3 }
 0x407   : > { %v6608_v59 = vpop.eup %6607  ;;  %6613 = vrcp.f32 %v1666_v4 }
 0x408   : > { %v1674_v21 = vpop.xlane.xlu1 %1673  ;;  %v1664_v17 = vpop.xlane.xlu0 %1663  ;;  %v1268_v40 = vmul.f32 %v6608_v59, %v7457_v52 }
 0x409   : > { %6615 = vrcp.f32 %v1664_v17 }
 0x40a   : > { %v6301_v42 = vpack.c.bf16 %v1268_v40, %v1267_v60 }
 0x40c   : > { %v1232_v43 = vpop.xlane.xlu1 %1231  ;;  %6302 = vmatpush3.bf16.xpose.msra.mxu1 %v6301_v42  ;;  %v1230_v61 = vpop.xlane.xlu0 %1229 }
 0x40d   : > { %6617 = vrcp.f32 %v1232_v43  ;;  %6303 = vmatprep.subr.bf16.mxu1 %v9117_v53 }
 0x40e   : > { %6619 = vrcp.f32 %v1230_v61 }
 0x40f   : > { %v6610_v8 = vpop.eup %6609  ;;  %6621 = vrcp.f32 %v1670_v10 }
 0x410   : > { %v6612_v5 = vpop.eup %6611  ;;  %v1678_v18 = vpop.xlane.xlu1 %1677  ;;  %v1270_v22 = vmul.f32 %v6610_v8, %v7467_v49 }
 0x411   : > { %v1668_v4 = vpop.xlane.xlu0 %1667  ;;  %v1269_v12 = vmul.f32 %v6612_v5, %v7469_v16  ;;  %v6614_v50 = vpop.eup %6613 }
 0x412   : > { %6623 = vrcp.f32 %v1668_v4  ;;  %v1710_v17 = vmul.f32 %v6614_v50, %v7450_v63 }
 0x413   : > { %v6304_v52 = vpack.c.bf16 %v1270_v22, %v1269_v12  ;;  %v6616_v20 = vpop.eup %6615 }
 0x414   : > { %v1236_v3 = vpop.xlane.xlu1 %1235  ;;  %v1709_v59 = vmul.f32 %v6616_v20, %v7478_v1 }
 0x415   : > { %v1234_v2 = vpop.xlane.xlu0 %1233  ;;  %6625 = vrcp.f32 %v1236_v3  ;;  %6305 = vmatpush3.bf16.xpose.msra.mxu1 %v6304_v52 }
 0x416   : > { %6627 = vrcp.f32 %v1234_v2  ;;  %6306 = vmatprep.subr.bf16.mxu1 %v9117_v53  ;;  %v6325_v60 = vpack.c.bf16 %v1710_v17, %v1709_v59 }
 0x417   : > { %v6618_v10 = vpop.eup %6617  ;;  %6629 = vrcp.f32 %v1674_v21 }
 0x418   : > { %v6620_v49 = vpop.eup %6619  ;;  %v1682_v16 = vpop.xlane.xlu1 %1681  ;;  %v1272_v42 = vmul.f32 %v6618_v10, %v7485_v7  ;;  %6326 = vmatpush3.bf16.xpose.msra.mxu0 %v6325_v60 }
 0x419   : > { %v1672_v40 = vpop.xlane.xlu0 %1671  ;;  %v1271_v43 = vmul.f32 %v6620_v49, %v7487_v9  ;;  %v6622_v61 = vpop.eup %6621  ;;  %6327 = vmatprep.subr.bf16.mxu0 %v9117_v53 }
 0x41a   : > { %6631 = vrcp.f32 %v1672_v40  ;;  %v1712_v21 = vmul.f32 %v6622_v61, %v7463_v6 }
 0x41b   : > { %v6307_v1 = vpack.c.bf16 %v1272_v42, %v1271_v43 }
 0x41c   : > { %v6624_v63 = vpop.eup %6623  ;;  %v1240_v8 = vpop.xlane.xlu1 %1239 }
 0x41d   : > { %v1238_v5 = vpop.xlane.xlu0 %1237  ;;  %6633 = vrcp.f32 %v1240_v8  ;;  %6308 = vmatpush3.bf16.xpose.msra.mxu1 %v6307_v1  ;;  %v1711_v4 = vmul.f32 %v6624_v63, %v7494_v26 }
 0x41e   : > { %6635 = vrcp.f32 %v1238_v5  ;;  %6309 = vmatprep.subr.bf16.mxu1 %v9117_v53 }
 0x41f   : > { %v6626_v7 = vpop.eup %6625  ;;  %v6328_v22 = vpack.c.bf16 %v1712_v21, %v1711_v4  ;;  %6637 = vrcp.f32 %v1678_v18 }
 0x420   : > { %v6628_v9 = vpop.eup %6627  ;;  %v1686_v12 = vpop.xlane.xlu1 %1685  ;;  %v1274_v52 = vmul.f32 %v6626_v7, %v7501_v11 }
 0x421   : > { %v1676_v50 = vpop.xlane.xlu0 %1675  ;;  %6329 = vmatpush3.bf16.xpose.msra.mxu0 %v6328_v22  ;;  %v1273_v20 = vmul.f32 %v6628_v9, %v7503_v46  ;;  %v6630_v3 = vpop.eup %6629 }
 0x422   : > { %6639 = vrcp.f32 %v1676_v50  ;;  %6330 = vmatprep.subr.bf16.mxu0 %v9117_v53  ;;  %v1714_v18 = vmul.f32 %v6630_v3, %v7480_v45 }
 0x423   : > { %v6310_v26 = vpack.c.bf16 %v1274_v52, %v1273_v20 }
 0x424   : > { %v6632_v6 = vpop.eup %6631  ;;  %v1244_v2 = vpop.xlane.xlu1 %1243 }
 0x425   : > { %v1242_v59 = vpop.xlane.xlu0 %1241  ;;  %6641 = vrcp.f32 %v1244_v2  ;;  %6311 = vmatpush3.bf16.xpose.msra.mxu1 %v6310_v26  ;;  %v1713_v17 = vmul.f32 %v6632_v6, %v7510_v57 }
 0x426   : > { %6643 = vrcp.f32 %v1242_v59  ;;  %6312 = vmatprep.subr.bf16.mxu1 %v9117_v53  ;;  %v1998_v59 = vrot.slane %v7184_v24, 4 }
 0x427   : > { %v6634_v11 = vpop.eup %6633  ;;  %v6331_v10 = vpack.c.bf16 %v1714_v18, %v1713_v17  ;;  %6645 = vrcp.f32 %v1682_v16 }
 0x428   : > { %v6636_v46 = vpop.eup %6635  ;;  %v1690_v60 = vpop.xlane.xlu1 %1689  ;;  %v1276_v40 = vmul.f32 %v6634_v11, %v7518_v44 }
 0x429   : > { %v1680_v49 = vpop.xlane.xlu0 %1679  ;;  %6332 = vmatpush3.bf16.xpose.msra.mxu0 %v6331_v10  ;;  %v1275_v42 = vmul.f32 %v6636_v46, %v7520_v27  ;;  %v6638_v43 = vpop.eup %6637 }
 0x42a   : > { %6647 = vrcp.f32 %v1680_v49  ;;  %6333 = vmatprep.subr.bf16.mxu0 %v9117_v53  ;;  %v1716_v16 = vmul.f32 %v6638_v43, %v7496_v62 }
 0x42b   : > { %v6313_v57 = vpack.c.bf16 %v1276_v40, %v1275_v42 }
 0x42c   : > { %v6640_v45 = vpop.eup %6639  ;;  %v1248_v61 = vpop.xlane.xlu1 %1247 }
 0x42d   : > { %v1684_v1 = vpop.xlane.xlu0 %1683  ;;  %6314 = vmatpush3.bf16.xpose.msra.mxu1 %v6313_v57  ;;  %v1715_v63 = vmul.f32 %v6640_v45, %v7525_v48  ;;  %v2530_v57 = vrot.slane %v7184_v24, 6 }
 0x42e   : > { %6649 = vrcp.f32 %v1684_v1  ;;  %6315 = vmatprep.subr.bf16.mxu1 %v9117_v53 }
 0x42f   : > { %v6642_v44 = vpop.eup %6641  ;;  %6651 = vrcp.f32 %v1248_v61  ;;  %v6334_v8 = vpack.c.bf16 %v1716_v16, %v1715_v63 }
 0x430   : > { %v6644_v27 = vpop.eup %6643  ;;  %6653 = vrcp.f32 %v1686_v12  ;;  %v1278_v4 = vmul.f32 %v6642_v44, %v7532_v51  ;;  %v1799_v46 = vpop.permute.xlu1 %1798 }
 0x431   : > { %v1246_v5 = vpop.xlane.xlu0 %1245  ;;  %6335 = vmatpush3.bf16.xpose.msra.mxu0 %v6334_v8  ;;  %v1277_v21 = vmul.f32 %v6644_v27, %v7534_v15  ;;  %v6646_v7 = vpop.eup %6645 }
 0x432   : > { %6655 = vrcp.f32 %v1246_v5  ;;  %6336 = vmatprep.subr.bf16.mxu0 %v9117_v53  ;;  %v1718_v50 = vmul.f32 %v6646_v7, %v7512_v56 }
 0x433   : > { %v6316_v48 = vpack.c.bf16 %v1278_v4, %v1277_v21  ;;  %v9118_v21 = vmov 0.0  }
 0x434   : > { %v6648_v62 = vpop.eup %6647 }
 0x435   : > { %v1688_v22 = vpop.xlane.xlu0 %1687  ;;  %6317 = vmatpush3.bf16.xpose.msra.mxu1 %v6316_v48  ;;  %v1717_v9 = vmul.f32 %v6648_v62, %v7538_v14 }
 0x436   : > { %6657 = vrcp.f32 %v1688_v22  ;;  %6318 = vmatprep.subr.bf16.mxu1 %v9117_v53 }
 0x437   : > { %v6337_v12 = vpack.c.bf16 %v1718_v50, %v1717_v9  ;;  %6659 = vrcp.f32 %v1690_v60 }
 0x438   : > { %v6650_v51 = vpop.eup %6649 }
 0x439   : > { %v6652_v52 = vpop.eup %6651  ;;  %6338 = vmatpush3.bf16.xpose.msra.mxu0 %v6337_v12  ;;  %v1719_v3 = vmul.f32 %v6650_v51, %v7544_v0 }
 0x43a   : > { %v6654_v15 = vpop.eup %6653  ;;  %6339 = vmatprep.subr.bf16.mxu0 %v9117_v53  ;;  %v1280_v14 = vmul.f32 %v6652_v52, %v7546_v13 }
 0x43b   : > { %v1720_v56 = vmul.f32 %v6654_v15, %v7527_v25 }
 0x43c   : > { %v6656_v20 = vpop.eup %6655  ;;  %v699_v11 = vpop.permute.xlu0 %698 }
 0x43d   : > { %v1279_v26 = vmul.f32 %v6656_v20, %v7550_v55  ;;  %v6340_v2 = vpack.c.bf16 %v1720_v56, %v1719_v3  ;;  %v7657_v55 = vadd.f32 %v7308_v54, %v699_v11  ;;  %v1801_v54 = vpop.permute.xlu1 %1800 }
 0x43f   : > { %v6319_v6 = vpack.c.bf16 %v1280_v14, %v1279_v26  ;;  %v1724_v10 = vrot.slane %v7657_v55, 2 }
 0x440   : > { %v6658_v17 = vpop.eup %6657  ;;  %v2499_v49 = vpop.permute.xlu0 %2498 }
 0x441   : > { %6320 = vmatpush3.bf16.xpose.msra.mxu1 %v6319_v6  ;;  %6341 = vmatpush3.bf16.xpose.msra.mxu0 %v6340_v2  ;;  %v6660_v18 = vpop.eup %6659  ;;  %v1721_v0 = vmul.f32 %v6658_v17, %v7553_v47  ;;  %v2501_v40 = vpop.permute.xlu1 %2500 }
 0x442   : > { %5897 = vmatprep.subr.msk.mxu1 %vm972_vm1, %v1998_v59  ;;  %6342 = vmatprep.subr.bf16.mxu0 %v9117_v53  ;;  %v1722_v25 = vmul.f32 %v6660_v18, %v7540_v58 }
 0x444   : > { %v6343_v13 = vpack.c.bf16 %v1722_v25, %v1721_v0  ;;  %v2503_v43 = vpop.permute.xlu0 %2502 }
 0x445   : > { %v2505_v45 = vpop.permute.xlu1 %2504 }
 0x448   : > { %5824 = vmatmul.mubr.f32.vlgmr.msra.gmra.mrb[16].mxu1 %v7657_v55  ;;  %v2507_v61 = vpop.permute.xlu0 %2506 }
 0x449   : > { %5898 = vmatpush3.msk.msra.mxu1 %vm972_vm1, %v1998_v59  ;;  %6344 = vmatpush3.bf16.xpose.msra.mxu0 %v6343_v13  ;;  %v2509_v1 = vpop.permute.xlu1 %2508 }
 0x44a   : > { %6345 = vmatprep.subr.bf16.mxu1 %v9117_v53 }
 0x44c   : > { %v2511_v24 = vpop.permute.xlu0 %2510 }
 0x450   : > { %5885 = vmatmul.mubr.f32.vlgmr.msra.gmra.mrb[24].mxu0 %v1724_v10  ;;  %v2515_v63 = vpop.permute.xlu0 %2514 }
 0x451   : > { %5889 = vmatprep.mubr.msk.f32.mxu0 %vm923_vm2, %v1799_v46 }
 0x454   : > { %v2519_v16 = vpop.permute.xlu0 %2518 }
 0x458   : > { %v2523_v8 = vpop.permute.xlu0 %2522 }
 0x45c   : > { %v2527_v5 = vpop.permute.xlu0 %2526 }
 0x51b   : > { %v1347_v47 = vpop.f32.mrb[16].mxu1 }
 0x51c   : > { %v5825_v60 = vpop.f32.mrb[17].mxu1 }
 0x523   : > { %v1792_v58 = vpop.f32.mrb[24].mxu0 }
 0x524   : > { %v5886_v42 = vpop.f32.mrb[25].mxu0  ;;  %5887 = vmatprep.subr.msk.mxu0 %vm972_vm1, %v1792_v58 }
 0x525   : > { %5888 = vmatpush3.msk.msra.mxu0 %vm972_vm1, %v1792_v58 }
 0x526   : > { %5890 = vmatmul.mubr.msk.f32.vlgmr.msra.gmra.mrb[26].mxu0 %vm923_vm2, %v1801_v54  ;;  %5892 = vmatprep.subr.msk.mxu0 %vm972_vm1, %v1347_v47 }
 0x527   : > { %5893 = vmatpush3.msk.msra.mxu0 %vm972_vm1, %v1347_v47  ;;  %5894 = vmatprep.mubr.msk.f32.mxu0 %vm923_vm2, %v7559_v19  ;;  %v2513_v19 = vpop.permute.xlu1 %2512 }
 0x528   : > { %5963 = vmatprep.subr.msk.mxu0 %vm972_vm1, %v2530_v57 }
 0x52e   : > { %5895 = vmatmul.mubr.msk.f32.vlgmr.msra.gmra.mrb[26].mxu0 %vm923_vm2, %v7566_v23  ;;  %v2517_v23 = vpop.permute.xlu1 %2516 }
 0x52f   : > { %5964 = vmatpush3.msk.msra.mxu0 %vm972_vm1, %v2530_v57  ;;  %5965 = vmatprep.mubr.msk.f32.mxu0 %vm923_vm2, %v2499_v49 }
 0x530   : > { %6369 = vmatprep.subr.bf16.mxu0 %v9117_v53 }
 0x532   : > { %5966 = vmatmul.mubr.msk.f32.vlgmr.msra.gmra.mrb[28].mxu0 %vm923_vm2, %v2501_v40  ;;  %v2521_v44 = vpop.permute.xlu1 %2520 }
 0x533   : > { %5968 = vmatprep.mubr.msk.f32.mxu0 %vm923_vm2, %v2503_v43 }
 0x536   : > { %5969 = vmatmul.mubr.msk.f32.gmra.mrb[30].mxu0 %vm923_vm2, %v2505_v45  ;;  %v2525_v27 = vpop.permute.xlu1 %2524 }
 0x537   : > { %5971 = vmatprep.mubr.msk.f32.mxu0 %vm923_vm2, %v2507_v61 }
 0x53a   : > { %5972 = vmatmul.mubr.msk.f32.gmra.mrb[32].mxu0 %vm923_vm2, %v2509_v1  ;;  %v2529_v4 = vpop.permute.xlu1 %2528 }
 0x53b   : > { %5974 = vmatprep.mubr.msk.f32.mxu0 %vm923_vm2, %v2511_v24 }
 0x53e   : > { %5975 = vmatmul.mubr.msk.f32.gmra.mrb[34].mxu0 %vm923_vm2, %v2513_v19 }
 0x53f   : > { %5977 = vmatprep.mubr.msk.f32.mxu0 %vm923_vm2, %v2515_v63 }
 0x542   : > { %5978 = vmatmul.mubr.msk.f32.gmra.mrb[36].mxu0 %vm923_vm2, %v2517_v23 }
 0x543   : > { %5980 = vmatprep.mubr.msk.f32.mxu0 %vm923_vm2, %v2519_v16 }
 0x546   : > { %5981 = vmatmul.mubr.msk.f32.gmra.mrb[38].mxu0 %vm923_vm2, %v2521_v44 }
 0x547   : > { %5983 = vmatprep.mubr.msk.f32.mxu0 %vm923_vm2, %v2523_v8 }
 0x54a   : > { %5984 = vmatmul.mubr.msk.f32.gmra.mrb[40].mxu0 %vm923_vm2, %v2525_v27 }
 0x54b   : > { %5986 = vmatprep.mubr.msk.f32.mxu0 %vm923_vm2, %v2527_v5 }
 0x54e   : > { %5987 = vmatmul.mubr.msk.f32.gmra.mrb[42].mxu0 %vm923_vm2, %v2529_v4 }
 0x54f   : > { %6021 = vmatprep.mubr.msk.f32.mxu0 %vm7079_vm3, %v9118_v21 }
 0x601   : > { %v7696_v7 = vpop.f32.mrb[26].mxu0 }
 0x602   : > { %9119 = vst [vmem:[#allocation9_spill] sm:$0xff] %v7696_v7  ;;  %v7698_v48 = vpop.f32.mrb[27].mxu0 }
 0x603   : > { %9120 = vst [vmem:[#allocation10_spill] sm:$0xff] %v7698_v48 }
 0x605   : > { %v5967_v62 = vpop.f32.mrb[28].mxu0 }
 0x606   : > { %v2711_v22 = vmul.f32 0.70710677, %v5967_v62  ;;  %v2631_v9 = vpop.f32.mrb[29].mxu0 }
 0x607   : > { %v2710_v50 = vmul.f32 0.70710677, %v2631_v9 }
 0x608   : > { %2728 = vmax.xlane.f32.xlu1 %v2711_v22 }
 0x609   : > { %2726 = vmax.xlane.f32.xlu0 %v2710_v50  ;;  %v5970_v12 = vpop.f32.mrb[30].mxu0 }
 0x60a   : > { %v2641_v51 = vpop.f32.mrb[31].mxu0  ;;  %v2713_v3 = vmul.f32 0.70710677, %v5970_v12 }
 0x60b   : > { %v2712_v52 = vmul.f32 0.70710677, %v2641_v51 }
 0x60d   : > { %2730 = vmax.xlane.f32.xlu0 %v2712_v52  ;;  %v5973_v15 = vpop.f32.mrb[32].mxu0 }
 0x60e   : > { %v2651_v20 = vpop.f32.mrb[33].mxu0  ;;  %v2715_v6 = vmul.f32 0.70710677, %v5973_v15 }
 0x60f   : > { %v2714_v26 = vmul.f32 0.70710677, %v2651_v20 }
 0x611   : > { %2732 = vmax.xlane.f32.xlu0 %v2713_v3  ;;  %2734 = vmax.xlane.f32.xlu1 %v2714_v26  ;;  %v5976_v14 = vpop.f32.mrb[34].mxu0 }
 0x612   : > { %v2661_v56 = vpop.f32.mrb[35].mxu0  ;;  %v2717_v18 = vmul.f32 0.70710677, %v5976_v14 }
 0x613   : > { %v2716_v2 = vmul.f32 0.70710677, %v2661_v56 }
 0x615   : > { %2736 = vmax.xlane.f32.xlu0 %v2715_v6  ;;  %2738 = vmax.xlane.f32.xlu1 %v2716_v2  ;;  %v5979_v59 = vpop.f32.mrb[36].mxu0 }
 0x616   : > { %v2671_v17 = vpop.f32.mrb[37].mxu0  ;;  %v7700_v13 = vmul.f32 0.70710677, %v5979_v59 }
 0x617   : > { %v2718_v11 = vmul.f32 0.70710677, %v2671_v17 }
 0x619   : > { %2740 = vmax.xlane.f32.xlu0 %v2717_v18  ;;  %2742 = vmax.xlane.f32.xlu1 %v2718_v11  ;;  %v5982_v0 = vpop.f32.mrb[38].mxu0 }
 0x61a   : > { %v2681_v25 = vpop.f32.mrb[39].mxu0  ;;  %v7706_v60 = vmul.f32 0.70710677, %v5982_v0 }
 0x61b   : > { %v7702_v10 = vmul.f32 0.70710677, %v2681_v25 }
 0x61d   : > { %2744 = vmax.xlane.f32.xlu0 %v7700_v13  ;;  %2746 = vmax.xlane.f32.xlu1 %v7702_v10  ;;  %v5985_v46 = vpop.f32.mrb[40].mxu0 }
 0x61e   : > { %v2691_v47 = vpop.f32.mrb[41].mxu0  ;;  %v7712_v58 = vmul.f32 0.70710677, %v5985_v46 }
 0x61f   : > { %v7708_v54 = vmul.f32 0.70710677, %v2691_v47 }
 0x621   : > { %2748 = vmax.xlane.f32.xlu0 %v7706_v60  ;;  %2750 = vmax.xlane.f32.xlu1 %v7708_v54  ;;  %v5988_v49 = vpop.f32.mrb[42].mxu0 }
 0x622   : > { %v2701_v40 = vpop.f32.mrb[43].mxu0  ;;  %v7718_v43 = vmul.f32 0.70710677, %v5988_v49 }
 0x623   : > { %v7714_v42 = vmul.f32 0.70710677, %v2701_v40 }
 0x625   : > { %2752 = vmax.xlane.f32.xlu0 %v7712_v58  ;;  %2754 = vmax.xlane.f32.xlu1 %v7714_v42 }
 0x629   : > { %2756 = vmax.xlane.f32.xlu0 %v7718_v43 }
 0x695   : > { %v2729_v57 = vpop.xlane.xlu1 %2728 }
 0x696   : > { %v2759_v45 = vsub.f32 %v2711_v22, %v2729_v57  ;;  %v2727_v61 = vpop.xlane.xlu0 %2726 }
 0x697   : > { %v2758_v1 = vsub.f32 %v2710_v50, %v2727_v61 }
 0x698   : > { %v2776_v24 = vmul.f32 1.442695, %v2759_v45 }
 0x699   : > { %v2774_v19 = vmul.f32 1.442695, %v2758_v1 }
 0x69a   : > { %6661 = vpow2.f32 %v2776_v24  ;;  %v2731_v63 = vpop.xlane.xlu0 %2730 }
 0x69b   : > { %6663 = vpow2.f32 %v2774_v19  ;;  %v2760_v23 = vsub.f32 %v2712_v52, %v2731_v63 }
 0x69d   : > { %v2778_v16 = vmul.f32 1.442695, %v2760_v23 }
 0x69e   : > { %v2735_v44 = vpop.xlane.xlu1 %2734  ;;  %v2733_v8 = vpop.xlane.xlu0 %2732 }
 0x69f   : > { %6665 = vpow2.f32 %v2778_v16  ;;  %v2762_v27 = vsub.f32 %v2714_v26, %v2735_v44  ;;  %v2761_v5 = vsub.f32 %v2713_v3, %v2733_v8 }
 0x6a1   : > { %v2782_v4 = vmul.f32 1.442695, %v2762_v27  ;;  %v2780_v62 = vmul.f32 1.442695, %v2761_v5 }
 0x6a2   : > { %v2739_v9 = vpop.xlane.xlu1 %2738  ;;  %v2737_v12 = vpop.xlane.xlu0 %2736 }
 0x6a3   : > { %6667 = vpow2.f32 %v2782_v4  ;;  %v2764_v22 = vsub.f32 %v2716_v2, %v2739_v9  ;;  %v2763_v51 = vsub.f32 %v2715_v6, %v2737_v12  ;;  %v663_v9 = vld [vmem:[%s9089_s3 + $0x28] sm:$0xff] }
 0x6a4   : > { %v7721_v50 = vpop.eup %6661  ;;  %6669 = vpow2.f32 %v2780_v62 }
 0x6a5   : > { %v7723_v15 = vpop.eup %6663  ;;  %v2786_v20 = vmul.f32 1.442695, %v2764_v22  ;;  %v2784_v52 = vmul.f32 1.442695, %v2763_v51  ;;  %2808 = vadd.xlane.f32.xlu0 %v7721_v50 }
 0x6a6   : > { %v2743_v14 = vpop.xlane.xlu1 %2742  ;;  %2806 = vadd.xlane.f32.xlu1 %v7723_v15  ;;  %v2741_v3 = vpop.xlane.xlu0 %2740 }
 0x6a7   : > { %6671 = vpow2.f32 %v2786_v20  ;;  %v2766_v26 = vsub.f32 %v2718_v11, %v2743_v14  ;;  %v2765_v56 = vsub.f32 %v2717_v18, %v2741_v3  ;;  %v9121_v20 = vld [vmem:[#allocation7_spill] sm:$0xff] }
 0x6a8   : > { %6673 = vpow2.f32 %v2784_v52 }
 0x6a9   : > { %v7727_v59 = vpop.eup %6665  ;;  %v2790_v6 = vmul.f32 1.442695, %v2766_v26  ;;  %v2788_v2 = vmul.f32 1.442695, %v2765_v56 }
 0x6aa   : > { %2810 = vadd.xlane.f32.xlu1 %v7727_v59  ;;  %v2745_v17 = vpop.xlane.xlu0 %2744 }
 0x6ab   : > { %6675 = vpow2.f32 %v2790_v6  ;;  %v2767_v0 = vsub.f32 %v7700_v13, %v2745_v17 }
 0x6ac   : > { %6677 = vpow2.f32 %v2788_v2 }
 0x6ad   : > { %v7731_v25 = vpop.eup %6667  ;;  %v2792_v46 = vmul.f32 1.442695, %v2767_v0 }
 0x6ae   : > { %v7733_v47 = vpop.eup %6669  ;;  %2814 = vadd.xlane.f32.xlu1 %v7731_v25  ;;  %v2749_v18 = vpop.xlane.xlu0 %2748 }
 0x6af   : > { %2812 = vadd.xlane.f32.xlu0 %v7733_v47  ;;  %v2769_v11 = vsub.f32 %v7706_v60, %v2749_v18  ;;  %6679 = vpow2.f32 %v2792_v46 }
 0x6b1   : > { %v7738_v49 = vpop.eup %6671  ;;  %v2796_v40 = vmul.f32 1.442695, %v2769_v11 }
 0x6b2   : > { %v7740_v57 = vpop.eup %6673  ;;  %2818 = vadd.xlane.f32.xlu1 %v7738_v49  ;;  %v2753_v13 = vpop.xlane.xlu0 %2752 }
 0x6b3   : > { %2816 = vadd.xlane.f32.xlu0 %v7740_v57  ;;  %v2771_v45 = vsub.f32 %v7712_v58, %v2753_v13  ;;  %6681 = vpow2.f32 %v2796_v40 }
 0x6b5   : > { %v7745_v61 = vpop.eup %6675  ;;  %v2800_v1 = vmul.f32 1.442695, %v2771_v45 }
 0x6b6   : > { %v7747_v24 = vpop.eup %6677  ;;  %2822 = vadd.xlane.f32.xlu1 %v7745_v61  ;;  %v2757_v60 = vpop.xlane.xlu0 %2756 }
 0x6b7   : > { %2820 = vadd.xlane.f32.xlu0 %v7747_v24  ;;  %v2773_v19 = vsub.f32 %v7718_v43, %v2757_v60  ;;  %6683 = vpow2.f32 %v2800_v1  ;;  %v2747_v43 = vpop.xlane.xlu1 %2746 }
 0x6b8   : > { %v2768_v8 = vsub.f32 %v7702_v10, %v2747_v43 }
 0x6b9   : > { %v2804_v63 = vmul.f32 1.442695, %v2773_v19  ;;  %v7752_v23 = vpop.eup %6679 }
 0x6ba   : > { %v2794_v5 = vmul.f32 1.442695, %v2768_v8 }
 0x6bb   : > { %6685 = vpow2.f32 %v2804_v63  ;;  %2824 = vadd.xlane.f32.xlu0 %v7752_v23  ;;  %v2751_v27 = vpop.xlane.xlu1 %2750 }
 0x6bc   : > { %v2770_v4 = vsub.f32 %v7708_v54, %v2751_v27  ;;  %6687 = vpow2.f32 %v2794_v5 }
 0x6bd   : > { %v7755_v58 = vpop.eup %6681 }
 0x6be   : > { %v2798_v62 = vmul.f32 1.442695, %v2770_v4 }
 0x6bf   : > { %2828 = vadd.xlane.f32.xlu0 %v7755_v58  ;;  %v2755_v12 = vpop.xlane.xlu1 %2754 }
 0x6c0   : > { %6689 = vpow2.f32 %v2798_v62  ;;  %v2772_v22 = vsub.f32 %v7714_v42, %v2755_v12 }
 0x6c1   : > { %v7758_v16 = vpop.eup %6683 }
 0x6c2   : > { %v2802_v51 = vmul.f32 1.442695, %v2772_v22 }
 0x6c3   : > { %2832 = vadd.xlane.f32.xlu0 %v7758_v16 }
 0x6c4   : > { %6691 = vpow2.f32 %v2802_v51  ;;  %v9122_v51 = vld [vmem:[#allocation5_spill] sm:$0xff] }
 0x6c5   : > { %v7761_v44 = vpop.eup %6685 }
 0x6c6   : > { %v7776_v10 = vpop.eup %6687 }
 0x6c7   : > { %2836 = vadd.xlane.f32.xlu0 %v7761_v44  ;;  %1966 = vrot.lane.b32.xlu1 %v7202_v28, %s7081_s13 }
 0x6ca   : > { %v7781_v54 = vpop.eup %6689 }
 0x6ce   : > { %v7812_v52 = vpop.eup %6691 }
 0x6dd   : > { %1968 = vrot.lane.b32.xlu0 %v7208_v29, %s7081_s13 }
 0x6e1   : > { %1972 = vrot.lane.b32.xlu0 %v7220_v31, %s7081_s13 }
 0x6e5   : > { %3030 = vrot.lane.b32.xlu0 %v7202_v28, %s7082_s14 }
 0x6e9   : > { %3032 = vrot.lane.b32.xlu0 %v7208_v29, %s7082_s14 }
 0x6eb   : > { %2826 = vadd.xlane.f32.xlu1 %v7776_v10 }
 0x6ed   : > { %3034 = vrot.lane.b32.xlu0 %v7214_v30, %s7082_s14 }
 0x6ef   : > { %2830 = vadd.xlane.f32.xlu1 %v7781_v54 }
 0x6f1   : > { %3036 = vrot.lane.b32.xlu0 %v7220_v31, %s7082_s14 }
 0x6f5   : > { %3038 = vrot.lane.b32.xlu0 %v7226_v32, %s7082_s14 }
 0x6f9   : > { %3040 = vrot.lane.b32.xlu0 %v7232_v33, %s7082_s14 }
 0x6fd   : > { %3042 = vrot.lane.b32.xlu0 %v7238_v34, %s7082_s14 }
 0x700   : > { %693 = vperm.xlu1 %6526, %v663_v9  }
 0x701   : > { %3044 = vrot.lane.b32.xlu0 %v7244_v35, %s7082_s14 }
 0x704   : > { %1970 = vrot.lane.b32.xlu1 %v7214_v30, %s7081_s13 }
 0x705   : > { %3046 = vrot.lane.b32.xlu0 %v7250_v36, %s7082_s14 }
 0x709   : > { %3048 = vrot.lane.b32.xlu0 %v7256_v37, %s7082_s14 }
 0x70d   : > { %3050 = vrot.lane.b32.xlu0 %v7262_v38, %s7082_s14 }
 0x711   : > { %3052 = vrot.lane.b32.xlu0 %v7268_v39, %s7082_s14 }
 0x715   : > { %3056 = vrot.lane.b32.xlu0 %v7280_v41, %s7082_s14 }
 0x719   : > { %3060 = vrot.lane.b32.xlu0 %v9121_v20, %s7082_s14 }
 0x728   : > { %2834 = vadd.xlane.f32.xlu1 %v7812_v52 }
 0x732   : > { %v2809_v14 = vpop.xlane.xlu0 %2808 }
 0x733   : > { %6693 = vrcp.f32 %v2809_v14  ;;  %v2807_v3 = vpop.xlane.xlu1 %2806 }
 0x734   : > { %6695 = vrcp.f32 %v2807_v3 }
 0x737   : > { %v2811_v26 = vpop.xlane.xlu1 %2810 }
 0x738   : > { %6697 = vrcp.f32 %v2811_v26 }
 0x739   : > { %1974 = vrot.lane.b32.xlu1 %v7226_v32, %s7081_s13 }
 0x73b   : > { %v2815_v42 = vpop.xlane.xlu1 %2814 }
 0x73c   : > { %v2813_v56 = vpop.xlane.xlu0 %2812 }
 0x73d   : > { %v6694_v6 = vpop.eup %6693  ;;  %6699 = vrcp.f32 %v2813_v56  ;;  %1976 = vrot.lane.b32.xlu1 %v7232_v33, %s7081_s13 }
 0x73e   : > { %v6696_v2 = vpop.eup %6695  ;;  %v2855_v17 = vmul.f32 %v6694_v6, %v7721_v50 }
 0x73f   : > { %v2819_v0 = vpop.xlane.xlu1 %2818  ;;  %v2854_v46 = vmul.f32 %v6696_v2, %v7723_v15 }
 0x740   : > { %v2817_v18 = vpop.xlane.xlu0 %2816 }
 0x741   : > { %6701 = vrcp.f32 %v2817_v18  ;;  %1978 = vrot.lane.b32.xlu1 %v7238_v34, %s7081_s13  ;;  %v6370_v11 = vpack.c.bf16 %v2855_v17, %v2854_v46 }
 0x742   : > { %6703 = vrcp.f32 %v2815_v42  ;;  %v6698_v45 = vpop.eup %6697 }
 0x743   : > { %v2823_v40 = vpop.xlane.xlu1 %2822  ;;  %6371 = vmatpush3.bf16.xpose.msra.mxu0 %v6370_v11  ;;  %v2856_v15 = vmul.f32 %v6698_v45, %v7727_v59 }
 0x744   : > { %v2821_v13 = vpop.xlane.xlu0 %2820  ;;  %6372 = vmatprep.subr.bf16.mxu0 %v9117_v53 }
 0x745   : > { %1980 = vrot.lane.b32.xlu1 %v7244_v35, %s7081_s13  ;;  %6705 = vrcp.f32 %v2821_v13 }
 0x746   : > { %6707 = vrcp.f32 %v2819_v0 }
 0x747   : > { %v6700_v50 = vpop.eup %6699  ;;  %v1967_v1 = vpop.permute.xlu1 %1966 }
 0x748   : > { %v2825_v60 = vpop.xlane.xlu0 %2824  ;;  %5899 = vmatprep.mubr.msk.f32.mxu1 %vm923_vm2, %v1967_v1  ;;  %v2857_v19 = vmul.f32 %v6700_v50, %v7733_v47 }
 0x749   : > { %1982 = vrot.lane.b32.xlu1 %v7250_v36, %s7081_s13  ;;  %6709 = vrcp.f32 %v2825_v60 }
 0x74a   : > { %v6373_v63 = vpack.c.bf16 %v2857_v19, %v2856_v15  ;;  %6711 = vrcp.f32 %v2823_v40 }
 0x74b   : > { %v6702_v43 = vpop.eup %6701 }
 0x74c   : > { %6374 = vmatpush3.bf16.xpose.msra.mxu0 %v6373_v63  ;;  %v2829_v8 = vpop.xlane.xlu0 %2828  ;;  %v6704_v27 = vpop.eup %6703  ;;  %v2859_v5 = vmul.f32 %v6702_v43, %v7740_v57 }
 0x74d   : > { %1984 = vrot.lane.b32.xlu1 %v7256_v37, %s7081_s13  ;;  %6375 = vmatprep.subr.bf16.mxu0 %v9117_v53  ;;  %v2858_v47 = vmul.f32 %v6704_v27, %v7731_v25  ;;  %6713 = vrcp.f32 %v2829_v8 }
 0x74f   : > { %v6376_v4 = vpack.c.bf16 %v2859_v5, %v2858_v47  ;;  %v6706_v62 = vpop.eup %6705 }
 0x750   : > { %v2833_v59 = vpop.xlane.xlu0 %2832  ;;  %v6708_v12 = vpop.eup %6707  ;;  %v2861_v57 = vmul.f32 %v6706_v62, %v7747_v24 }
 0x751   : > { %1986 = vrot.lane.b32.xlu1 %v7262_v38, %s7081_s13  ;;  %v2860_v25 = vmul.f32 %v6708_v12, %v7738_v49  ;;  %v9123_v49 = vld [vmem:[#allocation6_spill] sm:$0xff]  ;;  %v9124_v12 = vld [vmem:[#allocation4_spill] sm:$0xff] }
 0x753   : > { %v6379_v14 = vpack.c.bf16 %v2861_v57, %v2860_v25  ;;  %v6710_v3 = vpop.eup %6709 }
 0x754   : > { %6377 = vmatpush3.bf16.xpose.msra.mxu0 %v6376_v4  ;;  %v2837_v9 = vpop.xlane.xlu0 %2836  ;;  %v6712_v26 = vpop.eup %6711  ;;  %v2863_v42 = vmul.f32 %v6710_v3, %v7752_v23 }
 0x755   : > { %1988 = vrot.lane.b32.xlu1 %v7268_v39, %s7081_s13  ;;  %6378 = vmatprep.subr.bf16.mxu0 %v9117_v53  ;;  %v2862_v24 = vmul.f32 %v6712_v26, %v7745_v61 }
 0x757   : > { %v6382_v56 = vpack.c.bf16 %v2863_v42, %v2862_v24  ;;  %v6714_v2 = vpop.eup %6713 }
 0x758   : > { %v1969_v22 = vpop.permute.xlu0 %1968  ;;  %v2865_v18 = vmul.f32 %v6714_v2, %v7755_v58 }
 0x759   : > { %5900 = vmatmul.mubr.msk.f32.vlgmr.msra.gmra.mrb[18].mxu1 %vm923_vm2, %v1969_v22  ;;  %1990 = vrot.lane.b32.xlu1 %v9122_v51, %s7081_s13 }
 0x75c   : > { %6380 = vmatpush3.bf16.xpose.msra.mxu0 %v6379_v14  ;;  %v1973_v11 = vpop.permute.xlu0 %1972  ;;  %v2870_v14 = vrot.slane %v7657_v55, 6 }
 0x75d   : > { %1992 = vrot.lane.b32.xlu1 %v7280_v41, %s7081_s13  ;;  %6381 = vmatprep.subr.bf16.mxu0 %v9117_v53 }
 0x760   : > { %v3031_v58 = vpop.permute.xlu0 %3030 }
 0x761   : > { %1994 = vrot.lane.b32.xlu1 %v9123_v49, %s7081_s13 }
 0x764   : > { %6383 = vmatpush3.bf16.xpose.msra.mxu0 %v6382_v56 }
 0x765   : > { %1996 = vrot.lane.b32.xlu1 %v9121_v20, %s7081_s13  ;;  %6384 = vmatprep.subr.bf16.mxu0 %v9117_v53 }
 0x769   : > { %3054 = vrot.lane.b32.xlu1 %v9122_v51, %s7082_s14 }
 0x76d   : > { %3058 = vrot.lane.b32.xlu1 %v9123_v49, %s7082_s14 }
 0x778   : > { %v2827_v23 = vpop.xlane.xlu1 %2826 }
 0x779   : > { %6715 = vrcp.f32 %v2827_v23 }
 0x77c   : > { %v2831_v61 = vpop.xlane.xlu1 %2830 }
 0x77d   : > { %6717 = vrcp.f32 %v2831_v61 }
 0x77e   : > { %6719 = vrcp.f32 %v2833_v59 }
 0x77f   : > { %6721 = vrcp.f32 %v2837_v9 }
 0x780   : > { %v694_v6 = vpop.permute.xlu1 %693 }
 0x781   : > { %v7874_v57 = vadd.f32 %v9124_v12, %v694_v6 }
 0x783   : > { %v6716_v17 = vpop.eup %6715  ;;  %9125 = vst [vmem:[#allocation7_spill] sm:$0xff] %v7874_v57 }
 0x784   : > { %v1971_v0 = vpop.permute.xlu1 %1970  ;;  %v2864_v46 = vmul.f32 %v6716_v17, %v7776_v10  ;;  %v3033_v10 = vpop.permute.xlu0 %3032 }
 0x785   : > { %5902 = vmatprep.mubr.msk.f32.mxu1 %vm923_vm2, %v1971_v0 }
 0x786   : > { %5903 = vmatmul.mubr.msk.f32.gmra.mrb[20].mxu1 %vm923_vm2, %v1973_v11  ;;  %v6385_v40 = vpack.c.bf16 %v2865_v18, %v2864_v46 }
 0x787   : > { %v6718_v13 = vpop.eup %6717 }
 0x788   : > { %6386 = vmatpush3.bf16.xpose.msra.mxu0 %v6385_v40  ;;  %v6720_v45 = vpop.eup %6719  ;;  %v2866_v50 = vmul.f32 %v6718_v13, %v7781_v54  ;;  %v3035_v15 = vpop.permute.xlu0 %3034 }
 0x789   : > { %6387 = vmatprep.subr.bf16.mxu0 %v9117_v53  ;;  %v2867_v1 = vmul.f32 %v6720_v45, %v7758_v16  ;;  %v6722_v5 = vpop.eup %6721 }
 0x78a   : > { %v2869_v4 = vmul.f32 %v6722_v5, %v7761_v44 }
 0x78b   : > { %v6388_v60 = vpack.c.bf16 %v2867_v1, %v2866_v50 }
 0x78c   : > { %v3037_v19 = vpop.permute.xlu0 %3036 }
 0x790   : > { %6389 = vmatpush3.bf16.xpose.msra.mxu0 %v6388_v60  ;;  %v3039_v43 = vpop.permute.xlu0 %3038 }
 0x791   : > { %6390 = vmatprep.subr.bf16.mxu0 %v9117_v53 }
 0x794   : > { %v3041_v54 = vpop.permute.xlu0 %3040 }
 0x798   : > { %v3043_v9 = vpop.permute.xlu0 %3042 }
 0x7b5   : > { %v2835_v63 = vpop.xlane.xlu1 %2834 }
 0x7b6   : > { %6723 = vrcp.f32 %v2835_v63 }
 0x7b9   : > { %v1975_v8 = vpop.permute.xlu1 %1974 }
 0x7ba   : > { %5905 = vmatprep.mubr.msk.f32.mxu1 %vm923_vm2, %v1975_v8 }
 0x7bd   : > { %v1977_v27 = vpop.permute.xlu1 %1976 }
 0x7be   : > { %5906 = vmatmul.mubr.msk.f32.gmra.mrb[22].mxu1 %vm923_vm2, %v1977_v27 }
 0x7c0   : > { %v6724_v16 = vpop.eup %6723 }
 0x7c1   : > { %v1979_v59 = vpop.permute.xlu1 %1978  ;;  %v2868_v47 = vmul.f32 %v6724_v16, %v7812_v52  ;;  %v3045_v52 = vpop.permute.xlu0 %3044 }
 0x7c2   : > { %5908 = vmatprep.mubr.msk.f32.mxu1 %vm923_vm2, %v1979_v59 }
 0x7c3   : > { %v6391_v62 = vpack.c.bf16 %v2869_v4, %v2868_v47 }
 0x7c5   : > { %v1981_v22 = vpop.permute.xlu1 %1980  ;;  %6392 = vmatpush3.bf16.xpose.msra.mxu0 %v6391_v62  ;;  %v3047_v3 = vpop.permute.xlu0 %3046 }
 0x7c6   : > { %5909 = vmatmul.mubr.msk.f32.gmra.mrb[24].mxu1 %vm923_vm2, %v1981_v22  ;;  %6029 = vmatprep.subr.msk.mxu0 %vm972_vm1, %v7874_v57 }
 0x7c9   : > { %v1983_v25 = vpop.permute.xlu1 %1982  ;;  %v3049_v24 = vpop.permute.xlu0 %3048 }
 0x7ca   : > { %5911 = vmatprep.mubr.msk.f32.mxu1 %vm923_vm2, %v1983_v25 }
 0x7cc   : > { %6022 = vmatmul.mubr.f32.vlgmr.msra.gmra.mrb[44].mxu0 %v2870_v14 }
 0x7cd   : > { %v1985_v44 = vpop.permute.xlu1 %1984  ;;  %6030 = vmatpush3.msk.msra.mxu0 %vm972_vm1, %v7874_v57  ;;  %6031 = vmatprep.mubr.msk.f32.mxu0 %vm923_vm2, %v3031_v58  ;;  %v3051_v23 = vpop.permute.xlu0 %3050 }
 0x7ce   : > { %5912 = vmatmul.mubr.msk.f32.gmra.mrb[26].mxu1 %vm923_vm2, %v1985_v44  ;;  %6393 = vmatprep.subr.bf16.mxu0 %v9117_v53 }
 0x7d0   : > { %6032 = vmatmul.mubr.msk.f32.vlgmr.msra.gmra.mrb[46].mxu0 %vm923_vm2, %v3033_v10 }
 0x7d1   : > { %v1987_v26 = vpop.permute.xlu1 %1986  ;;  %6034 = vmatprep.mubr.msk.f32.mxu0 %vm923_vm2, %v3035_v15  ;;  %v3053_v2 = vpop.permute.xlu0 %3052 }
 0x7d2   : > { %5914 = vmatprep.mubr.msk.f32.mxu1 %vm923_vm2, %v1987_v26 }
 0x7d4   : > { %6035 = vmatmul.mubr.msk.f32.gmra.mrb[48].mxu0 %vm923_vm2, %v3037_v19 }
 0x7d5   : > { %v1989_v42 = vpop.permute.xlu1 %1988  ;;  %6037 = vmatprep.mubr.msk.f32.mxu0 %vm923_vm2, %v3039_v43  ;;  %v3057_v0 = vpop.permute.xlu0 %3056 }
 0x7d6   : > { %5915 = vmatmul.mubr.msk.f32.gmra.mrb[28].mxu1 %vm923_vm2, %v1989_v42 }
 0x7d8   : > { %6038 = vmatmul.mubr.msk.f32.gmra.mrb[50].mxu0 %vm923_vm2, %v3041_v54 }
 0x7d9   : > { %v1991_v56 = vpop.permute.xlu1 %1990  ;;  %6040 = vmatprep.mubr.msk.f32.mxu0 %vm923_vm2, %v3043_v9  ;;  %v3061_v11 = vpop.permute.xlu0 %3060 }
 0x7da   : > { %5917 = vmatprep.mubr.msk.f32.mxu1 %vm923_vm2, %v1991_v56 }
 0x7dc   : > { %6041 = vmatmul.mubr.msk.f32.gmra.mrb[52].mxu0 %vm923_vm2, %v3045_v52 }
 0x7dd   : > { %v1993_v61 = vpop.permute.xlu1 %1992  ;;  %6043 = vmatprep.mubr.msk.f32.mxu0 %vm923_vm2, %v3047_v3 }
 0x7de   : > { %5918 = vmatmul.mubr.msk.f32.gmra.mrb[30].mxu1 %vm923_vm2, %v1993_v61 }
 0x7e0   : > { %6044 = vmatmul.mubr.msk.f32.gmra.mrb[54].mxu0 %vm923_vm2, %v3049_v24 }
 0x7e1   : > { %v1995_v6 = vpop.permute.xlu1 %1994  ;;  %6046 = vmatprep.mubr.msk.f32.mxu0 %vm923_vm2, %v3051_v23 }
 0x7e2   : > { %5920 = vmatprep.mubr.msk.f32.mxu1 %vm923_vm2, %v1995_v6 }
 0x7e4   : > { %6047 = vmatmul.mubr.msk.f32.gmra.mrb[56].mxu0 %vm923_vm2, %v3053_v2 }
 0x7e5   : > { %v1997_v17 = vpop.permute.xlu1 %1996 }
 0x7e6   : > { %5921 = vmatmul.mubr.msk.f32.gmra.mrb[32].mxu1 %vm923_vm2, %v1997_v17 }
 0x7e7   : > { %5955 = vmatprep.mubr.msk.f32.mxu1 %vm7079_vm3, %v9118_v21 }
 0x7e9   : > { %v3055_v46 = vpop.permute.xlu1 %3054 }
 0x7ea   : > { %6049 = vmatprep.mubr.msk.f32.mxu0 %vm923_vm2, %v3055_v46 }
 0x7eb   : > { %6050 = vmatmul.mubr.msk.f32.gmra.mrb[58].mxu0 %vm923_vm2, %v3057_v0 }
 0x7ed   : > { %v3059_v18 = vpop.permute.xlu1 %3058 }
 0x7ee   : > { %6052 = vmatprep.mubr.msk.f32.mxu0 %vm923_vm2, %v3059_v18 }
 0x7ef   : > { %6053 = vmatmul.mubr.msk.f32.gmra.mrb[60].mxu0 %vm923_vm2, %v3061_v11 }
 0x7f0   : > { %6087 = vmatprep.mubr.msk.f32.mxu0 %vm7079_vm3, %v9118_v21 }
 0x82c   : > { %v5901_v40 = vpop.f32.mrb[18].mxu1 }
 0x82d   : > { %v7911_v13 = vmul.f32 0.70710677, %v5901_v40  ;;  %v2099_v45 = vpop.f32.mrb[19].mxu1 }
 0x82e   : > { %v7913_v50 = vmul.f32 0.70710677, %v2099_v45 }
 0x82f   : > { %2196 = vmax.xlane.f32.xlu0 %v7911_v13 }
 0x830   : > { %2194 = vmax.xlane.f32.xlu1 %v7913_v50 }
 0x859   : > { %v5904_v1 = vpop.f32.mrb[20].mxu1 }
 0x85a   : > { %v7917_v60 = vmul.f32 0.70710677, %v5904_v1  ;;  %v2109_v58 = vpop.f32.mrb[21].mxu1 }
 0x85b   : > { %v7919_v10 = vmul.f32 0.70710677, %v2109_v58 }
 0x85c   : > { %2200 = vmax.xlane.f32.xlu1 %v7917_v60 }
 0x85d   : > { %2198 = vmax.xlane.f32.xlu0 %v7919_v10 }
 0x891   : > { %v5907_v15 = vpop.f32.mrb[22].mxu1 }
 0x892   : > { %v7923_v19 = vmul.f32 0.70710677, %v5907_v15  ;;  %v2119_v63 = vpop.f32.mrb[23].mxu1 }
 0x893   : > { %v7925_v43 = vmul.f32 0.70710677, %v2119_v63 }
 0x894   : > { %2204 = vmax.xlane.f32.xlu1 %v7923_v19 }
 0x895   : > { %2202 = vmax.xlane.f32.xlu0 %v7925_v43 }
 0x899   : > { %v5910_v8 = vpop.f32.mrb[24].mxu1 }
 0x89a   : > { %v2129_v27 = vpop.f32.mrb[25].mxu1  ;;  %v7937_v22 = vmul.f32 0.70710677, %v5910_v8 }
 0x89b   : > { %v7939_v14 = vmul.f32 0.70710677, %v2129_v27 }
 0x89f   : > { %v7929_v5 = vpop.f32.mrb[44].mxu0 }
 0x8a0   : > { %9126 = vst [vmem:[#allocation5_spill] sm:$0xff] %v7929_v5  ;;  %v6023_v54 = vpop.f32.mrb[45].mxu0 }
 0x8a1   : > { %v5913_v16 = vpop.f32.mrb[26].mxu1 }
 0x8a2   : > { %v2139_v59 = vpop.f32.mrb[27].mxu1  ;;  %v7949_v23 = vmul.f32 0.70710677, %v5913_v16 }
 0x8a3   : > { %v6033_v47 = vpop.f32.mrb[46].mxu0  ;;  %v7951_v6 = vmul.f32 0.70710677, %v2139_v59 }
 0x8a4   : > { %v7931_v4 = vmul.f32 0.70710677, %v6033_v47  ;;  %v3163_v62 = vpop.f32.mrb[47].mxu0 }
 0x8a5   : > { %v7933_v9 = vmul.f32 0.70710677, %v3163_v62 }
 0x8a6   : > { %3260 = vmax.xlane.f32.xlu1 %v7931_v4 }
 0x8a7   : > { %3258 = vmax.xlane.f32.xlu0 %v7933_v9  ;;  %v6036_v12 = vpop.f32.mrb[48].mxu0 }
 0x8a8   : > { %v3173_v25 = vpop.f32.mrb[49].mxu0  ;;  %v7943_v26 = vmul.f32 0.70710677, %v6036_v12 }
 0x8a9   : > { %v5916_v52 = vpop.f32.mrb[28].mxu1  ;;  %v7945_v24 = vmul.f32 0.70710677, %v3173_v25 }
 0x8aa   : > { %v2149_v44 = vpop.f32.mrb[29].mxu1  ;;  %2208 = vmax.xlane.f32.xlu1 %v7937_v22  ;;  %v7961_v45 = vmul.f32 0.70710677, %v5916_v52 }
 0x8ab   : > { %2206 = vmax.xlane.f32.xlu0 %v7939_v14  ;;  %v6039_v3 = vpop.f32.mrb[50].mxu0  ;;  %v7963_v58 = vmul.f32 0.70710677, %v2149_v44 }
 0x8ac   : > { %v3183_v42 = vpop.f32.mrb[51].mxu0  ;;  %v7955_v46 = vmul.f32 0.70710677, %v6039_v3 }
 0x8ad   : > { %v7957_v11 = vmul.f32 0.70710677, %v3183_v42 }
 0x8ae   : > { %3264 = vmax.xlane.f32.xlu1 %v7943_v26 }
 0x8af   : > { %3262 = vmax.xlane.f32.xlu0 %v7945_v24  ;;  %v6042_v56 = vpop.f32.mrb[52].mxu0 }
 0x8b0   : > { %v3193_v61 = vpop.f32.mrb[53].mxu0  ;;  %v7967_v8 = vmul.f32 0.70710677, %v6042_v56 }
 0x8b1   : > { %v5919_v2 = vpop.f32.mrb[30].mxu1  ;;  %v7969_v27 = vmul.f32 0.70710677, %v3193_v61 }
 0x8b2   : > { %v2159_v17 = vpop.f32.mrb[31].mxu1  ;;  %2212 = vmax.xlane.f32.xlu1 %v7949_v23  ;;  %v7973_v59 = vmul.f32 0.70710677, %v5919_v2 }
 0x8b3   : > { %2210 = vmax.xlane.f32.xlu0 %v7951_v6  ;;  %v6045_v0 = vpop.f32.mrb[54].mxu0  ;;  %v7975_v47 = vmul.f32 0.70710677, %v2159_v17 }
 0x8b4   : > { %v3203_v18 = vpop.f32.mrb[55].mxu0  ;;  %v7979_v25 = vmul.f32 0.70710677, %v6045_v0 }
 0x8b5   : > { %v7981_v44 = vmul.f32 0.70710677, %v3203_v18 }
 0x8b6   : > { %3268 = vmax.xlane.f32.xlu1 %v7955_v46 }
 0x8b7   : > { %3266 = vmax.xlane.f32.xlu0 %v7957_v11  ;;  %v6048_v40 = vpop.f32.mrb[56].mxu0 }
 0x8b8   : > { %v3213_v1 = vpop.f32.mrb[57].mxu0  ;;  %v7993_v0 = vmul.f32 0.70710677, %v6048_v40 }
 0x8b9   : > { %v5922_v15 = vpop.f32.mrb[32].mxu1  ;;  %v7995_v48 = vmul.f32 0.70710677, %v3213_v1 }
 0x8ba   : > { %v2169_v63 = vpop.f32.mrb[33].mxu1  ;;  %2216 = vmax.xlane.f32.xlu1 %v7961_v45  ;;  %v7986_v56 = vmul.f32 0.70710677, %v5922_v15 }
 0x8bb   : > { %2214 = vmax.xlane.f32.xlu0 %v7963_v58  ;;  %v7989_v2 = vmul.f32 0.70710677, %v2169_v63 }
 0x8bc   : > { %v2197_v52 = vpop.xlane.xlu0 %2196 }
 0x8bd   : > { %v2195_v3 = vpop.xlane.xlu1 %2194  ;;  %v2227_v42 = vsub.f32 %v7911_v13, %v2197_v52 }
 0x8be   : > { %3272 = vmax.xlane.f32.xlu1 %v7967_v8  ;;  %v6051_v54 = vpop.f32.mrb[58].mxu0  ;;  %v2226_v61 = vsub.f32 %v7913_v50, %v2195_v3 }
 0x8bf   : > { %3270 = vmax.xlane.f32.xlu0 %v7969_v27  ;;  %v3223_v16 = vpop.f32.mrb[59].mxu0  ;;  %v2244_v17 = vmul.f32 1.442695, %v2227_v42  ;;  %v7999_v13 = vmul.f32 0.70710677, %v6051_v54 }
 0x8c0   : > { %v2242_v18 = vmul.f32 1.442695, %v2226_v61  ;;  %v8001_v50 = vmul.f32 0.70710677, %v3223_v16 }
 0x8c1   : > { %6725 = vpow2.f32 %v2244_v17 }
 0x8c2   : > { %2220 = vmax.xlane.f32.xlu1 %v7973_v59  ;;  %v6054_v62 = vpop.f32.mrb[60].mxu0  ;;  %6727 = vpow2.f32 %v2242_v18 }
 0x8c3   : > { %2218 = vmax.xlane.f32.xlu0 %v7975_v47  ;;  %v3233_v12 = vpop.f32.mrb[61].mxu0  ;;  %v8005_v15 = vmul.f32 0.70710677, %v6054_v62 }
 0x8c4   : > { %v8007_v40 = vmul.f32 0.70710677, %v3233_v12 }
 0x8c6   : > { %3276 = vmax.xlane.f32.xlu1 %v7979_v25 }
 0x8c7   : > { %3274 = vmax.xlane.f32.xlu0 %v7981_v44 }
 0x8ca   : > { %2224 = vmax.xlane.f32.xlu1 %v7986_v56 }
 0x8cb   : > { %2222 = vmax.xlane.f32.xlu0 %v7989_v2  ;;  %v8011_v1 = vpop.eup %6725 }
 0x8cc   : > { %v8013_v63 = vpop.eup %6727 }
 0x8ce   : > { %3280 = vmax.xlane.f32.xlu1 %v7993_v0 }
 0x8cf   : > { %3278 = vmax.xlane.f32.xlu0 %v7995_v48 }
 0x8d2   : > { %3284 = vmax.xlane.f32.xlu1 %v7999_v13 }
 0x8d3   : > { %3282 = vmax.xlane.f32.xlu0 %v8001_v50 }
 0x8d6   : > { %3288 = vmax.xlane.f32.xlu1 %v8005_v15 }
 0x8d7   : > { %3286 = vmax.xlane.f32.xlu0 %v8007_v40 }
 0x8da   : > { %2276 = vadd.xlane.f32.xlu1 %v8011_v1 }
 0x8db   : > { %2274 = vadd.xlane.f32.xlu0 %v8013_v63 }
 0x8e9   : > { %v2201_v54 = vpop.xlane.xlu1 %2200 }
 0x8ea   : > { %v2229_v16 = vsub.f32 %v7917_v60, %v2201_v54  ;;  %v2199_v52 = vpop.xlane.xlu0 %2198 }
 0x8eb   : > { %v2228_v62 = vsub.f32 %v7919_v10, %v2199_v52 }
 0x8ec   : > { %v2248_v12 = vmul.f32 1.442695, %v2229_v16 }
 0x8ed   : > { %v2246_v3 = vmul.f32 1.442695, %v2228_v62 }
 0x8ee   : > { %6729 = vpow2.f32 %v2248_v12 }
 0x8ef   : > { %6731 = vpow2.f32 %v2246_v3 }
 0x8f8   : > { %v8019_v42 = vpop.eup %6729 }
 0x8f9   : > { %v8021_v61 = vpop.eup %6731  ;;  %2280 = vadd.xlane.f32.xlu1 %v8019_v42 }
 0x8fa   : > { %2278 = vadd.xlane.f32.xlu0 %v8021_v61 }
 0x921   : > { %v2205_v17 = vpop.xlane.xlu1 %2204 }
 0x922   : > { %v2231_v18 = vsub.f32 %v7923_v19, %v2205_v17  ;;  %v2203_v7 = vpop.xlane.xlu0 %2202 }
 0x923   : > { %v2230_v60 = vsub.f32 %v7925_v43, %v2203_v7 }
 0x924   : > { %v2252_v54 = vmul.f32 1.442695, %v2231_v18 }
 0x925   : > { %v2250_v10 = vmul.f32 1.442695, %v2230_v60 }
 0x926   : > { %6733 = vpow2.f32 %v2252_v54 }
 0x927   : > { %6735 = vpow2.f32 %v2250_v10 }
 0x930   : > { %v8027_v16 = vpop.eup %6733 }
 0x931   : > { %v8029_v52 = vpop.eup %6735  ;;  %2284 = vadd.xlane.f32.xlu1 %v8027_v16 }
 0x932   : > { %2282 = vadd.xlane.f32.xlu0 %v8029_v52 }
 0x933   : > { %v3261_v62 = vpop.xlane.xlu1 %3260 }
 0x934   : > { %v3291_v12 = vsub.f32 %v7931_v4, %v3261_v62  ;;  %v3259_v3 = vpop.xlane.xlu0 %3258 }
 0x935   : > { %v3290_v19 = vsub.f32 %v7933_v9, %v3259_v3 }
 0x936   : > { %v3308_v17 = vmul.f32 1.442695, %v3291_v12 }
 0x937   : > { %v3306_v7 = vmul.f32 1.442695, %v3290_v19  ;;  %v2209_v43 = vpop.xlane.xlu1 %2208 }
 0x938   : > { %6737 = vpow2.f32 %v3308_v17  ;;  %v2233_v18 = vsub.f32 %v7937_v22, %v2209_v43  ;;  %v2207_v60 = vpop.xlane.xlu0 %2206 }
 0x939   : > { %6739 = vpow2.f32 %v3306_v7  ;;  %v2232_v54 = vsub.f32 %v7939_v14, %v2207_v60 }
 0x93a   : > { %v2256_v10 = vmul.f32 1.442695, %v2233_v18 }
 0x93b   : > { %v2254_v5 = vmul.f32 1.442695, %v2232_v54  ;;  %v3265_v21 = vpop.xlane.xlu1 %3264 }
 0x93c   : > { %6741 = vpow2.f32 %v2256_v10  ;;  %v3293_v57 = vsub.f32 %v7943_v26, %v3265_v21  ;;  %v3263_v4 = vpop.xlane.xlu0 %3262 }
 0x93d   : > { %6743 = vpow2.f32 %v2254_v5  ;;  %v3292_v9 = vsub.f32 %v7945_v24, %v3263_v4 }
 0x93e   : > { %v3312_v62 = vmul.f32 1.442695, %v3293_v57 }
 0x93f   : > { %v3310_v12 = vmul.f32 1.442695, %v3292_v9  ;;  %v2213_v3 = vpop.xlane.xlu1 %2212 }
 0x940   : > { %6745 = vpow2.f32 %v3312_v62  ;;  %v2235_v22 = vsub.f32 %v7949_v23, %v2213_v3  ;;  %v2211_v19 = vpop.xlane.xlu0 %2210 }
 0x941   : > { %6747 = vpow2.f32 %v3310_v12  ;;  %v2234_v14 = vsub.f32 %v7951_v6, %v2211_v19 }
 0x942   : > { %v8041_v17 = vpop.eup %6737  ;;  %v2260_v7 = vmul.f32 1.442695, %v2235_v22 }
 0x943   : > { %v8043_v43 = vpop.eup %6739  ;;  %v2258_v21 = vmul.f32 1.442695, %v2234_v14  ;;  %v3269_v26 = vpop.xlane.xlu1 %3268  ;;  %3340 = vadd.xlane.f32.xlu1 %v8041_v17 }
 0x944   : > { %6749 = vpow2.f32 %v2260_v7  ;;  %v3295_v57 = vsub.f32 %v7955_v46, %v3269_v26  ;;  %3338 = vadd.xlane.f32.xlu0 %v8043_v43  ;;  %v3267_v5 = vpop.xlane.xlu0 %3266 }
 0x945   : > { %6751 = vpow2.f32 %v2258_v21  ;;  %v3294_v24 = vsub.f32 %v7957_v11, %v3267_v5 }
 0x946   : > { %v8049_v23 = vpop.eup %6741  ;;  %v3316_v6 = vmul.f32 1.442695, %v3295_v57 }
 0x947   : > { %v8051_v18 = vpop.eup %6743  ;;  %v3314_v60 = vmul.f32 1.442695, %v3294_v24  ;;  %v2217_v54 = vpop.xlane.xlu1 %2216  ;;  %2288 = vadd.xlane.f32.xlu1 %v8049_v23 }
 0x948   : > { %6753 = vpow2.f32 %v3316_v6  ;;  %v2237_v10 = vsub.f32 %v7961_v45, %v2217_v54  ;;  %2286 = vadd.xlane.f32.xlu0 %v8051_v18  ;;  %v2215_v46 = vpop.xlane.xlu0 %2214 }
 0x949   : > { %6755 = vpow2.f32 %v3314_v60  ;;  %v2236_v4 = vsub.f32 %v7963_v58, %v2215_v46 }
 0x94a   : > { %v8057_v9 = vpop.eup %6745  ;;  %v2264_v11 = vmul.f32 1.442695, %v2237_v10 }
 0x94b   : > { %v8059_v62 = vpop.eup %6747  ;;  %v2262_v12 = vmul.f32 1.442695, %v2236_v4  ;;  %v3273_v3 = vpop.xlane.xlu1 %3272  ;;  %3344 = vadd.xlane.f32.xlu1 %v8057_v9 }
 0x94c   : > { %6757 = vpow2.f32 %v2264_v11  ;;  %v3297_v22 = vsub.f32 %v7967_v8, %v3273_v3  ;;  %3342 = vadd.xlane.f32.xlu0 %v8059_v62  ;;  %v3271_v45 = vpop.xlane.xlu0 %3270 }
 0x94d   : > { %6759 = vpow2.f32 %v2262_v12  ;;  %v3296_v19 = vsub.f32 %v7969_v27, %v3271_v45 }
 0x94e   : > { %v8065_v14 = vpop.eup %6749  ;;  %v3320_v58 = vmul.f32 1.442695, %v3297_v22 }
 0x94f   : > { %v8067_v7 = vpop.eup %6751  ;;  %v3318_v21 = vmul.f32 1.442695, %v3296_v19  ;;  %v2221_v26 = vpop.xlane.xlu1 %2220  ;;  %2292 = vadd.xlane.f32.xlu1 %v8065_v14 }
 0x950   : > { %6761 = vpow2.f32 %v3320_v58  ;;  %v2239_v57 = vsub.f32 %v7973_v59, %v2221_v26  ;;  %2290 = vadd.xlane.f32.xlu0 %v8067_v7  ;;  %v2219_v8 = vpop.xlane.xlu0 %2218 }
 0x951   : > { %6763 = vpow2.f32 %v3318_v21  ;;  %v2238_v5 = vsub.f32 %v7975_v47, %v2219_v8 }
 0x952   : > { %v8073_v24 = vpop.eup %6753  ;;  %v2268_v27 = vmul.f32 1.442695, %v2239_v57 }
 0x953   : > { %v8075_v6 = vpop.eup %6755  ;;  %v2266_v60 = vmul.f32 1.442695, %v2238_v5  ;;  %v3277_v54 = vpop.xlane.xlu1 %3276  ;;  %3348 = vadd.xlane.f32.xlu1 %v8073_v24 }
 0x954   : > { %6765 = vpow2.f32 %v2268_v27  ;;  %v3299_v10 = vsub.f32 %v7979_v25, %v3277_v54  ;;  %3346 = vadd.xlane.f32.xlu0 %v8075_v6  ;;  %v3275_v59 = vpop.xlane.xlu0 %3274 }
 0x955   : > { %6767 = vpow2.f32 %v2266_v60  ;;  %v3298_v46 = vsub.f32 %v7981_v44, %v3275_v59 }
 0x956   : > { %v8081_v4 = vpop.eup %6757  ;;  %v3324_v47 = vmul.f32 1.442695, %v3299_v10 }
 0x957   : > { %v8083_v11 = vpop.eup %6759  ;;  %v3322_v12 = vmul.f32 1.442695, %v3298_v46  ;;  %v2225_v3 = vpop.xlane.xlu1 %2224  ;;  %2296 = vadd.xlane.f32.xlu1 %v8081_v4 }
 0x958   : > { %6769 = vpow2.f32 %v3324_v47  ;;  %v2241_v22 = vsub.f32 %v7986_v56, %v2225_v3  ;;  %2294 = vadd.xlane.f32.xlu0 %v8083_v11  ;;  %v2223_v25 = vpop.xlane.xlu0 %2222 }
 0x959   : > { %6771 = vpow2.f32 %v3322_v12  ;;  %v2240_v45 = vsub.f32 %v7989_v2, %v2223_v25 }
 0x95a   : > { %v8089_v19 = vpop.eup %6761  ;;  %v2272_v44 = vmul.f32 1.442695, %v2241_v22 }
 0x95b   : > { %v8091_v58 = vpop.eup %6763  ;;  %v2270_v21 = vmul.f32 1.442695, %v2240_v45  ;;  %v3281_v26 = vpop.xlane.xlu1 %3280  ;;  %3352 = vadd.xlane.f32.xlu1 %v8089_v19 }
 0x95c   : > { %6773 = vpow2.f32 %v2272_v44  ;;  %v3301_v57 = vsub.f32 %v7993_v0, %v3281_v26  ;;  %3350 = vadd.xlane.f32.xlu0 %v8091_v58  ;;  %v3279_v56 = vpop.xlane.xlu0 %3278 }
 0x95d   : > { %6775 = vpow2.f32 %v2270_v21  ;;  %v3300_v8 = vsub.f32 %v7995_v48, %v3279_v56 }
 0x95e   : > { %v8097_v5 = vpop.eup %6765  ;;  %v3328_v2 = vmul.f32 1.442695, %v3301_v57 }
 0x95f   : > { %v8099_v27 = vpop.eup %6767  ;;  %v3326_v60 = vmul.f32 1.442695, %v3300_v8  ;;  %v3285_v54 = vpop.xlane.xlu1 %3284  ;;  %2300 = vadd.xlane.f32.xlu1 %v8097_v5 }
 0x960   : > { %6777 = vpow2.f32 %v3328_v2  ;;  %v3303_v10 = vsub.f32 %v7999_v13, %v3285_v54  ;;  %2298 = vadd.xlane.f32.xlu0 %v8099_v27  ;;  %v3283_v0 = vpop.xlane.xlu0 %3282 }
 0x961   : > { %6779 = vpow2.f32 %v3326_v60  ;;  %v3302_v59 = vsub.f32 %v8001_v50, %v3283_v0 }
 0x962   : > { %v8105_v46 = vpop.eup %6769  ;;  %v3332_v48 = vmul.f32 1.442695, %v3303_v10 }
 0x963   : > { %v8107_v47 = vpop.eup %6771  ;;  %v3330_v12 = vmul.f32 1.442695, %v3302_v59  ;;  %v3289_v3 = vpop.xlane.xlu1 %3288  ;;  %3356 = vadd.xlane.f32.xlu1 %v8105_v46 }
 0x964   : > { %6781 = vpow2.f32 %v3332_v48  ;;  %v3305_v22 = vsub.f32 %v8005_v15, %v3289_v3  ;;  %3354 = vadd.xlane.f32.xlu0 %v8107_v47  ;;  %v3287_v13 = vpop.xlane.xlu0 %3286 }
 0x965   : > { %6783 = vpow2.f32 %v3330_v12  ;;  %v3304_v25 = vsub.f32 %v8007_v40, %v3287_v13  ;;  %v7061_v12 = vld [vmem:[%s9090_s4] sm:$0xff]  ;;  %v665_v13 = vld [vmem:[%s9089_s3 + $0x38] sm:$0xff] }
 0x966   : > { %v8113_v45 = vpop.eup %6773  ;;  %v3336_v50 = vmul.f32 1.442695, %v3305_v22 }
 0x967   : > { %v8115_v44 = vpop.eup %6775  ;;  %v3334_v21 = vmul.f32 1.442695, %v3304_v25  ;;  %2304 = vadd.xlane.f32.xlu1 %v8113_v45  ;;  %v2277_v26 = vpop.xlane.xlu1 %2276 }
 0x968   : > { %6785 = vpow2.f32 %v3336_v50  ;;  %2302 = vadd.xlane.f32.xlu0 %v8115_v44  ;;  %v2275_v57 = vpop.xlane.xlu0 %2274 }
 0x969   : > { %6787 = vpow2.f32 %v3334_v21 }
 0x96a   : > { %v8119_v15 = vpop.eup %6777  ;;  %6789 = vrcp.f32 %v2277_v26 }
 0x96b   : > { %v8121_v56 = vpop.eup %6779  ;;  %6791 = vrcp.f32 %v2275_v57  ;;  %3360 = vadd.xlane.f32.xlu1 %v8119_v15 }
 0x96c   : > { %3358 = vadd.xlane.f32.xlu0 %v8121_v56 }
 0x96e   : > { %v8125_v40 = vpop.eup %6781 }
 0x96f   : > { %v8127_v8 = vpop.eup %6783  ;;  %3364 = vadd.xlane.f32.xlu1 %v8125_v40 }
 0x970   : > { %3362 = vadd.xlane.f32.xlu0 %v8127_v8 }
 0x972   : > { %v8131_v2 = vpop.eup %6785 }
 0x973   : > { %v8133_v60 = vpop.eup %6787  ;;  %3368 = vadd.xlane.f32.xlu1 %v8131_v2 }
 0x974   : > { %v6790_v54 = vpop.eup %6789  ;;  %3366 = vadd.xlane.f32.xlu0 %v8133_v60 }
 0x975   : > { %v6792_v10 = vpop.eup %6791  ;;  %v2323_v0 = vmul.f32 %v6790_v54, %v8011_v1  ;;  %v7062_v1 = vld [vmem:[%s9090_s4 + $0x8] sm:$0xff] }
 0x976   : > { %v2322_v59 = vmul.f32 %v6792_v10, %v8013_v63 }
 0x978   : > { %v6346_v48 = vpack.c.bf16 %v2323_v0, %v2322_v59 }
 0x97a   : > { %6347 = vmatpush3.bf16.xpose.msra.mxu1 %v6346_v48 }
 0x97b   : > { %6348 = vmatprep.subr.bf16.mxu1 %v9117_v53 }
 0x984   : > { %2410 = vrot.lane.b32.xlu1 %v7061_v12, %s7081_s13 }
 0x986   : > { %v2281_v3 = vpop.xlane.xlu1 %2280 }
 0x987   : > { %6793 = vrcp.f32 %v2281_v3  ;;  %v2279_v22 = vpop.xlane.xlu0 %2278 }
 0x988   : > { %6795 = vrcp.f32 %v2279_v22  ;;  %2412 = vrot.lane.b32.xlu1 %v7062_v1, %s7081_s13 }
 0x98a   : > { %703 = vperm.xlu0 %6525, %v665_v13  }
 0x98c   : > { %2944 = vrot.lane.b32.xlu1 %v7062_v1, %s7078_s10 }
 0x98e   : > { %2942 = vrot.lane.b32.xlu0 %v7061_v12, %s7078_s10 }
 0x990   : > { %3474 = vrot.lane.b32.xlu1 %v7062_v1, %s7082_s14 }
 0x991   : > { %v6794_v63 = vpop.eup %6793 }
 0x992   : > { %v6796_v25 = vpop.eup %6795  ;;  %3472 = vrot.lane.b32.xlu0 %v7061_v12, %s7082_s14  ;;  %v2325_v50 = vmul.f32 %v6794_v63, %v8019_v42 }
 0x993   : > { %v2324_v21 = vmul.f32 %v6796_v25, %v8021_v61 }
 0x994   : > { %3562 = vrot.lane.b32.xlu1 %v7208_v29, %s7083_s25 }
 0x995   : > { %v6349_v26 = vpack.c.bf16 %v2325_v50, %v2324_v21 }
 0x996   : > { %3560 = vrot.lane.b32.xlu0 %v7202_v28, %s7083_s25 }
 0x997   : > { %6350 = vmatpush3.bf16.xpose.msra.mxu1 %v6349_v26 }
 0x998   : > { %4093 = vrot.lane.b32.xlu1 %v7202_v28, %s7084_s26  ;;  %6351 = vmatprep.subr.bf16.mxu1 %v9117_v53 }
 0x99a   : > { %3564 = vrot.lane.b32.xlu0 %v7214_v30, %s7083_s25 }
 0x99c   : > { %4095 = vrot.lane.b32.xlu1 %v7208_v29, %s7084_s26 }
 0x99e   : > { %3566 = vrot.lane.b32.xlu0 %v7220_v31, %s7083_s25 }
 0x9a0   : > { %4097 = vrot.lane.b32.xlu1 %v7214_v30, %s7084_s26 }
 0x9a2   : > { %3568 = vrot.lane.b32.xlu0 %v7226_v32, %s7083_s25 }
 0x9a4   : > { %4099 = vrot.lane.b32.xlu1 %v7220_v31, %s7084_s26 }
 0x9a6   : > { %3570 = vrot.lane.b32.xlu0 %v7232_v33, %s7083_s25 }
 0x9a8   : > { %4101 = vrot.lane.b32.xlu1 %v7226_v32, %s7084_s26 }
 0x9aa   : > { %3572 = vrot.lane.b32.xlu0 %v7238_v34, %s7083_s25 }
 0x9ac   : > { %4103 = vrot.lane.b32.xlu1 %v7232_v33, %s7084_s26 }
 0x9ae   : > { %3574 = vrot.lane.b32.xlu0 %v7244_v35, %s7083_s25 }
 0x9b0   : > { %4105 = vrot.lane.b32.xlu1 %v7238_v34, %s7084_s26 }
 0x9b2   : > { %3576 = vrot.lane.b32.xlu0 %v7250_v36, %s7083_s25 }
 0x9b4   : > { %4107 = vrot.lane.b32.xlu1 %v7244_v35, %s7084_s26 }
 0x9b6   : > { %3578 = vrot.lane.b32.xlu0 %v7256_v37, %s7083_s25 }
 0x9b8   : > { %4109 = vrot.lane.b32.xlu1 %v7250_v36, %s7084_s26 }
 0x9ba   : > { %3580 = vrot.lane.b32.xlu0 %v7262_v38, %s7083_s25 }
 0x9bc   : > { %4111 = vrot.lane.b32.xlu1 %v7256_v37, %s7084_s26 }
 0x9be   : > { %v2285_v42 = vpop.xlane.xlu1 %2284  ;;  %3582 = vrot.lane.b32.xlu0 %v7268_v39, %s7083_s25 }
 0x9bf   : > { %6797 = vrcp.f32 %v2285_v42  ;;  %v2283_v61 = vpop.xlane.xlu0 %2282 }
 0x9c0   : > { %6799 = vrcp.f32 %v2283_v61  ;;  %4113 = vrot.lane.b32.xlu1 %v7262_v38, %s7084_s26 }
 0x9c2   : > { %3584 = vrot.lane.b32.xlu0 %v9122_v51, %s7083_s25 }
 0x9c4   : > { %4115 = vrot.lane.b32.xlu1 %v7268_v39, %s7084_s26 }
 0x9c6   : > { %3586 = vrot.lane.b32.xlu0 %v7280_v41, %s7083_s25 }
 0x9c8   : > { %4117 = vrot.lane.b32.xlu1 %v9122_v51, %s7084_s26 }
 0x9c9   : > { %v6798_v57 = vpop.eup %6797 }
 0x9ca   : > { %v6800_v54 = vpop.eup %6799  ;;  %3588 = vrot.lane.b32.xlu0 %v9123_v49, %s7083_s25  ;;  %v2327_v10 = vmul.f32 %v6798_v57, %v8027_v16 }
 0x9cb   : > { %v2326_v0 = vmul.f32 %v6800_v54, %v8029_v52 }
 0x9cc   : > { %4119 = vrot.lane.b32.xlu1 %v7280_v41, %s7084_s26 }
 0x9cd   : > { %v6352_v59 = vpack.c.bf16 %v2327_v10, %v2326_v0 }
 0x9ce   : > { %3590 = vrot.lane.b32.xlu0 %v9121_v20, %s7083_s25 }
 0x9cf   : > { %6353 = vmatpush3.bf16.xpose.msra.mxu1 %v6352_v59 }
 0x9d0   : > { %4123 = vrot.lane.b32.xlu1 %v9121_v20, %s7084_s26  ;;  %v3341_v48 = vpop.xlane.xlu1 %3340  ;;  %6354 = vmatprep.subr.bf16.mxu1 %v9117_v53 }
 0x9d1   : > { %6801 = vrcp.f32 %v3341_v48  ;;  %v3339_v12 = vpop.xlane.xlu0 %3338 }
 0x9d2   : > { %6803 = vrcp.f32 %v3339_v12  ;;  %4121 = vrot.lane.b32.xlu0 %v9123_v49, %s7084_s26 }
 0x9d4   : > { %v2289_v16 = vpop.xlane.xlu1 %2288 }
 0x9d5   : > { %6805 = vrcp.f32 %v2289_v16  ;;  %v2287_v52 = vpop.xlane.xlu0 %2286 }
 0x9d6   : > { %6807 = vrcp.f32 %v2287_v52 }
 0x9d8   : > { %v3345_v3 = vpop.xlane.xlu1 %3344 }
 0x9d9   : > { %6809 = vrcp.f32 %v3345_v3  ;;  %v3343_v22 = vpop.xlane.xlu0 %3342 }
 0x9da   : > { %6811 = vrcp.f32 %v3343_v22 }
 0x9db   : > { %v6802_v13 = vpop.eup %6801 }
 0x9dc   : > { %v6804_v1 = vpop.eup %6803  ;;  %v2293_v63 = vpop.xlane.xlu1 %2292  ;;  %v3387_v25 = vmul.f32 %v6802_v13, %v8041_v17 }
 0x9dd   : > { %6813 = vrcp.f32 %v2293_v63  ;;  %v2291_v50 = vpop.xlane.xlu0 %2290  ;;  %v3386_v21 = vmul.f32 %v6804_v1, %v8043_v43 }
 0x9de   : > { %6815 = vrcp.f32 %v2291_v50 }
 0x9df   : > { %v6806_v26 = vpop.eup %6805  ;;  %v6394_v42 = vpack.c.bf16 %v3387_v25, %v3386_v21 }
 0x9e0   : > { %v6808_v61 = vpop.eup %6807  ;;  %v3349_v57 = vpop.xlane.xlu1 %3348  ;;  %v2329_v54 = vmul.f32 %v6806_v26, %v8049_v23 }
 0x9e1   : > { %6817 = vrcp.f32 %v3349_v57  ;;  %6395 = vmatpush3.bf16.xpose.msra.mxu0 %v6394_v42  ;;  %v3347_v10 = vpop.xlane.xlu0 %3346  ;;  %v2328_v0 = vmul.f32 %v6808_v61, %v8051_v18 }
 0x9e2   : > { %6819 = vrcp.f32 %v3347_v10  ;;  %6396 = vmatprep.subr.bf16.mxu0 %v9117_v53 }
 0x9e3   : > { %v6810_v17 = vpop.eup %6809  ;;  %v6355_v59 = vpack.c.bf16 %v2329_v54, %v2328_v0 }
 0x9e4   : > { %v6812_v48 = vpop.eup %6811  ;;  %v2297_v12 = vpop.xlane.xlu1 %2296  ;;  %v3389_v43 = vmul.f32 %v6810_v17, %v8057_v9 }
 0x9e5   : > { %6821 = vrcp.f32 %v2297_v12  ;;  %6356 = vmatpush3.bf16.xpose.msra.mxu1 %v6355_v59  ;;  %v2295_v16 = vpop.xlane.xlu0 %2294  ;;  %v3388_v52 = vmul.f32 %v6812_v48, %v8059_v62 }
 0x9e6   : > { %6823 = vrcp.f32 %v2295_v16  ;;  %6357 = vmatprep.subr.bf16.mxu1 %v9117_v53 }
 0x9e7   : > { %v6814_v23 = vpop.eup %6813  ;;  %v6397_v3 = vpack.c.bf16 %v3389_v43, %v3388_v52 }
 0x9e8   : > { %v6816_v18 = vpop.eup %6815  ;;  %v3353_v22 = vpop.xlane.xlu1 %3352  ;;  %v2331_v13 = vmul.f32 %v6814_v23, %v8065_v14 }
 0x9e9   : > { %6825 = vrcp.f32 %v3353_v22  ;;  %6398 = vmatpush3.bf16.xpose.msra.mxu0 %v6397_v3  ;;  %v3351_v1 = vpop.xlane.xlu0 %3350  ;;  %v2330_v63 = vmul.f32 %v6816_v18, %v8067_v7 }
 0x9ea   : > { %6827 = vrcp.f32 %v3351_v1  ;;  %6399 = vmatprep.subr.bf16.mxu0 %v9117_v53 }
 0x9eb   : > { %v6818_v9 = vpop.eup %6817  ;;  %v6358_v25 = vpack.c.bf16 %v2331_v13, %v2330_v63 }
 0x9ec   : > { %v6820_v62 = vpop.eup %6819  ;;  %v2301_v50 = vpop.xlane.xlu1 %2300  ;;  %v3391_v21 = vmul.f32 %v6818_v9, %v8073_v24 }
 0x9ed   : > { %6829 = vrcp.f32 %v2301_v50  ;;  %6359 = vmatpush3.bf16.xpose.msra.mxu1 %v6358_v25  ;;  %v2299_v26 = vpop.xlane.xlu0 %2298  ;;  %v3390_v42 = vmul.f32 %v6820_v62, %v8075_v6 }
 0x9ee   : > { %6831 = vrcp.f32 %v2299_v26  ;;  %6360 = vmatprep.subr.bf16.mxu1 %v9117_v53 }
 0x9ef   : > { %v6822_v14 = vpop.eup %6821  ;;  %v6400_v61 = vpack.c.bf16 %v3391_v21, %v3390_v42 }
 0x9f0   : > { %v6824_v7 = vpop.eup %6823  ;;  %v3357_v57 = vpop.xlane.xlu1 %3356  ;;  %v2333_v54 = vmul.f32 %v6822_v14, %v8081_v4 }
 0x9f1   : > { %6833 = vrcp.f32 %v3357_v57  ;;  %6401 = vmatpush3.bf16.xpose.msra.mxu0 %v6400_v61  ;;  %v3355_v10 = vpop.xlane.xlu0 %3354  ;;  %v2332_v0 = vmul.f32 %v6824_v7, %v8083_v11 }
 0x9f2   : > { %6835 = vrcp.f32 %v3355_v10  ;;  %6402 = vmatprep.subr.bf16.mxu0 %v9117_v53 }
 0x9f3   : > { %v6826_v24 = vpop.eup %6825  ;;  %v6361_v17 = vpack.c.bf16 %v2333_v54, %v2332_v0  ;;  %v2338_v0 = vrot.slane %v7657_v55, 4 }
 0x9f4   : > { %v6828_v6 = vpop.eup %6827  ;;  %v2305_v59 = vpop.xlane.xlu1 %2304  ;;  %v3393_v48 = vmul.f32 %v6826_v24, %v8089_v19 }
 0x9f5   : > { %6837 = vrcp.f32 %v2305_v59  ;;  %6362 = vmatpush3.bf16.xpose.msra.mxu1 %v6361_v17  ;;  %v2303_v12 = vpop.xlane.xlu0 %2302  ;;  %v3392_v43 = vmul.f32 %v6828_v6, %v8091_v58 }
 0x9f6   : > { %6839 = vrcp.f32 %v2303_v12  ;;  %6363 = vmatprep.subr.bf16.mxu1 %v9117_v53 }
 0x9f7   : > { %v6830_v4 = vpop.eup %6829  ;;  %v6403_v16 = vpack.c.bf16 %v3393_v48, %v3392_v43 }
 0x9f8   : > { %v6832_v11 = vpop.eup %6831  ;;  %v3361_v52 = vpop.xlane.xlu1 %3360  ;;  %v2335_v23 = vmul.f32 %v6830_v4, %v8097_v5 }
 0x9f9   : > { %6841 = vrcp.f32 %v3361_v52  ;;  %6404 = vmatpush3.bf16.xpose.msra.mxu0 %v6403_v16  ;;  %v3359_v3 = vpop.xlane.xlu0 %3358  ;;  %v2334_v18 = vmul.f32 %v6832_v11, %v8099_v27  ;;  %v9127_v52 = vld [vmem:[#allocation7_spill] sm:$0xff] }
 0x9fa   : > { %6843 = vrcp.f32 %v3359_v3  ;;  %6405 = vmatprep.subr.bf16.mxu0 %v9117_v53 }
 0x9fb   : > { %v6834_v19 = vpop.eup %6833  ;;  %v6364_v22 = vpack.c.bf16 %v2335_v23, %v2334_v18  ;;  %v4125_v23 = vrot.slane %v9127_v52, 4 }
 0x9fc   : > { %v6836_v58 = vpop.eup %6835  ;;  %v3365_v13 = vpop.xlane.xlu1 %3364  ;;  %v3395_v1 = vmul.f32 %v6834_v19, %v8105_v46 }
 0x9fd   : > { %6845 = vrcp.f32 %v3365_v13  ;;  %6365 = vmatpush3.bf16.xpose.msra.mxu1 %v6364_v22  ;;  %v3363_v63 = vpop.xlane.xlu0 %3362  ;;  %v3394_v9 = vmul.f32 %v6836_v58, %v8107_v47  ;;  %v9128_v22 = vld [vmem:[#allocation8_spill] sm:$0xff] }
 0x9fe   : > { %6847 = vrcp.f32 %v3363_v63  ;;  %6366 = vmatprep.subr.bf16.mxu1 %v9117_v53 }
 0x9ff   : > { %v6838_v5 = vpop.eup %6837  ;;  %v6406_v25 = vpack.c.bf16 %v3395_v1, %v3394_v9 }
 0xa00   : > { %v6840_v27 = vpop.eup %6839  ;;  %v3369_v62 = vpop.xlane.xlu1 %3368  ;;  %v2337_v50 = vmul.f32 %v6838_v5, %v8113_v45 }
 0xa01   : > { %6407 = vmatpush3.bf16.xpose.msra.mxu0 %v6406_v25  ;;  %v2336_v21 = vmul.f32 %v6840_v27, %v8115_v44  ;;  %v3367_v26 = vpop.xlane.xlu0 %3366  ;;  %6849 = vrcp.f32 %v3369_v62 }
 0xa02   : > { %6408 = vmatprep.subr.bf16.mxu0 %v9117_v53  ;;  %6851 = vrcp.f32 %v3367_v26 }
 0xa03   : > { %v6842_v46 = vpop.eup %6841  ;;  %v6367_v42 = vpack.c.bf16 %v2337_v50, %v2336_v21 }
 0xa04   : > { %v6844_v14 = vpop.eup %6843  ;;  %v2411_v61 = vpop.permute.xlu1 %2410  ;;  %v3397_v47 = vmul.f32 %v6842_v46, %v8119_v15 }
 0xa05   : > { %6368 = vmatpush3.bf16.xpose.msra.mxu1 %v6367_v42  ;;  %v3396_v7 = vmul.f32 %v6844_v14, %v8121_v56 }
 0xa07   : > { %v6846_v57 = vpop.eup %6845  ;;  %v6409_v54 = vpack.c.bf16 %v3397_v47, %v3396_v7 }
 0xa08   : > { %v6848_v45 = vpop.eup %6847  ;;  %v8256_v10 = vpop.permute.xlu1 %2412  ;;  %v3399_v15 = vmul.f32 %v6846_v57, %v8125_v40 }
 0xa09   : > { %6410 = vmatpush3.bf16.xpose.msra.mxu0 %v6409_v54  ;;  %v704_v44 = vpop.permute.xlu0 %703  ;;  %v3398_v24 = vmul.f32 %v6848_v45, %v8127_v8 }
 0xa0a   : > { %6411 = vmatprep.subr.bf16.mxu0 %v9117_v53 }
 0xa0b   : > { %v6850_v6 = vpop.eup %6849  ;;  %v6412_v59 = vpack.c.bf16 %v3399_v15, %v3398_v24 }
 0xa0c   : > { %v8262_v17 = vpop.permute.xlu1 %2944  ;;  %5956 = vmatmul.mubr.f32.vlgmr.msra.gmra.mrb[34].mxu1 %v2338_v0  ;;  %v6852_v48 = vpop.eup %6851  ;;  %v3401_v40 = vmul.f32 %v6850_v6, %v8131_v2  ;;  %v9129_v6 = vmov 0.0  }
 0xa0d   : > { %v8264_v56 = vpop.permute.xlu0 %2942  ;;  %5960 = vmatprep.mubr.msk.f32.mxu1 %vm923_vm2, %v2411_v61  ;;  %v3400_v8 = vmul.f32 %v6852_v48, %v8133_v60  ;;  %v8285_v60 = vadd.f32 %v9128_v22, %v704_v44 }
 0xa0f   : > { %v6415_v16 = vpack.c.bf16 %v3401_v40, %v3400_v8  ;;  %v9130_v8 = vld [vmem:[#allocation5_spill] sm:$0xff] }
 0xa10   : > { %v8267_v12 = vpop.permute.xlu1 %3474 }
 0xa11   : > { %6413 = vmatpush3.bf16.xpose.msra.mxu0 %v6412_v59  ;;  %v8269_v55 = vpop.permute.xlu0 %3472 }
 0xa12   : > { %6414 = vmatprep.subr.bf16.mxu0 %v9117_v53 }
 0xa14   : > { %v8274_v43 = vpop.permute.xlu1 %3562 }
 0xa15   : > { %v8276_v4 = vpop.permute.xlu0 %3560 }
 0xa18   : > { %v4094_v11 = vpop.permute.xlu1 %4093 }
 0xa19   : > { %6416 = vmatpush3.bf16.xpose.msra.mxu0 %v6415_v16  ;;  %v8279_v3 = vpop.permute.xlu0 %3564 }
 0xa1a   : > { %6161 = vmatprep.subr.msk.mxu0 %vm972_vm1, %v4125_v23 }
 0xa1c   : > { %v4096_v18 = vpop.permute.xlu1 %4095 }
 0xa1d   : > { %v8282_v19 = vpop.permute.xlu0 %3566 }
 0xa20   : > { %v4098_v2 = vpop.permute.xlu1 %4097  ;;  %6088 = vmatmul.mubr.f32.vlgmr.msra.gmra.mrb[62].mxu0 %v8285_v60 }
 0xa21   : > { %6162 = vmatpush3.msk.msra.mxu0 %vm972_vm1, %v4125_v23  ;;  %6163 = vmatprep.mubr.msk.f32.mxu0 %vm923_vm2, %v4094_v11  ;;  %v8290_v58 = vpop.permute.xlu0 %3568 }
 0xa22   : > { %6441 = vmatprep.subr.bf16.mxu0 %v9117_v53 }
 0xa24   : > { %v4100_v13 = vpop.permute.xlu1 %4099  ;;  %6164 = vmatmul.mubr.msk.f32.vlgmr.msra.gmra.mrb[64].mxu0 %vm923_vm2, %v4096_v18 }
 0xa25   : > { %6166 = vmatprep.mubr.msk.f32.mxu0 %vm923_vm2, %v4098_v2  ;;  %v8295_v1 = vpop.permute.xlu0 %3570 }
 0xa28   : > { %v4102_v63 = vpop.permute.xlu1 %4101  ;;  %6167 = vmatmul.mubr.msk.f32.gmra.mrb[66].mxu0 %vm923_vm2, %v4100_v13 }
 0xa29   : > { %6169 = vmatprep.mubr.msk.f32.mxu0 %vm923_vm2, %v4102_v63  ;;  %v8299_v9 = vpop.permute.xlu0 %3572 }
 0xa2c   : > { %v4104_v5 = vpop.permute.xlu1 %4103 }
 0xa2d   : > { %6170 = vmatmul.mubr.msk.f32.gmra.mrb[68].mxu0 %vm923_vm2, %v4104_v5  ;;  %v8302_v25 = vpop.permute.xlu0 %3574 }
 0xa30   : > { %v4106_v27 = vpop.permute.xlu1 %4105 }
 0xa31   : > { %6172 = vmatprep.mubr.msk.f32.mxu0 %vm923_vm2, %v4106_v27  ;;  %v3577_v62 = vpop.permute.xlu0 %3576 }
 0xa34   : > { %v4108_v50 = vpop.permute.xlu1 %4107 }
 0xa35   : > { %6173 = vmatmul.mubr.msk.f32.gmra.mrb[70].mxu0 %vm923_vm2, %v4108_v50  ;;  %v3579_v21 = vpop.permute.xlu0 %3578 }
 0xa38   : > { %v4110_v46 = vpop.permute.xlu1 %4109 }
 0xa39   : > { %6175 = vmatprep.mubr.msk.f32.mxu0 %vm923_vm2, %v4110_v46  ;;  %v3581_v26 = vpop.permute.xlu0 %3580 }
 0xa3c   : > { %v4112_v42 = vpop.permute.xlu1 %4111 }
 0xa3d   : > { %6176 = vmatmul.mubr.msk.f32.gmra.mrb[72].mxu0 %vm923_vm2, %v4112_v42  ;;  %v3583_v14 = vpop.permute.xlu0 %3582 }
 0xa40   : > { %v4114_v61 = vpop.permute.xlu1 %4113 }
 0xa41   : > { %6178 = vmatprep.mubr.msk.f32.mxu0 %vm923_vm2, %v4114_v61  ;;  %v3585_v47 = vpop.permute.xlu0 %3584 }
 0xa44   : > { %v4116_v7 = vpop.permute.xlu1 %4115 }
 0xa45   : > { %6179 = vmatmul.mubr.msk.f32.gmra.mrb[74].mxu0 %vm923_vm2, %v4116_v7  ;;  %v3587_v57 = vpop.permute.xlu0 %3586 }
 0xa48   : > { %v4118_v54 = vpop.permute.xlu1 %4117 }
 0xa49   : > { %6181 = vmatprep.mubr.msk.f32.mxu0 %vm923_vm2, %v4118_v54  ;;  %v3589_v45 = vpop.permute.xlu0 %3588 }
 0xa4c   : > { %v4120_v44 = vpop.permute.xlu1 %4119 }
 0xa4d   : > { %6182 = vmatmul.mubr.msk.f32.gmra.mrb[76].mxu0 %vm923_vm2, %v4120_v44  ;;  %v3591_v0 = vpop.permute.xlu0 %3590 }
 0xa50   : > { %v4124_v15 = vpop.permute.xlu1 %4123 }
 0xa51   : > { %v4122_v24 = vpop.permute.xlu0 %4121 }
 0xa52   : > { %6184 = vmatprep.mubr.msk.f32.mxu0 %vm923_vm2, %v4122_v24 }
 0xa53   : > { %6185 = vmatmul.mubr.msk.f32.gmra.mrb[78].mxu0 %vm923_vm2, %v4124_v15 }
 0xa54   : > { %6219 = vmatprep.mubr.msk.f32.mxu0 %vm7079_vm3, %v9129_v6 }
 0xadf   : > { %v2406_v59 = vpop.f32.mrb[34].mxu1 }
 0xae0   : > { %v5957_v48 = vpop.f32.mrb[35].mxu1  ;;  %5958 = vmatprep.subr.msk.mxu1 %vm972_vm1, %v2406_v59 }
 0xae1   : > { %5959 = vmatpush3.msk.msra.mxu1 %vm972_vm1, %v2406_v59 }
 0xae2   : > { %5961 = vmatmul.mubr.msk.f32.vlgmr.msra.gmra.mrb[36].mxu1 %vm923_vm2, %v8256_v10  ;;  %6024 = vmatprep.subr.msk.mxu1 %vm972_vm1, %v9130_v8  ;;  %v3592_v10 = vrot.slane %v9127_v52, 2 }
 0xae3   : > { %6025 = vmatpush3.msk.msra.mxu1 %vm972_vm1, %v9130_v8  ;;  %6026 = vmatprep.mubr.msk.f32.mxu1 %vm923_vm2, %v8264_v56 }
 0xaea   : > { %6027 = vmatmul.mubr.msk.f32.vlgmr.msra.gmra.mrb[36].mxu1 %vm923_vm2, %v8262_v17 }
 0xaeb   : > { %6092 = vmatprep.mubr.msk.f32.mxu1 %vm923_vm2, %v8269_v55 }
 0xaf3   : > { %v3468_v40 = vpop.f32.mrb[62].mxu0 }
 0xaf4   : > { %v6089_v16 = vpop.f32.mrb[63].mxu0  ;;  %6090 = vmatprep.subr.msk.mxu1 %vm972_vm1, %v3468_v40 }
 0xaf5   : > { %6091 = vmatpush3.msk.msra.mxu1 %vm972_vm1, %v3468_v40 }
 0xaf6   : > { %6093 = vmatmul.mubr.msk.f32.vlgmr.msra.gmra.mrb[36].mxu1 %vm923_vm2, %v8267_v12  ;;  %6095 = vmatprep.subr.msk.mxu1 %vm972_vm1, %v3592_v10 }
 0xaf7   : > { %6096 = vmatpush3.msk.msra.mxu1 %vm972_vm1, %v3592_v10  ;;  %6097 = vmatprep.mubr.msk.f32.mxu1 %vm923_vm2, %v8276_v4  ;;  %v6165_v17 = vpop.f32.mrb[64].mxu0 }
 0xaf8   : > { %v8339_v56 = vmul.f32 0.70710677, %v6165_v17  ;;  %v4226_v55 = vpop.f32.mrb[65].mxu0  ;;  %6417 = vmatprep.subr.bf16.mxu1 %v9117_v53 }
 0xaf9   : > { %v8385_v50 = vmul.f32 0.70710677, %v4226_v55 }
 0xafa   : > { %4323 = vmax.xlane.f32.xlu0 %v8339_v56  ;;  %6098 = vmatmul.mubr.msk.f32.vlgmr.msra.gmra.mrb[38].mxu1 %vm923_vm2, %v8274_v43 }
 0xafb   : > { %6100 = vmatprep.mubr.msk.f32.mxu1 %vm923_vm2, %v8279_v3  ;;  %v6168_v12 = vpop.f32.mrb[66].mxu0 }
 0xafc   : > { %v4236_v11 = vpop.f32.mrb[67].mxu0  ;;  %v8399_v54 = vmul.f32 0.70710677, %v6168_v12 }
 0xafd   : > { %v8391_v42 = vmul.f32 0.70710677, %v4236_v11 }
 0xafe   : > { %6101 = vmatmul.mubr.msk.f32.gmra.mrb[40].mxu1 %vm923_vm2, %v8282_v19 }
 0xaff   : > { %6103 = vmatprep.mubr.msk.f32.mxu1 %vm923_vm2, %v8290_v58 }
 0xb00   : > { %v6171_v4 = vpop.f32.mrb[68].mxu0 }
 0xb01   : > { %v4246_v23 = vpop.f32.mrb[69].mxu0  ;;  %v8411_v8 = vmul.f32 0.70710677, %v6171_v4 }
 0xb02   : > { %6104 = vmatmul.mubr.msk.f32.gmra.mrb[42].mxu1 %vm923_vm2, %v8295_v1  ;;  %v8403_v44 = vmul.f32 0.70710677, %v4246_v23 }
 0xb03   : > { %6106 = vmatprep.mubr.msk.f32.mxu1 %vm923_vm2, %v8299_v9 }
 0xb06   : > { %6107 = vmatmul.mubr.msk.f32.gmra.mrb[44].mxu1 %vm923_vm2, %v8302_v25 }
 0xb07   : > { %6109 = vmatprep.mubr.msk.f32.mxu1 %vm923_vm2, %v3577_v62 }
 0xb08   : > { %v6174_v43 = vpop.f32.mrb[70].mxu0 }
 0xb09   : > { %v4256_v3 = vpop.f32.mrb[71].mxu0  ;;  %v8423_v4 = vmul.f32 0.70710677, %v6174_v43 }
 0xb0a   : > { %6110 = vmatmul.mubr.msk.f32.gmra.mrb[46].mxu1 %vm923_vm2, %v3579_v21  ;;  %v8415_v16 = vmul.f32 0.70710677, %v4256_v3 }
 0xb0b   : > { %6112 = vmatprep.mubr.msk.f32.mxu1 %vm923_vm2, %v3581_v26 }
 0xb0e   : > { %6113 = vmatmul.mubr.msk.f32.gmra.mrb[48].mxu1 %vm923_vm2, %v3583_v14 }
 0xb0f   : > { %6115 = vmatprep.mubr.msk.f32.mxu1 %vm923_vm2, %v3585_v47 }
 0xb10   : > { %v8362_v18 = vpop.f32.mrb[72].mxu0 }
 0xb11   : > { %v4266_v19 = vpop.f32.mrb[73].mxu0 }
 0xb12   : > { %6116 = vmatmul.mubr.msk.f32.gmra.mrb[50].mxu1 %vm923_vm2, %v3587_v57  ;;  %v8427_v23 = vmul.f32 0.70710677, %v4266_v19 }
 0xb13   : > { %6118 = vmatprep.mubr.msk.f32.mxu1 %vm923_vm2, %v3589_v45 }
 0xb16   : > { %6119 = vmatmul.mubr.msk.f32.gmra.mrb[52].mxu1 %vm923_vm2, %v3591_v0 }
 0xb17   : > { %6153 = vmatprep.mubr.msk.f32.mxu1 %vm7079_vm3, %v9129_v6 }
 0xb18   : > { %v8369_v22 = vpop.f32.mrb[74].mxu0 }
 0xb19   : > { %v4276_v2 = vpop.f32.mrb[75].mxu0 }
 0xb1a   : > { %v8440_v43 = vmul.f32 0.70710677, %v4276_v2 }
 0xb20   : > { %v8371_v58 = vpop.f32.mrb[76].mxu0 }
 0xb21   : > { %v8373_v13 = vpop.f32.mrb[77].mxu0 }
 0xb22   : > { %v8460_v2 = vmul.f32 0.70710677, %v8373_v13 }
 0xb26   : > { %v8375_v1 = vpop.f32.mrb[78].mxu0 }
 0xb27   : > { %v8377_v63 = vpop.f32.mrb[79].mxu0 }
 0xb87   : > { %v4324_v13 = vpop.xlane.xlu0 %4323 }
 0xbcd   : > { %v6099_v9 = vpop.f32.mrb[38].mxu1 }
 0xbce   : > { %v8379_v5 = vmul.f32 0.70710677, %v6099_v9  ;;  %v3693_v25 = vpop.f32.mrb[39].mxu1 }
 0xbcf   : > { %v8381_v27 = vmul.f32 0.70710677, %v3693_v25  ;;  %v8436_v25 = vmul.f32 0.70710677, %v8362_v18 }
 0xbd0   : > { %3790 = vmax.xlane.f32.xlu1 %v8379_v5 }
 0xbd1   : > { %3788 = vmax.xlane.f32.xlu0 %v8381_v27  ;;  %v6102_v62 = vpop.f32.mrb[40].mxu1 }
 0xbd2   : > { %v8387_v21 = vmul.f32 0.70710677, %v6102_v62  ;;  %v3703_v46 = vpop.f32.mrb[41].mxu1 }
 0xbd3   : > { %v8393_v61 = vmul.f32 0.70710677, %v3703_v46  ;;  %v8449_v46 = vmul.f32 0.70710677, %v8369_v22  ;;  %v8467_v22 = vmul.f32 0.70710677, %v8377_v63 }
 0xbd4   : > { %4321 = vmax.xlane.f32.xlu1 %v8385_v50 }
 0xbd5   : > { %3794 = vmax.xlane.f32.xlu0 %v8387_v21  ;;  %v6105_v26 = vpop.f32.mrb[42].mxu1 }
 0xbd6   : > { %v3713_v14 = vpop.f32.mrb[43].mxu1  ;;  %v8405_v24 = vmul.f32 0.70710677, %v6105_v26 }
 0xbd7   : > { %v8397_v7 = vmul.f32 0.70710677, %v3713_v14 }
 0xbd8   : > { %4325 = vmax.xlane.f32.xlu1 %v8391_v42 }
 0xbd9   : > { %3792 = vmax.xlane.f32.xlu0 %v8393_v61  ;;  %v6108_v47 = vpop.f32.mrb[44].mxu1 }
 0xbda   : > { %v3723_v57 = vpop.f32.mrb[45].mxu1  ;;  %v8417_v17 = vmul.f32 0.70710677, %v6108_v47  ;;  %v8470_v47 = vmul.f32 0.70710677, %v8371_v58 }
 0xbdb   : > { %v8409_v59 = vmul.f32 0.70710677, %v3723_v57  ;;  %v8475_v57 = vmul.f32 0.70710677, %v8375_v1 }
 0xbdc   : > { %3796 = vmax.xlane.f32.xlu1 %v8397_v7 }
 0xbdd   : > { %4327 = vmax.xlane.f32.xlu0 %v8399_v54  ;;  %v6111_v45 = vpop.f32.mrb[46].mxu1 }
 0xbde   : > { %v3733_v0 = vpop.f32.mrb[47].mxu1  ;;  %v8429_v3 = vmul.f32 0.70710677, %v6111_v45  ;;  %v4354_v45 = vsub.f32 %v8339_v56, %v4324_v13 }
 0xbdf   : > { %v8421_v12 = vmul.f32 0.70710677, %v3733_v0 }
 0xbe0   : > { %4329 = vmax.xlane.f32.xlu1 %v8403_v44 }
 0xbe1   : > { %3798 = vmax.xlane.f32.xlu0 %v8405_v24  ;;  %v6114_v15 = vpop.f32.mrb[48].mxu1 }
 0xbe2   : > { %v3743_v48 = vpop.f32.mrb[49].mxu1  ;;  %v8442_v62 = vmul.f32 0.70710677, %v6114_v15 }
 0xbe3   : > { %v8433_v9 = vmul.f32 0.70710677, %v3743_v48 }
 0xbe4   : > { %3800 = vmax.xlane.f32.xlu1 %v8409_v59 }
 0xbe5   : > { %4331 = vmax.xlane.f32.xlu0 %v8411_v8  ;;  %v6117_v40 = vpop.f32.mrb[50].mxu1 }
 0xbe6   : > { %v3753_v10 = vpop.f32.mrb[51].mxu1  ;;  %v8455_v26 = vmul.f32 0.70710677, %v6117_v40  ;;  %v4371_v40 = vmul.f32 1.442695, %v4354_v45 }
 0xbe7   : > { %v8446_v19 = vmul.f32 0.70710677, %v3753_v10 }
 0xbe8   : > { %4333 = vmax.xlane.f32.xlu1 %v8415_v16 }
 0xbe9   : > { %3802 = vmax.xlane.f32.xlu0 %v8417_v17  ;;  %v6120_v55 = vpop.f32.mrb[52].mxu1 }
 0xbea   : > { %v3763_v11 = vpop.f32.mrb[53].mxu1  ;;  %v8462_v14 = vmul.f32 0.70710677, %v6120_v55 }
 0xbeb   : > { %v8453_v18 = vmul.f32 0.70710677, %v3763_v11 }
 0xbec   : > { %3804 = vmax.xlane.f32.xlu1 %v8421_v12 }
 0xbed   : > { %4335 = vmax.xlane.f32.xlu0 %v8423_v4 }
 0xbf0   : > { %4337 = vmax.xlane.f32.xlu1 %v8427_v23 }
 0xbf1   : > { %3806 = vmax.xlane.f32.xlu0 %v8429_v3 }
 0xbf4   : > { %3808 = vmax.xlane.f32.xlu1 %v8433_v9 }
 0xbf5   : > { %4339 = vmax.xlane.f32.xlu0 %v8436_v25 }
 0xbf8   : > { %4341 = vmax.xlane.f32.xlu1 %v8440_v43 }
 0xbf9   : > { %3810 = vmax.xlane.f32.xlu0 %v8442_v62 }
 0xbfc   : > { %3812 = vmax.xlane.f32.xlu1 %v8446_v19 }
 0xbfd   : > { %4343 = vmax.xlane.f32.xlu0 %v8449_v46 }
 0xc00   : > { %3816 = vmax.xlane.f32.xlu1 %v8453_v18 }
 0xc01   : > { %3814 = vmax.xlane.f32.xlu0 %v8455_v26 }
 0xc04   : > { %4345 = vmax.xlane.f32.xlu1 %v8460_v2 }
 0xc05   : > { %3818 = vmax.xlane.f32.xlu0 %v8462_v14 }
 0xc08   : > { %4349 = vmax.xlane.f32.xlu1 %v8467_v22 }
 0xc09   : > { %4347 = vmax.xlane.f32.xlu0 %v8470_v47 }
 0xc0d   : > { %4351 = vmax.xlane.f32.xlu0 %v8475_v57 }
 0xc5d   : > { %v3791_v0 = vpop.xlane.xlu1 %3790 }
 0xc5e   : > { %v3821_v15 = vsub.f32 %v8379_v5, %v3791_v0  ;;  %v3789_v63 = vpop.xlane.xlu0 %3788 }
 0xc5f   : > { %v3820_v48 = vsub.f32 %v8381_v27, %v3789_v63 }
 0xc60   : > { %v3838_v58 = vmul.f32 1.442695, %v3821_v15 }
 0xc61   : > { %v3836_v10 = vmul.f32 1.442695, %v3820_v48  ;;  %v4322_v55 = vpop.xlane.xlu1 %4321 }
 0xc62   : > { %6853 = vpow2.f32 %v3838_v58  ;;  %v4353_v11 = vsub.f32 %v8385_v50, %v4322_v55  ;;  %v3795_v1 = vpop.xlane.xlu0 %3794 }
 0xc63   : > { %6855 = vpow2.f32 %v3836_v10  ;;  %v3823_v6 = vsub.f32 %v8387_v21, %v3795_v1 }
 0xc64   : > { %v4369_v52 = vmul.f32 1.442695, %v4353_v11  ;;  %6857 = vpow2.f32 %v4371_v40 }
 0xc65   : > { %v4326_v56 = vpop.xlane.xlu1 %4325  ;;  %v3842_v13 = vmul.f32 1.442695, %v3823_v6 }
 0xc66   : > { %6859 = vpow2.f32 %v4369_v52  ;;  %v4355_v5 = vsub.f32 %v8391_v42, %v4326_v56  ;;  %v3793_v0 = vpop.xlane.xlu0 %3792 }
 0xc67   : > { %v3822_v27 = vsub.f32 %v8393_v61, %v3793_v0  ;;  %6861 = vpow2.f32 %v3842_v13 }
 0xc68   : > { %v4373_v63 = vmul.f32 1.442695, %v4355_v5 }
 0xc69   : > { %v3840_v45 = vmul.f32 1.442695, %v3822_v27  ;;  %v3797_v15 = vpop.xlane.xlu1 %3796 }
 0xc6a   : > { %v3824_v50 = vsub.f32 %v8397_v7, %v3797_v15  ;;  %v4328_v48 = vpop.xlane.xlu0 %4327 }
 0xc6b   : > { %6863 = vpow2.f32 %v3840_v45  ;;  %v4356_v21 = vsub.f32 %v8399_v54, %v4328_v48 }
 0xc6c   : > { %v8487_v58 = vpop.eup %6853  ;;  %6865 = vpow2.f32 %v4373_v63  ;;  %v3844_v42 = vmul.f32 1.442695, %v3824_v50 }
 0xc6d   : > { %v8489_v40 = vpop.eup %6855  ;;  %v4375_v52 = vmul.f32 1.442695, %v4356_v21  ;;  %v4330_v6 = vpop.xlane.xlu1 %4329  ;;  %3870 = vadd.xlane.f32.xlu0 %v8487_v58 }
 0xc6e   : > { %v4357_v61 = vsub.f32 %v8403_v44, %v4330_v6  ;;  %3868 = vadd.xlane.f32.xlu1 %v8489_v40  ;;  %v3799_v10 = vpop.xlane.xlu0 %3798  ;;  %v8494_v7 = vpop.eup %6857 }
 0xc6f   : > { %6867 = vpow2.f32 %v4375_v52  ;;  %v3825_v54 = vsub.f32 %v8405_v24, %v3799_v10 }
 0xc70   : > { %v8497_v55 = vpop.eup %6859  ;;  %6869 = vpow2.f32 %v3844_v42  ;;  %v4377_v56 = vmul.f32 1.442695, %v4357_v61 }
 0xc71   : > { %v3846_v11 = vmul.f32 1.442695, %v3825_v54  ;;  %v3801_v1 = vpop.xlane.xlu1 %3800  ;;  %4403 = vadd.xlane.f32.xlu0 %v8494_v7  ;;  %v8503_v0 = vpop.eup %6861 }
 0xc72   : > { %v3826_v13 = vsub.f32 %v8409_v59, %v3801_v1  ;;  %4401 = vadd.xlane.f32.xlu1 %v8497_v55  ;;  %v4332_v44 = vpop.xlane.xlu0 %4331 }
 0xc73   : > { %6871 = vpow2.f32 %v3846_v11  ;;  %v4358_v5 = vsub.f32 %v8411_v8, %v4332_v44 }
 0xc74   : > { %6873 = vpow2.f32 %v4377_v56  ;;  %v3848_v15 = vmul.f32 1.442695, %v3826_v13 }
 0xc75   : > { %v8505_v27 = vpop.eup %6863  ;;  %v4379_v24 = vmul.f32 1.442695, %v4358_v5  ;;  %v4334_v45 = vpop.xlane.xlu1 %4333  ;;  %3874 = vadd.xlane.f32.xlu0 %v8503_v0 }
 0xc76   : > { %v4359_v63 = vsub.f32 %v8415_v16, %v4334_v45  ;;  %3872 = vadd.xlane.f32.xlu1 %v8505_v27  ;;  %v3803_v59 = vpop.xlane.xlu0 %3802  ;;  %v8511_v48 = vpop.eup %6865 }
 0xc77   : > { %6875 = vpow2.f32 %v4379_v24  ;;  %v3827_v50 = vsub.f32 %v8417_v17, %v3803_v59 }
 0xc78   : > { %6877 = vpow2.f32 %v3848_v15  ;;  %v4381_v6 = vmul.f32 1.442695, %v4359_v63 }
 0xc79   : > { %v8513_v8 = vpop.eup %6867  ;;  %v3850_v21 = vmul.f32 1.442695, %v3827_v50  ;;  %v3805_v52 = vpop.xlane.xlu1 %3804 }
 0xc7a   : > { %v3828_v42 = vsub.f32 %v8421_v12, %v3805_v52  ;;  %4405 = vadd.xlane.f32.xlu1 %v8511_v48  ;;  %4407 = vadd.xlane.f32.xlu0 %v8513_v8  ;;  %v4336_v16 = vpop.xlane.xlu0 %4335  ;;  %v8519_v10 = vpop.eup %6869 }
 0xc7b   : > { %6879 = vpow2.f32 %v3850_v21  ;;  %v4360_v61 = vsub.f32 %v8423_v4, %v4336_v16 }
 0xc7c   : > { %6881 = vpow2.f32 %v4381_v6  ;;  %v3852_v1 = vmul.f32 1.442695, %v3828_v42 }
 0xc7d   : > { %v8521_v17 = vpop.eup %6871  ;;  %v4383_v54 = vmul.f32 1.442695, %v4360_v61  ;;  %v4338_v11 = vpop.xlane.xlu1 %4337 }
 0xc7e   : > { %v4361_v56 = vsub.f32 %v8427_v23, %v4338_v11  ;;  %3876 = vadd.xlane.f32.xlu1 %v8519_v10  ;;  %3878 = vadd.xlane.f32.xlu0 %v8521_v17  ;;  %v3807_v12 = vpop.xlane.xlu0 %3806  ;;  %v8527_v44 = vpop.eup %6873 }
 0xc7f   : > { %6883 = vpow2.f32 %v4383_v54  ;;  %v3829_v13 = vsub.f32 %v8429_v3, %v3807_v12 }
 0xc80   : > { %6885 = vpow2.f32 %v3852_v1  ;;  %v4385_v45 = vmul.f32 1.442695, %v4361_v56 }
 0xc81   : > { %v8529_v4 = vpop.eup %6875  ;;  %v3854_v5 = vmul.f32 1.442695, %v3829_v13  ;;  %v3809_v24 = vpop.xlane.xlu1 %3808 }
 0xc82   : > { %v3830_v15 = vsub.f32 %v8433_v9, %v3809_v24  ;;  %4409 = vadd.xlane.f32.xlu1 %v8527_v44  ;;  %4411 = vadd.xlane.f32.xlu0 %v8529_v4  ;;  %v4340_v23 = vpop.xlane.xlu0 %4339  ;;  %v8535_v59 = vpop.eup %6877 }
 0xc83   : > { %6887 = vpow2.f32 %v3854_v5  ;;  %v4362_v63 = vsub.f32 %v8436_v25, %v4340_v23 }
 0xc84   : > { %6889 = vpow2.f32 %v4385_v45  ;;  %v3856_v52 = vmul.f32 1.442695, %v3830_v15 }
 0xc85   : > { %v8537_v3 = vpop.eup %6879  ;;  %v4387_v50 = vmul.f32 1.442695, %v4362_v63  ;;  %v4342_v21 = vpop.xlane.xlu1 %4341 }
 0xc86   : > { %v4363_v6 = vsub.f32 %v8440_v43, %v4342_v21  ;;  %3880 = vadd.xlane.f32.xlu1 %v8535_v59  ;;  %3882 = vadd.xlane.f32.xlu0 %v8537_v3  ;;  %v3811_v9 = vpop.xlane.xlu0 %3810  ;;  %v8543_v16 = vpop.eup %6881 }
 0xc87   : > { %6891 = vpow2.f32 %v4387_v50  ;;  %v3831_v42 = vsub.f32 %v8442_v62, %v3811_v9 }
 0xc88   : > { %6893 = vpow2.f32 %v3856_v52  ;;  %v4389_v11 = vmul.f32 1.442695, %v4363_v6 }
 0xc89   : > { %v8545_v25 = vpop.eup %6883  ;;  %v3858_v61 = vmul.f32 1.442695, %v3831_v42  ;;  %v3813_v54 = vpop.xlane.xlu1 %3812 }
 0xc8a   : > { %v3832_v1 = vsub.f32 %v8446_v19, %v3813_v54  ;;  %4413 = vadd.xlane.f32.xlu1 %v8543_v16  ;;  %4415 = vadd.xlane.f32.xlu0 %v8545_v25  ;;  %v4344_v43 = vpop.xlane.xlu0 %4343  ;;  %v8551_v12 = vpop.eup %6885 }
 0xc8b   : > { %6895 = vpow2.f32 %v3858_v61  ;;  %v4364_v56 = vsub.f32 %v8449_v46, %v4344_v43 }
 0xc8c   : > { %6897 = vpow2.f32 %v4389_v11  ;;  %v3860_v24 = vmul.f32 1.442695, %v3832_v1 }
 0xc8d   : > { %v8553_v62 = vpop.eup %6887  ;;  %v4391_v13 = vmul.f32 1.442695, %v4364_v56  ;;  %v3817_v5 = vpop.xlane.xlu1 %3816 }
 0xc8e   : > { %v3834_v45 = vsub.f32 %v8453_v18, %v3817_v5  ;;  %3884 = vadd.xlane.f32.xlu1 %v8551_v12  ;;  %3886 = vadd.xlane.f32.xlu0 %v8553_v62  ;;  %v3815_v19 = vpop.xlane.xlu0 %3814  ;;  %v8559_v23 = vpop.eup %6889 }
 0xc8f   : > { %6899 = vpow2.f32 %v4391_v13  ;;  %v3833_v15 = vsub.f32 %v8455_v26, %v3815_v19 }
 0xc90   : > { %6901 = vpow2.f32 %v3860_v24  ;;  %v3864_v21 = vmul.f32 1.442695, %v3834_v45 }
 0xc91   : > { %v8561_v46 = vpop.eup %6891  ;;  %v3862_v63 = vmul.f32 1.442695, %v3833_v15  ;;  %v4346_v50 = vpop.xlane.xlu1 %4345 }
 0xc92   : > { %v4365_v52 = vsub.f32 %v8460_v2, %v4346_v50  ;;  %4417 = vadd.xlane.f32.xlu1 %v8559_v23  ;;  %4419 = vadd.xlane.f32.xlu0 %v8561_v46  ;;  %v3819_v18 = vpop.xlane.xlu0 %3818  ;;  %v8567_v9 = vpop.eup %6893 }
 0xc93   : > { %6903 = vpow2.f32 %v3862_v63  ;;  %v3835_v6 = vsub.f32 %v8462_v14, %v3819_v18  ;;  %v8618_v18 = vld [vmem:[%s9090_s4 + $0x8] sm:$0xff] }
 0xc94   : > { %6905 = vpow2.f32 %v3864_v21  ;;  %v4393_v54 = vmul.f32 1.442695, %v4365_v52  ;;  %v8609_v52 = vld [vmem:[%s9090_s4] sm:$0xff] }
 0xc95   : > { %v8569_v26 = vpop.eup %6895  ;;  %v3866_v42 = vmul.f32 1.442695, %v3835_v6  ;;  %v4350_v61 = vpop.xlane.xlu1 %4349 }
 0xc96   : > { %v4367_v11 = vsub.f32 %v8467_v22, %v4350_v61  ;;  %3888 = vadd.xlane.f32.xlu1 %v8567_v9  ;;  %3890 = vadd.xlane.f32.xlu0 %v8569_v26  ;;  %v4348_v2 = vpop.xlane.xlu0 %4347  ;;  %v8575_v43 = vpop.eup %6897 }
 0xc97   : > { %6907 = vpow2.f32 %v3866_v42  ;;  %v4366_v1 = vsub.f32 %v8470_v47, %v4348_v2 }
 0xc98   : > { %6909 = vpow2.f32 %v4393_v54  ;;  %v4397_v13 = vmul.f32 1.442695, %v4367_v11 }
 0xc99   : > { %v8577_v14 = vpop.eup %6899  ;;  %v4395_v56 = vmul.f32 1.442695, %v4366_v1 }
 0xc9a   : > { %4421 = vadd.xlane.f32.xlu1 %v8575_v43  ;;  %4423 = vadd.xlane.f32.xlu0 %v8577_v14  ;;  %v4352_v22 = vpop.xlane.xlu0 %4351  ;;  %v8582_v24 = vpop.eup %6901 }
 0xc9b   : > { %6911 = vpow2.f32 %v4395_v56  ;;  %v4368_v5 = vsub.f32 %v8475_v57, %v4352_v22 }
 0xc9c   : > { %6913 = vpow2.f32 %v4397_v13 }
 0xc9d   : > { %v8584_v45 = vpop.eup %6903  ;;  %v4399_v47 = vmul.f32 1.442695, %v4368_v5 }
 0xc9e   : > { %3892 = vadd.xlane.f32.xlu1 %v8582_v24  ;;  %3894 = vadd.xlane.f32.xlu0 %v8584_v45  ;;  %v8588_v19 = vpop.eup %6905 }
 0xc9f   : > { %6915 = vpow2.f32 %v4399_v47 }
 0xca1   : > { %v8590_v15 = vpop.eup %6907 }
 0xca2   : > { %3896 = vadd.xlane.f32.xlu1 %v8588_v19  ;;  %3898 = vadd.xlane.f32.xlu0 %v8590_v15  ;;  %v8594_v57 = vpop.eup %6909 }
 0xca5   : > { %v8596_v63 = vpop.eup %6911 }
 0xca6   : > { %4425 = vadd.xlane.f32.xlu1 %v8594_v57  ;;  %4427 = vadd.xlane.f32.xlu0 %v8596_v63  ;;  %v8600_v50 = vpop.eup %6913 }
 0xca9   : > { %v8602_v21 = vpop.eup %6915 }
 0xcaa   : > { %4429 = vadd.xlane.f32.xlu1 %v8600_v50  ;;  %4431 = vadd.xlane.f32.xlu0 %v8602_v21 }
 0xcbb   : > { %4005 = vrot.lane.b32.xlu1 %v8609_v52, %s7083_s25 }
 0xcbf   : > { %4537 = vrot.lane.b32.xlu1 %v8609_v52, %s7084_s26 }
 0xcc0   : > { %4007 = vrot.lane.b32.xlu0 %v8618_v18, %s7083_s25 }
 0xcc3   : > { %4539 = vrot.lane.b32.xlu1 %v8618_v18, %s7084_s26 }
 0xcc4   : > { %4625 = vrot.lane.b32.xlu0 %v7202_v28, %s7085_s9 }
 0xcc7   : > { %4627 = vrot.lane.b32.xlu1 %v7208_v29, %s7085_s9 }
 0xcc8   : > { %4629 = vrot.lane.b32.xlu0 %v7214_v30, %s7085_s9 }
 0xccb   : > { %4631 = vrot.lane.b32.xlu1 %v7220_v31, %s7085_s9 }
 0xccc   : > { %4633 = vrot.lane.b32.xlu0 %v7226_v32, %s7085_s9 }
 0xccf   : > { %4635 = vrot.lane.b32.xlu1 %v7232_v33, %s7085_s9 }
 0xcd0   : > { %4637 = vrot.lane.b32.xlu0 %v7238_v34, %s7085_s9 }
 0xcd3   : > { %4639 = vrot.lane.b32.xlu1 %v7244_v35, %s7085_s9 }
 0xcd4   : > { %4641 = vrot.lane.b32.xlu0 %v7250_v36, %s7085_s9 }
 0xcd7   : > { %4643 = vrot.lane.b32.xlu1 %v7256_v37, %s7085_s9 }
 0xcd8   : > { %4645 = vrot.lane.b32.xlu0 %v7262_v38, %s7085_s9 }
 0xcdb   : > { %4647 = vrot.lane.b32.xlu1 %v7268_v39, %s7085_s9 }
 0xcdc   : > { %4649 = vrot.lane.b32.xlu0 %v9122_v51, %s7085_s9 }
 0xcdf   : > { %4651 = vrot.lane.b32.xlu1 %v7280_v41, %s7085_s9 }
 0xce0   : > { %4653 = vrot.lane.b32.xlu0 %v9123_v49, %s7085_s9 }
 0xce3   : > { %4655 = vrot.lane.b32.xlu1 %v9121_v20, %s7085_s9 }
 0xcfa   : > { %v3871_v28 = vpop.xlane.xlu0 %3870 }
 0xcfb   : > { %6917 = vrcp.f32 %v3871_v28  ;;  %v3869_v29 = vpop.xlane.xlu1 %3868 }
 0xcfc   : > { %6919 = vrcp.f32 %v3869_v29 }
 0xcfe   : > { %v4404_v30 = vpop.xlane.xlu0 %4403 }
 0xcff   : > { %6921 = vrcp.f32 %v4404_v30  ;;  %v4402_v31 = vpop.xlane.xlu1 %4401 }
 0xd00   : > { %6923 = vrcp.f32 %v4402_v31 }
 0xd02   : > { %v3875_v32 = vpop.xlane.xlu0 %3874 }
 0xd03   : > { %6925 = vrcp.f32 %v3875_v32  ;;  %v3873_v33 = vpop.xlane.xlu1 %3872 }
 0xd04   : > { %6927 = vrcp.f32 %v3873_v33 }
 0xd05   : > { %v6918_v34 = vpop.eup %6917 }
 0xd06   : > { %v6920_v35 = vpop.eup %6919  ;;  %v3917_v36 = vmul.f32 %v6918_v34, %v8487_v58 }
 0xd07   : > { %v4406_v37 = vpop.xlane.xlu1 %4405  ;;  %v4408_v38 = vpop.xlane.xlu0 %4407  ;;  %v3916_v39 = vmul.f32 %v6920_v35, %v8489_v40 }
 0xd08   : > { %6929 = vrcp.f32 %v4406_v37 }
 0xd09   : > { %v6922_v41 = vpop.eup %6921  ;;  %6931 = vrcp.f32 %v4408_v38  ;;  %v6418_v20 = vpack.c.bf16 %v3917_v36, %v3916_v39 }
 0xd0a   : > { %v6924_v51 = vpop.eup %6923  ;;  %v4450_v49 = vmul.f32 %v6922_v41, %v8494_v7 }
 0xd0b   : > { %v3877_v6 = vpop.xlane.xlu1 %3876  ;;  %6419 = vmatpush3.bf16.xpose.msra.mxu1 %v6418_v20  ;;  %v3879_v42 = vpop.xlane.xlu0 %3878  ;;  %v4449_v61 = vmul.f32 %v6924_v51, %v8497_v55 }
 0xd0c   : > { %6933 = vrcp.f32 %v3877_v6  ;;  %6420 = vmatprep.subr.bf16.mxu1 %v9117_v53 }
 0xd0d   : > { %v6926_v58 = vpop.eup %6925  ;;  %6935 = vrcp.f32 %v3879_v42  ;;  %v6442_v54 = vpack.c.bf16 %v4450_v49, %v4449_v61 }
 0xd0e   : > { %v6928_v11 = vpop.eup %6927  ;;  %v3919_v40 = vmul.f32 %v6926_v58, %v8503_v0 }
 0xd0f   : > { %v4410_v2 = vpop.xlane.xlu1 %4409  ;;  %6443 = vmatpush3.bf16.xpose.msra.mxu0 %v6442_v54  ;;  %v4412_v1 = vpop.xlane.xlu0 %4411  ;;  %v3918_v56 = vmul.f32 %v6928_v11, %v8505_v27 }
 0xd10   : > { %6937 = vrcp.f32 %v4410_v2  ;;  %6444 = vmatprep.subr.bf16.mxu0 %v9117_v53 }
 0xd11   : > { %6939 = vrcp.f32 %v4412_v1  ;;  %v6421_v7 = vpack.c.bf16 %v3919_v40, %v3918_v56 }
 0xd12   : > { %v6930_v55 = vpop.eup %6929 }
 0xd13   : > { %v6932_v13 = vpop.eup %6931  ;;  %v3881_v22 = vpop.xlane.xlu1 %3880  ;;  %6422 = vmatpush3.bf16.xpose.msra.mxu1 %v6421_v7  ;;  %v4451_v47 = vmul.f32 %v6930_v55, %v8511_v48 }
 0xd14   : > { %v3883_v5 = vpop.xlane.xlu0 %3882  ;;  %6941 = vrcp.f32 %v3881_v22  ;;  %v4452_v0 = vmul.f32 %v6932_v13, %v8513_v8  ;;  %6423 = vmatprep.subr.bf16.mxu1 %v9117_v53 }
 0xd15   : > { %6943 = vrcp.f32 %v3883_v5 }
 0xd16   : > { %v6934_v28 = vpop.eup %6933  ;;  %v6445_v27 = vpack.c.bf16 %v4452_v0, %v4451_v47 }
 0xd17   : > { %v6936_v29 = vpop.eup %6935  ;;  %v4414_v30 = vpop.xlane.xlu1 %4413  ;;  %v3920_v32 = vmul.f32 %v6934_v28, %v8519_v10 }
 0xd18   : > { %v4416_v31 = vpop.xlane.xlu0 %4415  ;;  %6945 = vrcp.f32 %v4414_v30  ;;  %6446 = vmatpush3.bf16.xpose.msra.mxu0 %v6445_v27  ;;  %v3921_v33 = vmul.f32 %v6936_v29, %v8521_v17 }
 0xd19   : > { %6947 = vrcp.f32 %v4416_v31  ;;  %6447 = vmatprep.subr.bf16.mxu0 %v9117_v53 }
 0xd1a   : > { %v6938_v48 = vpop.eup %6937  ;;  %v6424_v34 = vpack.c.bf16 %v3921_v33, %v3920_v32 }
 0xd1b   : > { %v6940_v8 = vpop.eup %6939  ;;  %v3885_v35 = vpop.xlane.xlu1 %3884  ;;  %v4453_v37 = vmul.f32 %v6938_v48, %v8527_v44 }
 0xd1c   : > { %v3887_v36 = vpop.xlane.xlu0 %3886  ;;  %6949 = vrcp.f32 %v3885_v35  ;;  %6425 = vmatpush3.bf16.xpose.msra.mxu1 %v6424_v34  ;;  %v4454_v38 = vmul.f32 %v6940_v8, %v8529_v4 }
 0xd1d   : > { %6951 = vrcp.f32 %v3887_v36  ;;  %6426 = vmatprep.subr.bf16.mxu1 %v9117_v53 }
 0xd1e   : > { %v6942_v10 = vpop.eup %6941  ;;  %v6448_v39 = vpack.c.bf16 %v4454_v38, %v4453_v37 }
 0xd1f   : > { %v6944_v17 = vpop.eup %6943  ;;  %v4418_v41 = vpop.xlane.xlu1 %4417  ;;  %v3922_v51 = vmul.f32 %v6942_v10, %v8535_v59 }
 0xd20   : > { %v4420_v20 = vpop.xlane.xlu0 %4419  ;;  %6953 = vrcp.f32 %v4418_v41  ;;  %6449 = vmatpush3.bf16.xpose.msra.mxu0 %v6448_v39  ;;  %v3923_v49 = vmul.f32 %v6944_v17, %v8537_v3 }
 0xd21   : > { %6955 = vrcp.f32 %v4420_v20  ;;  %6450 = vmatprep.subr.bf16.mxu0 %v9117_v53 }
 0xd22   : > { %v6946_v44 = vpop.eup %6945  ;;  %v6427_v6 = vpack.c.bf16 %v3923_v49, %v3922_v51 }
 0xd23   : > { %v6948_v4 = vpop.eup %6947  ;;  %v3889_v42 = vpop.xlane.xlu1 %3888  ;;  %v4455_v58 = vmul.f32 %v6946_v44, %v8543_v16 }
 0xd24   : > { %v3891_v61 = vpop.xlane.xlu0 %3890  ;;  %6957 = vrcp.f32 %v3889_v42  ;;  %6428 = vmatpush3.bf16.xpose.msra.mxu1 %v6427_v6  ;;  %v4456_v54 = vmul.f32 %v6948_v4, %v8545_v25 }
 0xd25   : > { %6959 = vrcp.f32 %v3891_v61  ;;  %6429 = vmatprep.subr.bf16.mxu1 %v9117_v53 }
 0xd26   : > { %v6950_v59 = vpop.eup %6949  ;;  %v6451_v11 = vpack.c.bf16 %v4456_v54, %v4455_v58 }
 0xd27   : > { %v6952_v3 = vpop.eup %6951  ;;  %v4422_v40 = vpop.xlane.xlu1 %4421  ;;  %v3924_v1 = vmul.f32 %v6950_v59, %v8551_v12 }
 0xd28   : > { %v4424_v2 = vpop.xlane.xlu0 %4423  ;;  %6961 = vrcp.f32 %v4422_v40  ;;  %6452 = vmatpush3.bf16.xpose.msra.mxu0 %v6451_v11  ;;  %v3925_v56 = vmul.f32 %v6952_v3, %v8553_v62 }
 0xd29   : > { %6963 = vrcp.f32 %v4424_v2  ;;  %6453 = vmatprep.subr.bf16.mxu0 %v9117_v53 }
 0xd2a   : > { %v6954_v16 = vpop.eup %6953  ;;  %v6430_v7 = vpack.c.bf16 %v3925_v56, %v3924_v1  ;;  %v9131_v56 = vld [vmem:[#allocation7_spill] sm:$0xff] }
 0xd2b   : > { %v6956_v25 = vpop.eup %6955  ;;  %v3893_v55 = vpop.xlane.xlu1 %3892  ;;  %v4457_v22 = vmul.f32 %v6954_v16, %v8559_v23  ;;  %v4657_v16 = vrot.slane %v9131_v56, 6 }
 0xd2c   : > { %v3895_v13 = vpop.xlane.xlu0 %3894  ;;  %6965 = vrcp.f32 %v3893_v55  ;;  %6431 = vmatpush3.bf16.xpose.msra.mxu1 %v6430_v7  ;;  %v4458_v5 = vmul.f32 %v6956_v25, %v8561_v46 }
 0xd2d   : > { %6967 = vrcp.f32 %v3895_v13  ;;  %6432 = vmatprep.subr.bf16.mxu1 %v9117_v53 }
 0xd2e   : > { %v6958_v12 = vpop.eup %6957  ;;  %v6454_v47 = vpack.c.bf16 %v4458_v5, %v4457_v22 }
 0xd2f   : > { %v6960_v62 = vpop.eup %6959  ;;  %v3897_v0 = vpop.xlane.xlu1 %3896  ;;  %v3926_v27 = vmul.f32 %v6958_v12, %v8567_v9 }
 0xd30   : > { %v3899_v28 = vpop.xlane.xlu0 %3898  ;;  %6969 = vrcp.f32 %v3897_v0  ;;  %6455 = vmatpush3.bf16.xpose.msra.mxu0 %v6454_v47  ;;  %v3927_v29 = vmul.f32 %v6960_v62, %v8569_v26 }
 0xd31   : > { %6971 = vrcp.f32 %v3899_v28  ;;  %6456 = vmatprep.subr.bf16.mxu0 %v9117_v53 }
 0xd32   : > { %v6962_v23 = vpop.eup %6961  ;;  %v6433_v30 = vpack.c.bf16 %v3927_v29, %v3926_v27  ;;  %v9132_v27 = vmov 0.0  }
 0xd33   : > { %v6964_v46 = vpop.eup %6963  ;;  %v4426_v31 = vpop.xlane.xlu1 %4425  ;;  %v4459_v33 = vmul.f32 %v6962_v23, %v8575_v43 }
 0xd34   : > { %v4428_v32 = vpop.xlane.xlu0 %4427  ;;  %6973 = vrcp.f32 %v4426_v31  ;;  %6434 = vmatpush3.bf16.xpose.msra.mxu1 %v6433_v30  ;;  %v4460_v48 = vmul.f32 %v6964_v46, %v8577_v14 }
 0xd35   : > { %6975 = vrcp.f32 %v4428_v32  ;;  %6435 = vmatprep.subr.bf16.mxu1 %v9117_v53 }
 0xd36   : > { %v6966_v9 = vpop.eup %6965  ;;  %v6457_v34 = vpack.c.bf16 %v4460_v48, %v4459_v33 }
 0xd37   : > { %v6968_v26 = vpop.eup %6967  ;;  %v4430_v8 = vpop.xlane.xlu1 %4429  ;;  %v3928_v36 = vmul.f32 %v6966_v9, %v8582_v24 }
 0xd38   : > { %v4432_v35 = vpop.xlane.xlu0 %4431  ;;  %6977 = vrcp.f32 %v4430_v8  ;;  %6458 = vmatpush3.bf16.xpose.msra.mxu0 %v6457_v34  ;;  %v3929_v37 = vmul.f32 %v6968_v26, %v8584_v45 }
 0xd39   : > { %6979 = vrcp.f32 %v4432_v35  ;;  %6459 = vmatprep.subr.bf16.mxu0 %v9117_v53 }
 0xd3a   : > { %v6970_v43 = vpop.eup %6969  ;;  %v6436_v38 = vpack.c.bf16 %v3929_v37, %v3928_v36 }
 0xd3b   : > { %v6972_v14 = vpop.eup %6971  ;;  %v3930_v39 = vmul.f32 %v6970_v43, %v8588_v19  ;;  %v3933_v19 = vrot.slane %v8285_v60, 2  ;;  %v4006_v42 = vpop.permute.xlu1 %4005 }
 0xd3c   : > { %6437 = vmatpush3.bf16.xpose.msra.mxu1 %v6436_v38  ;;  %v3931_v17 = vmul.f32 %v6972_v14, %v8590_v15  ;;  %v4008_v61 = vpop.permute.xlu0 %4007 }
 0xd3d   : > { %6438 = vmatprep.subr.bf16.mxu1 %v9117_v53 }
 0xd3e   : > { %v6974_v10 = vpop.eup %6973  ;;  %v6439_v51 = vpack.c.bf16 %v3931_v17, %v3930_v39 }
 0xd3f   : > { %v6976_v41 = vpop.eup %6975  ;;  %v4461_v24 = vmul.f32 %v6974_v10, %v8594_v57  ;;  %v4465_v57 = vrot.slane %v8285_v60, 4 }
 0xd40   : > { %v4462_v20 = vmul.f32 %v6976_v41, %v8596_v63  ;;  %v4538_v63 = vpop.permute.xlu1 %4537  ;;  %v4626_v54 = vpop.permute.xlu0 %4625 }
 0xd42   : > { %v6978_v45 = vpop.eup %6977  ;;  %v6460_v49 = vpack.c.bf16 %v4462_v20, %v4461_v24 }
 0xd43   : > { %v6980_v44 = vpop.eup %6979  ;;  %v4463_v6 = vmul.f32 %v6978_v45, %v8600_v50 }
 0xd44   : > { %6440 = vmatpush3.bf16.xpose.msra.mxu1 %v6439_v51  ;;  %6461 = vmatpush3.bf16.xpose.msra.mxu0 %v6460_v49  ;;  %v4464_v4 = vmul.f32 %v6980_v44, %v8602_v21  ;;  %v4540_v58 = vpop.permute.xlu1 %4539  ;;  %v4630_v21 = vpop.permute.xlu0 %4629 }
 0xd45   : > { %6462 = vmatprep.subr.bf16.mxu0 %v9117_v53 }
 0xd46   : > { %v6463_v15 = vpack.c.bf16 %v4464_v4, %v4463_v6 }
 0xd48   : > { %v4628_v59 = vpop.permute.xlu1 %4627  ;;  %v4634_v2 = vpop.permute.xlu0 %4633 }
 0xd4b   : > { %6154 = vmatmul.mubr.f32.vlgmr.msra.gmra.mrb[54].mxu1 %v3933_v19 }
 0xd4c   : > { %6464 = vmatpush3.bf16.xpose.msra.mxu0 %v6463_v15  ;;  %6158 = vmatprep.mubr.msk.f32.mxu1 %vm923_vm2, %v4006_v42  ;;  %v4632_v3 = vpop.permute.xlu1 %4631  ;;  %v4638_v25 = vpop.permute.xlu0 %4637 }
 0xd50   : > { %v4636_v7 = vpop.permute.xlu1 %4635  ;;  %v4642_v13 = vpop.permute.xlu0 %4641 }
 0xd53   : > { %6220 = vmatmul.mubr.f32.vlgmr.msra.gmra.mrb[80].mxu0 %v4465_v57 }
 0xd54   : > { %v4640_v55 = vpop.permute.xlu1 %4639  ;;  %v4646_v5 = vpop.permute.xlu0 %4645 }
 0xd58   : > { %v4644_v22 = vpop.permute.xlu1 %4643  ;;  %v4650_v47 = vpop.permute.xlu0 %4649 }
 0xd5c   : > { %v4648_v12 = vpop.permute.xlu1 %4647  ;;  %v4654_v0 = vpop.permute.xlu0 %4653 }
 0xd60   : > { %v4652_v62 = vpop.permute.xlu1 %4651 }
 0xd64   : > { %v4656_v28 = vpop.permute.xlu1 %4655 }
 0xe1e   : > { %v4001_v11 = vpop.f32.mrb[54].mxu1 }
 0xe1f   : > { %v6155_v50 = vpop.f32.mrb[55].mxu1  ;;  %6156 = vmatprep.subr.msk.mxu1 %vm972_vm1, %v4001_v11 }
 0xe20   : > { %6157 = vmatpush3.msk.msra.mxu1 %vm972_vm1, %v4001_v11 }
 0xe21   : > { %6159 = vmatmul.mubr.msk.f32.vlgmr.msra.gmra.mrb[36].mxu1 %vm923_vm2, %v4008_v61 }
 0xe22   : > { %6224 = vmatprep.mubr.msk.f32.mxu1 %vm923_vm2, %v4538_v63 }
 0xe26   : > { %v4533_v40 = vpop.f32.mrb[80].mxu0 }
 0xe27   : > { %v6221_v1 = vpop.f32.mrb[81].mxu0  ;;  %6222 = vmatprep.subr.msk.mxu1 %vm972_vm1, %v4533_v40 }
 0xe28   : > { %6223 = vmatpush3.msk.msra.mxu1 %vm972_vm1, %v4533_v40 }
 0xe29   : > { %6225 = vmatmul.mubr.msk.f32.vlgmr.msra.gmra.mrb[36].mxu1 %vm923_vm2, %v4540_v58  ;;  %6227 = vmatprep.subr.msk.mxu1 %vm972_vm1, %v4657_v16 }
 0xe2a   : > { %6228 = vmatpush3.msk.msra.mxu1 %vm972_vm1, %v4657_v16  ;;  %6229 = vmatprep.mubr.msk.f32.mxu1 %vm923_vm2, %v4626_v54 }
 0xe2b   : > { %6465 = vmatprep.subr.bf16.mxu1 %v9117_v53 }
 0xe2d   : > { %6230 = vmatmul.mubr.msk.f32.vlgmr.msra.gmra.mrb[56].mxu1 %vm923_vm2, %v4628_v59 }
 0xe2e   : > { %6232 = vmatprep.mubr.msk.f32.mxu1 %vm923_vm2, %v4630_v21 }
 0xe31   : > { %6233 = vmatmul.mubr.msk.f32.gmra.mrb[58].mxu1 %vm923_vm2, %v4632_v3 }
 0xe32   : > { %6235 = vmatprep.mubr.msk.f32.mxu1 %vm923_vm2, %v4634_v2 }
 0xe35   : > { %6236 = vmatmul.mubr.msk.f32.gmra.mrb[60].mxu1 %vm923_vm2, %v4636_v7 }
 0xe36   : > { %6238 = vmatprep.mubr.msk.f32.mxu1 %vm923_vm2, %v4638_v25 }
 0xe39   : > { %6239 = vmatmul.mubr.msk.f32.gmra.mrb[62].mxu1 %vm923_vm2, %v4640_v55 }
 0xe3a   : > { %6241 = vmatprep.mubr.msk.f32.mxu1 %vm923_vm2, %v4642_v13 }
 0xe3d   : > { %6242 = vmatmul.mubr.msk.f32.gmra.mrb[64].mxu1 %vm923_vm2, %v4644_v22 }
 0xe3e   : > { %6244 = vmatprep.mubr.msk.f32.mxu1 %vm923_vm2, %v4646_v5 }
 0xe41   : > { %6245 = vmatmul.mubr.msk.f32.gmra.mrb[66].mxu1 %vm923_vm2, %v4648_v12 }
 0xe42   : > { %6247 = vmatprep.mubr.msk.f32.mxu1 %vm923_vm2, %v4650_v47 }
 0xe45   : > { %6248 = vmatmul.mubr.msk.f32.gmra.mrb[68].mxu1 %vm923_vm2, %v4652_v62 }
 0xe46   : > { %6250 = vmatprep.mubr.msk.f32.mxu1 %vm923_vm2, %v4654_v0 }
 0xe49   : > { %6251 = vmatmul.mubr.msk.f32.gmra.mrb[70].mxu1 %vm923_vm2, %v4656_v28 }
 0xe4a   : > { %6285 = vmatprep.mubr.msk.f32.mxu1 %vm7079_vm3, %v9132_v27 }
 0xf00   : > { %v6231_v29 = vpop.f32.mrb[56].mxu1 }
 0xf01   : > { %v4838_v23 = vmul.f32 0.70710677, %v6231_v29  ;;  %v4758_v30 = vpop.f32.mrb[57].mxu1 }
 0xf02   : > { %v4837_v46 = vmul.f32 0.70710677, %v4758_v30 }
 0xf03   : > { %4855 = vmax.xlane.f32.xlu1 %v4838_v23 }
 0xf04   : > { %4853 = vmax.xlane.f32.xlu0 %v4837_v46  ;;  %v6234_v31 = vpop.f32.mrb[58].mxu1 }
 0xf05   : > { %v4768_v32 = vpop.f32.mrb[59].mxu1  ;;  %v4840_v34 = vmul.f32 0.70710677, %v6234_v31 }
 0xf06   : > { %v4839_v33 = vmul.f32 0.70710677, %v4768_v32 }
 0xf08   : > { %4857 = vmax.xlane.f32.xlu0 %v4839_v33  ;;  %v6237_v48 = vpop.f32.mrb[60].mxu1 }
 0xf09   : > { %v4778_v9 = vpop.f32.mrb[61].mxu1  ;;  %v4842_v36 = vmul.f32 0.70710677, %v6237_v48 }
 0xf0a   : > { %v4841_v26 = vmul.f32 0.70710677, %v4778_v9 }
 0xf0c   : > { %4859 = vmax.xlane.f32.xlu0 %v4840_v34  ;;  %4861 = vmax.xlane.f32.xlu1 %v4841_v26  ;;  %v6240_v8 = vpop.f32.mrb[62].mxu1 }
 0xf0d   : > { %v4788_v35 = vpop.f32.mrb[63].mxu1  ;;  %v4844_v14 = vmul.f32 0.70710677, %v6240_v8 }
 0xf0e   : > { %v4843_v37 = vmul.f32 0.70710677, %v4788_v35 }
 0xf10   : > { %4863 = vmax.xlane.f32.xlu0 %v4842_v36  ;;  %4865 = vmax.xlane.f32.xlu1 %v4843_v37  ;;  %v6243_v43 = vpop.f32.mrb[64].mxu1 }
 0xf11   : > { %v4798_v38 = vpop.f32.mrb[65].mxu1  ;;  %v8734_v41 = vmul.f32 0.70710677, %v6243_v43 }
 0xf12   : > { %v4845_v10 = vmul.f32 0.70710677, %v4798_v38 }
 0xf14   : > { %4867 = vmax.xlane.f32.xlu0 %v4844_v14  ;;  %4869 = vmax.xlane.f32.xlu1 %v4845_v10  ;;  %v6246_v39 = vpop.f32.mrb[66].mxu1 }
 0xf15   : > { %v4808_v17 = vpop.f32.mrb[67].mxu1  ;;  %v8740_v51 = vmul.f32 0.70710677, %v6246_v39 }
 0xf16   : > { %v8736_v24 = vmul.f32 0.70710677, %v4808_v17 }
 0xf18   : > { %4871 = vmax.xlane.f32.xlu0 %v8734_v41  ;;  %4873 = vmax.xlane.f32.xlu1 %v8736_v24  ;;  %v6249_v20 = vpop.f32.mrb[68].mxu1 }
 0xf19   : > { %v4818_v45 = vpop.f32.mrb[69].mxu1  ;;  %v8746_v4 = vmul.f32 0.70710677, %v6249_v20 }
 0xf1a   : > { %v8742_v49 = vmul.f32 0.70710677, %v4818_v45 }
 0xf1c   : > { %4875 = vmax.xlane.f32.xlu0 %v8740_v51  ;;  %4877 = vmax.xlane.f32.xlu1 %v8742_v49  ;;  %v6252_v44 = vpop.f32.mrb[70].mxu1 }
 0xf1d   : > { %v4828_v6 = vpop.f32.mrb[71].mxu1  ;;  %v8752_v15 = vmul.f32 0.70710677, %v6252_v44 }
 0xf1e   : > { %v8748_v19 = vmul.f32 0.70710677, %v4828_v6 }
 0xf20   : > { %4879 = vmax.xlane.f32.xlu0 %v8746_v4  ;;  %4881 = vmax.xlane.f32.xlu1 %v8748_v19 }
 0xf24   : > { %4883 = vmax.xlane.f32.xlu0 %v8752_v15 }
 0xf90   : > { %v4856_v42 = vpop.xlane.xlu1 %4855 }
 0xf91   : > { %v4886_v57 = vsub.f32 %v4838_v23, %v4856_v42  ;;  %v4854_v63 = vpop.xlane.xlu0 %4853 }
 0xf92   : > { %v4885_v61 = vsub.f32 %v4837_v46, %v4854_v63 }
 0xf93   : > { %v4903_v58 = vmul.f32 1.442695, %v4886_v57 }
 0xf94   : > { %v4901_v54 = vmul.f32 1.442695, %v4885_v61 }
 0xf95   : > { %6981 = vpow2.f32 %v4903_v58  ;;  %v4858_v59 = vpop.xlane.xlu0 %4857  ;;  %v254_v58 = vld [vmem:[%s9087_s1] sm:$0xff] }
 0xf96   : > { %6983 = vpow2.f32 %v4901_v54  ;;  %v4887_v11 = vsub.f32 %v4839_v33, %v4858_v59  ;;  %v8818_v54 = vld [vmem:[%s7151_s8] sm:$0xff] }
 0xf97   : > { %v286_v59 = vmul.f32 %v8818_v54, %v254_v58 }
 0xf98   : > { %v4905_v50 = vmul.f32 1.442695, %v4887_v11  ;;  %v256_v11 = vld [vmem:[%s9087_s1 + $0x10] sm:$0xff] }
 0xf99   : > { %v4862_v21 = vpop.xlane.xlu1 %4861  ;;  %v4860_v3 = vpop.xlane.xlu0 %4859 }
 0xf9a   : > { %6985 = vpow2.f32 %v4905_v50  ;;  %v4889_v40 = vsub.f32 %v4841_v26, %v4862_v21  ;;  %v4888_v2 = vsub.f32 %v4840_v34, %v4860_v3  ;;  %v255_v50 = vld [vmem:[%s9087_s1 + $0x8] sm:$0xff]  ;;  %v270_v3 = vld [vmem:[%s9087_s1 + $0x80] sm:$0xff] }
 0xf9c   : > { %v4909_v1 = vmul.f32 1.442695, %v4889_v40  ;;  %v4907_v56 = vmul.f32 1.442695, %v4888_v2  ;;  %v257_v40 = vld [vmem:[%s9087_s1 + $0x18] sm:$0xff]  ;;  %v302_v2 = vmul.f32 %v8818_v54, %v270_v3  ;;  %v282_v3 = vld [vmem:[%s9087_s1 + $0xe0] sm:$0xff] }
 0xf9d   : > { %v4866_v16 = vpop.xlane.xlu1 %4865  ;;  %v4864_v7 = vpop.xlane.xlu0 %4863 }
 0xf9e   : > { %6987 = vpow2.f32 %v4909_v1  ;;  %v4891_v25 = vsub.f32 %v4843_v37, %v4866_v16  ;;  %v4890_v55 = vsub.f32 %v4842_v36, %v4864_v7  ;;  %v271_v16 = vld [vmem:[%s9087_s1 + $0x88] sm:$0xff] }
 0xf9f   : > { %v8755_v13 = vpop.eup %6981  ;;  %6989 = vpow2.f32 %v4907_v56  ;;  %v272_v56 = vld [vmem:[%s9087_s1 + $0x90] sm:$0xff] }
 0xfa0   : > { %v8757_v22 = vpop.eup %6983  ;;  %v4913_v5 = vmul.f32 1.442695, %v4891_v25  ;;  %v4911_v12 = vmul.f32 1.442695, %v4890_v55  ;;  %4935 = vadd.xlane.f32.xlu0 %v8755_v13  ;;  %v304_v7 = vmul.f32 %v8818_v54, %v272_v56  ;;  %v258_v55 = vld [vmem:[%s9087_s1 + $0x20] sm:$0xff]  ;;  %v268_v56 = vld [vmem:[%s9087_s1 + $0x70] sm:$0xff] }
 0xfa1   : > { %v4870_v47 = vpop.xlane.xlu1 %4869  ;;  %4933 = vadd.xlane.f32.xlu1 %v8757_v22  ;;  %v4868_v62 = vpop.xlane.xlu0 %4867 }
 0xfa2   : > { %6991 = vpow2.f32 %v4913_v5  ;;  %v4893_v0 = vsub.f32 %v4845_v10, %v4870_v47  ;;  %v4892_v28 = vsub.f32 %v4844_v14, %v4868_v62  ;;  %v273_v5 = vld [vmem:[%s9087_s1 + $0x98] sm:$0xff]  ;;  %v274_v62 = vld [vmem:[%s9087_s1 + $0xa0] sm:$0xff] }
 0xfa3   : > { %6993 = vpow2.f32 %v4911_v12  ;;  %v290_v12 = vmul.f32 %v8818_v54, %v258_v55  ;;  %v284_v55 = vld [vmem:[%s9087_s1 + $0xf0] sm:$0xff] }
 0xfa4   : > { %v8761_v27 = vpop.eup %6985  ;;  %v4917_v29 = vmul.f32 1.442695, %v4893_v0  ;;  %v4915_v23 = vmul.f32 1.442695, %v4892_v28  ;;  %v259_v0 = vld [vmem:[%s9087_s1 + $0x28] sm:$0xff]  ;;  %v306_v28 = vmul.f32 %v8818_v54, %v274_v62  ;;  %v285_v62 = vld [vmem:[%s9087_s1 + $0xf8] sm:$0xff] }
 0xfa5   : > { %v4874_v30 = vpop.xlane.xlu1 %4873  ;;  %4937 = vadd.xlane.f32.xlu1 %v8761_v27  ;;  %v4872_v46 = vpop.xlane.xlu0 %4871 }
 0xfa6   : > { %6995 = vpow2.f32 %v4917_v29  ;;  %v4895_v31 = vsub.f32 %v8736_v24, %v4874_v30  ;;  %v4894_v32 = vsub.f32 %v8734_v41, %v4872_v46  ;;  %v275_v30 = vld [vmem:[%s9087_s1 + $0xa8] sm:$0xff] }
 0xfa7   : > { %6997 = vpow2.f32 %v4915_v23  ;;  %v260_v23 = vld [vmem:[%s9087_s1 + $0x30] sm:$0xff] }
 0xfa8   : > { %v8766_v33 = vpop.eup %6987  ;;  %v4921_v48 = vmul.f32 1.442695, %v4895_v31  ;;  %v4919_v9 = vmul.f32 1.442695, %v4894_v32  ;;  %v292_v46 = vmul.f32 %v8818_v54, %v260_v23  ;;  %v276_v32 = vld [vmem:[%s9087_s1 + $0xb0] sm:$0xff] }
 0xfa9   : > { %v8768_v34 = vpop.eup %6989  ;;  %v4878_v26 = vpop.xlane.xlu1 %4877  ;;  %4941 = vadd.xlane.f32.xlu1 %v8766_v33 }
 0xfaa   : > { %v4876_v8 = vpop.xlane.xlu0 %4875  ;;  %6999 = vpow2.f32 %v4921_v48  ;;  %v4897_v35 = vsub.f32 %v8742_v49, %v4878_v26  ;;  %4939 = vadd.xlane.f32.xlu0 %v8768_v34  ;;  %v261_v48 = vld [vmem:[%s9087_s1 + $0x38] sm:$0xff] }
 0xfab   : > { %v4896_v36 = vsub.f32 %v8740_v51, %v4876_v8  ;;  %7001 = vpow2.f32 %v4919_v9  ;;  %v308_v9 = vmul.f32 %v8818_v54, %v276_v32  ;;  %v262_v8 = vld [vmem:[%s9087_s1 + $0x40] sm:$0xff] }
 0xfac   : > { %v8774_v37 = vpop.eup %6991  ;;  %v4925_v43 = vmul.f32 1.442695, %v4897_v35  ;;  %v277_v35 = vld [vmem:[%s9087_s1 + $0xb8] sm:$0xff] }
 0xfad   : > { %v4923_v38 = vmul.f32 1.442695, %v4896_v36  ;;  %v8776_v14 = vpop.eup %6993  ;;  %v4882_v10 = vpop.xlane.xlu1 %4881  ;;  %4945 = vadd.xlane.f32.xlu1 %v8774_v37  ;;  %v294_v36 = vmul.f32 %v8818_v54, %v262_v8 }
 0xfae   : > { %v4880_v39 = vpop.xlane.xlu0 %4879  ;;  %7003 = vpow2.f32 %v4925_v43  ;;  %v4899_v17 = vsub.f32 %v8748_v19, %v4882_v10  ;;  %4943 = vadd.xlane.f32.xlu0 %v8776_v14  ;;  %v263_v10 = vld [vmem:[%s9087_s1 + $0x48] sm:$0xff] }
 0xfaf   : > { %v4898_v41 = vsub.f32 %v8746_v4, %v4880_v39  ;;  %7005 = vpow2.f32 %v4923_v38  ;;  %v278_v38 = vld [vmem:[%s9087_s1 + $0xc0] sm:$0xff] }
 0xfb0   : > { %v8782_v24 = vpop.eup %6995  ;;  %v4929_v20 = vmul.f32 1.442695, %v4899_v17  ;;  %v310_v39 = vmul.f32 %v8818_v54, %v278_v38 }
 0xfb1   : > { %v4927_v45 = vmul.f32 1.442695, %v4898_v41  ;;  %v8784_v51 = vpop.eup %6997  ;;  %4949 = vadd.xlane.f32.xlu1 %v8782_v24  ;;  %v264_v41 = vld [vmem:[%s9087_s1 + $0x50] sm:$0xff] }
 0xfb2   : > { %v4884_v49 = vpop.xlane.xlu0 %4883  ;;  %7007 = vpow2.f32 %v4929_v20  ;;  %4947 = vadd.xlane.f32.xlu0 %v8784_v51  ;;  %v279_v20 = vld [vmem:[%s9087_s1 + $0xc8] sm:$0xff] }
 0xfb3   : > { %v4900_v44 = vsub.f32 %v8752_v15, %v4884_v49  ;;  %7009 = vpow2.f32 %v4927_v45  ;;  %v296_v45 = vmul.f32 %v8818_v54, %v264_v41 }
 0xfb4   : > { %v8789_v6 = vpop.eup %6999 }
 0xfb5   : > { %v4931_v19 = vmul.f32 1.442695, %v4900_v44  ;;  %v8791_v4 = vpop.eup %7001  ;;  %4953 = vadd.xlane.f32.xlu1 %v8789_v6  ;;  %v280_v44 = vld [vmem:[%s9087_s1 + $0xd0] sm:$0xff] }
 0xfb6   : > { %4951 = vadd.xlane.f32.xlu0 %v8791_v4  ;;  %v312_v58 = vmul.f32 %v8818_v54, %v280_v44 }
 0xfb7   : > { %7011 = vpow2.f32 %v4931_v19  ;;  %v265_v19 = vld [vmem:[%s9087_s1 + $0x58] sm:$0xff] }
 0xfb8   : > { %v8795_v42 = vpop.eup %7003 }
 0xfb9   : > { %v8797_v57 = vpop.eup %7005  ;;  %4957 = vadd.xlane.f32.xlu1 %v8795_v42 }
 0xfba   : > { %4955 = vadd.xlane.f32.xlu0 %v8797_v57 }
 0xfbc   : > { %v8801_v15 = vpop.eup %7007 }
 0xfbd   : > { %v8803_v63 = vpop.eup %7009  ;;  %4961 = vadd.xlane.f32.xlu1 %v8801_v15 }
 0xfbe   : > { %4959 = vadd.xlane.f32.xlu0 %v8803_v63 }
 0xfc1   : > { %v8807_v61 = vpop.eup %7011 }
 0xfc2   : > { %4963 = vadd.xlane.f32.xlu0 %v8807_v61 }
 0xfce   : > { %5069 = vrot.lane.b32.xlu1 %v8609_v52, %s7085_s9  ;;  %v288_v52 = vmul.f32 %v8818_v54, %v256_v11  ;;  %v266_v11 = vld [vmem:[%s9087_s1 + $0x60] sm:$0xff] }
 0xfd8   : > { %5071 = vrot.lane.b32.xlu0 %v8618_v18, %s7085_s9  ;;  %v8829_v18 = vld [vmem:[%s7151_s8 + $0x8] sm:$0xff] }
 0xfd9   : > { %v287_v21 = vmul.f32 %v8829_v18, %v255_v50  ;;  %v289_v1 = vmul.f32 %v8829_v18, %v257_v40  ;;  %v303_v25 = vmul.f32 %v8829_v18, %v271_v16  ;;  %v305_v47 = vmul.f32 %v8829_v18, %v273_v5  ;;  %v281_v50 = vld [vmem:[%s9087_s1 + $0xd8] sm:$0xff]  ;;  %v267_v40 = vld [vmem:[%s9087_s1 + $0x68] sm:$0xff] }
 0xfda   : > { %v291_v29 = vmul.f32 %v8829_v18, %v259_v0  ;;  %v307_v31 = vmul.f32 %v8829_v18, %v275_v30  ;;  %v293_v26 = vmul.f32 %v8829_v18, %v261_v48  ;;  %v309_v43 = vmul.f32 %v8829_v18, %v277_v35  ;;  %v283_v16 = vld [vmem:[%s9087_s1 + $0xe8] sm:$0xff]  ;;  %v269_v5 = vld [vmem:[%s9087_s1 + $0x78] sm:$0xff] }
 0xfdb   : > { %v295_v17 = vmul.f32 %v8829_v18, %v263_v10  ;;  %v311_v49 = vmul.f32 %v8829_v18, %v279_v20 }
 0xff2   : > { %318 = vadd.xlane.f32.xlu1 %v286_v59  ;;  %v297_v59 = vmul.f32 %v8829_v18, %v265_v19 }
 0xff6   : > { %322 = vadd.xlane.f32.xlu1 %v288_v52  ;;  %v298_v52 = vmul.f32 %v8818_v54, %v266_v11 }
 0xff7   : > { %320 = vadd.xlane.f32.xlu0 %v287_v21  ;;  %v313_v21 = vmul.f32 %v8829_v18, %v281_v50 }
 0xffa   : > { %350 = vadd.xlane.f32.xlu1 %v302_v2  ;;  %v314_v2 = vmul.f32 %v8818_v54, %v282_v3 }
 0xffb   : > { %324 = vadd.xlane.f32.xlu0 %v289_v1  ;;  %v299_v1 = vmul.f32 %v8829_v18, %v267_v40 }
 0xffe   : > { %354 = vadd.xlane.f32.xlu1 %v304_v7  ;;  %v300_v7 = vmul.f32 %v8818_v54, %v268_v56 }
 0xfff   : > { %352 = vadd.xlane.f32.xlu0 %v303_v25  ;;  %v315_v25 = vmul.f32 %v8829_v18, %v283_v16 }
0x1002   : > { %326 = vadd.xlane.f32.xlu1 %v290_v12  ;;  %v316_v12 = vmul.f32 %v8818_v54, %v284_v55 }
0x1003   : > { %356 = vadd.xlane.f32.xlu0 %v305_v47  ;;  %v301_v47 = vmul.f32 %v8829_v18, %v269_v5 }
0x1006   : > { %358 = vadd.xlane.f32.xlu1 %v306_v28 }
0x1007   : > { %328 = vadd.xlane.f32.xlu0 %v291_v29  ;;  %v317_v29 = vmul.f32 %v8829_v18, %v285_v62 }
0x100a   : > { %330 = vadd.xlane.f32.xlu1 %v292_v46 }
0x100b   : > { %360 = vadd.xlane.f32.xlu0 %v307_v31 }
0x100e   : > { %362 = vadd.xlane.f32.xlu1 %v308_v9 }
0x100f   : > { %332 = vadd.xlane.f32.xlu0 %v293_v26 }
0x1012   : > { %334 = vadd.xlane.f32.xlu1 %v294_v36 }
0x1013   : > { %364 = vadd.xlane.f32.xlu0 %v309_v43 }
0x1016   : > { %366 = vadd.xlane.f32.xlu1 %v310_v39 }
0x1017   : > { %336 = vadd.xlane.f32.xlu0 %v295_v17 }
0x101a   : > { %338 = vadd.xlane.f32.xlu1 %v296_v45 }
0x101b   : > { %368 = vadd.xlane.f32.xlu0 %v311_v49 }
0x101e   : > { %370 = vadd.xlane.f32.xlu1 %v312_v58 }
0x101f   : > { %340 = vadd.xlane.f32.xlu0 %v297_v59 }
0x1022   : > { %342 = vadd.xlane.f32.xlu1 %v298_v52 }
0x1023   : > { %372 = vadd.xlane.f32.xlu0 %v313_v21 }
0x1026   : > { %374 = vadd.xlane.f32.xlu1 %v314_v2 }
0x1027   : > { %344 = vadd.xlane.f32.xlu0 %v299_v1 }
0x102a   : > { %346 = vadd.xlane.f32.xlu1 %v300_v7 }
0x102b   : > { %376 = vadd.xlane.f32.xlu0 %v315_v25 }
0x102d   : > { %v4936_v0 = vpop.xlane.xlu0 %4935 }
0x102e   : > { %7013 = vrcp.f32 %v4936_v0  ;;  %v4934_v28 = vpop.xlane.xlu1 %4933  ;;  %378 = vadd.xlane.f32.xlu1 %v316_v12 }
0x102f   : > { %7015 = vrcp.f32 %v4934_v28  ;;  %348 = vadd.xlane.f32.xlu0 %v301_v47 }
0x1032   : > { %v4938_v23 = vpop.xlane.xlu1 %4937 }
0x1033   : > { %380 = vadd.xlane.f32.xlu0 %v317_v29  ;;  %7017 = vrcp.f32 %v4938_v23  ;;  %v4997_v29 = vrot.slane %v8285_v60, 6 }
0x1036   : > { %v4942_v9 = vpop.xlane.xlu1 %4941 }
0x1037   : > { %v4940_v30 = vpop.xlane.xlu0 %4939 }
0x1038   : > { %v7014_v46 = vpop.eup %7013  ;;  %7019 = vrcp.f32 %v4940_v30 }
0x1039   : > { %v7016_v31 = vpop.eup %7015  ;;  %v4982_v32 = vmul.f32 %v7014_v46, %v8755_v13 }
0x103a   : > { %v4981_v48 = vmul.f32 %v7016_v31, %v8757_v22  ;;  %v4946_v38 = vpop.xlane.xlu1 %4945 }
0x103b   : > { %v4944_v26 = vpop.xlane.xlu0 %4943 }
0x103c   : > { %7021 = vrcp.f32 %v4944_v26  ;;  %v6466_v8 = vpack.c.bf16 %v4982_v32, %v4981_v48  ;;  %v414_v26 = vlaneseq }
0x103d   : > { %7023 = vrcp.f32 %v4942_v9  ;;  %v7018_v35 = vpop.eup %7017 }
0x103e   : > { %6467 = vmatpush3.bf16.xpose.msra.mxu1 %v6466_v8  ;;  %v4983_v10 = vmul.f32 %v7018_v35, %v8761_v27  ;;  %v4950_v45 = vpop.xlane.xlu1 %4949  ;;  %v415_v60 = vand.u32 127, %v414_v26 }
0x103f   : > { %6468 = vmatprep.subr.bf16.mxu1 %v9117_v53  ;;  %v4948_v36 = vpop.xlane.xlu0 %4947 }
0x1040   : > { %7025 = vrcp.f32 %v4948_v36 }
0x1041   : > { %7027 = vrcp.f32 %v4946_v38  ;;  %v417_v38 = vshrl.u32 %v414_v26, 7 }
0x1042   : > { %v7020_v43 = vpop.eup %7019  ;;  %v4954_v59 = vpop.xlane.xlu1 %4953 }
0x1043   : > { %v4984_v39 = vmul.f32 %v7020_v43, %v8768_v34  ;;  %v4952_v41 = vpop.xlane.xlu0 %4951 }
0x1044   : > { %7029 = vrcp.f32 %v4952_v41 }
0x1045   : > { %v6469_v13 = vpack.c.bf16 %v4984_v39, %v4983_v10  ;;  %7031 = vrcp.f32 %v4950_v45  ;;  %v420_v10 = vadd.s32 4294967288, %v415_v60 }
0x1046   : > { %v7022_v17 = vpop.eup %7021  ;;  %v4958_v3 = vpop.xlane.xlu1 %4957 }
0x1047   : > { %6470 = vmatpush3.bf16.xpose.msra.mxu1 %v6469_v13  ;;  %v7024_v22 = vpop.eup %7023  ;;  %v4986_v20 = vmul.f32 %v7022_v17, %v8776_v14  ;;  %v4956_v34 = vpop.xlane.xlu0 %4955  ;;  %v8975_v17 = vsub.s32 %v420_v10, %v417_v38 }
0x1048   : > { %6471 = vmatprep.subr.bf16.mxu1 %v9117_v53  ;;  %v4985_v49 = vmul.f32 %v7024_v22, %v8766_v33  ;;  %7033 = vrcp.f32 %v4956_v34  ;;  %v8977_v22 = vsub.s32 %v415_v60, %v417_v38 }
0x1049   : > { %7035 = vrcp.f32 %v4954_v59 }
0x104a   : > { %v6472_v44 = vpack.c.bf16 %v4986_v20, %v4985_v49  ;;  %v7026_v19 = vpop.eup %7025  ;;  %v4962_v16 = vpop.xlane.xlu1 %4961 }
0x104b   : > { %v7028_v27 = vpop.eup %7027  ;;  %v4988_v58 = vmul.f32 %v7026_v19, %v8784_v51  ;;  %v4960_v52 = vpop.xlane.xlu0 %4959 }
0x104c   : > { %v4987_v11 = vmul.f32 %v7028_v27, %v8774_v37  ;;  %7037 = vrcp.f32 %v4960_v52 }
0x104d   : > { %7039 = vrcp.f32 %v4958_v3 }
0x104e   : > { %v6475_v50 = vpack.c.bf16 %v4988_v58, %v4987_v11  ;;  %v7030_v14 = vpop.eup %7029  ;;  %v5070_v28 = vpop.permute.xlu1 %5069 }
0x104f   : > { %6473 = vmatpush3.bf16.xpose.msra.mxu1 %v6472_v44  ;;  %v7032_v33 = vpop.eup %7031  ;;  %v4990_v21 = vmul.f32 %v7030_v14, %v8791_v4  ;;  %v4964_v1 = vpop.xlane.xlu0 %4963 }
0x1050   : > { %6474 = vmatprep.subr.bf16.mxu1 %v9117_v53  ;;  %v4989_v40 = vmul.f32 %v7032_v33, %v8782_v24  ;;  %7041 = vrcp.f32 %v4964_v1 }
0x1051   : > { %7043 = vrcp.f32 %v4962_v16 }
0x1052   : > { %v6478_v2 = vpack.c.bf16 %v4990_v21, %v4989_v40  ;;  %v7034_v51 = vpop.eup %7033 }
0x1053   : > { %v7036_v37 = vpop.eup %7035  ;;  %v4992_v56 = vmul.f32 %v7034_v51, %v8797_v57 }
0x1054   : > { %v4991_v7 = vmul.f32 %v7036_v37, %v8789_v6 }
0x1056   : > { %v6481_v25 = vpack.c.bf16 %v4992_v56, %v4991_v7  ;;  %v7038_v4 = vpop.eup %7037 }
0x1057   : > { %6476 = vmatpush3.bf16.xpose.msra.mxu1 %v6475_v50  ;;  %v7040_v24 = vpop.eup %7039  ;;  %v4994_v55 = vmul.f32 %v7038_v4, %v8803_v63 }
0x1058   : > { %6477 = vmatprep.subr.bf16.mxu1 %v9117_v53  ;;  %v4993_v5 = vmul.f32 %v7040_v24, %v8795_v42  ;;  %v8973_v42 = vpop.permute.xlu0 %5071 }
0x105a   : > { %v6484_v12 = vpack.c.bf16 %v4994_v55, %v4993_v5  ;;  %v7042_v47 = vpop.eup %7041 }
0x105b   : > { %v7044_v62 = vpop.eup %7043  ;;  %v4996_v6 = vmul.f32 %v7042_v47, %v8807_v61 }
0x105c   : > { %v4995_v57 = vmul.f32 %v7044_v62, %v8801_v15 }
0x105e   : > { %v6487_v0 = vpack.c.bf16 %v4996_v6, %v4995_v57 }
0x105f   : > { %6479 = vmatpush3.bf16.xpose.msra.mxu1 %v6478_v2 }
0x1060   : > { %6480 = vmatprep.subr.bf16.mxu1 %v9117_v53 }
0x1067   : > { %6482 = vmatpush3.bf16.xpose.msra.mxu1 %v6481_v25 }
0x1068   : > { %6483 = vmatprep.subr.bf16.mxu1 %v9117_v53 }
0x106f   : > { %6485 = vmatpush3.bf16.xpose.msra.mxu1 %v6484_v12 }
0x1070   : > { %6486 = vmatprep.subr.bf16.mxu1 %v9117_v53 }
0x1077   : > { %6488 = vmatpush3.bf16.xpose.msra.mxu1 %v6487_v0 }
0x107e   : > { %6286 = vmatmul.mubr.f32.vlgmr.msra.gmra.mrb[72].mxu1 %v4997_v29 }
0x107f   : > { %6290 = vmatprep.mubr.msk.f32.mxu1 %vm923_vm2, %v5070_v28  ;;  %v319_v63 = vpop.xlane.xlu1 %318 }
0x1080   : > { %v419_v49 = vrot.slane %v319_v63, %v8977_v22 }
0x1083   : > { %v323_v23 = vpop.xlane.xlu1 %322 }
0x1084   : > { %v321_v30 = vpop.xlane.xlu0 %320  ;;  %v430_v19 = vrot.slane %v323_v23, %v8977_v22 }
0x1085   : > { %v424_v45 = vrot.slane %v321_v30, %v8975_v17 }
0x1087   : > { %v351_v46 = vpop.xlane.xlu1 %350  ;;  %v426_v58 = vsel %vm425_vm4, %v424_v45, %v419_v49 }
0x1088   : > { %v325_v31 = vpop.xlane.xlu0 %324  ;;  %v493_v50 = vrot.slane %v351_v46, %v8977_v22 }
0x1089   : > { %v434_v44 = vrot.slane %v325_v31, %v8975_v17 }
0x108b   : > { %v355_v53 = vpop.xlane.xlu1 %354  ;;  %v435_v59 = vsel %vm425_vm4, %v434_v44, %v430_v19 }
0x108c   : > { %v353_v32 = vpop.xlane.xlu0 %352  ;;  %v502_v33 = vrot.slane %v355_v53, %v8977_v22  ;;  %v563_v2 = vsel %vm562_vm5, %v435_v59, %v426_v58 }
0x108d   : > { %v497_v11 = vrot.slane %v353_v32, %v8975_v17 }
0x108f   : > { %v327_v61 = vpop.xlane.xlu1 %326  ;;  %v498_v51 = vsel %vm425_vm4, %v497_v11, %v493_v50 }
0x1090   : > { %v357_v48 = vpop.xlane.xlu0 %356  ;;  %v439_v21 = vrot.slane %v327_v61, %v8977_v22 }
0x1091   : > { %v506_v14 = vrot.slane %v357_v48, %v8975_v17 }
0x1093   : > { %v359_v15 = vpop.xlane.xlu1 %358  ;;  %v507_v56 = vsel %vm425_vm4, %v506_v14, %v502_v33 }
0x1094   : > { %v329_v9 = vpop.xlane.xlu0 %328  ;;  %v511_v1 = vrot.slane %v359_v15, %v8977_v22  ;;  %v576_v55 = vsel %vm562_vm5, %v507_v56, %v498_v51  ;;  %v658_v51 = vld [vmem:[%s9089_s3] sm:$0xff]  ;;  %v9058_v56 = vld [vmem:[%s9091_s5 + $0x8] sm:$0xff] }
0x1095   : > { %v443_v52 = vrot.slane %v329_v9, %v8975_v17 }
0x1097   : > { %v331_v8 = vpop.xlane.xlu1 %330  ;;  %v444_v16 = vsel %vm425_vm4, %v443_v52, %v439_v21 }
0x1098   : > { %v361_v35 = vpop.xlane.xlu0 %360  ;;  %v448_v25 = vrot.slane %v331_v8, %v8977_v22  ;;  %v565_v5 = vsel %vm564_vm6, %v444_v16, %v563_v2  ;;  %v9133_v16 = vmov 0  }
0x1099   : > { %v515_v37 = vrot.slane %v361_v35, %v8975_v17 }
0x109b   : > { %v363_v36 = vpop.xlane.xlu1 %362  ;;  %v516_v12 = vsel %vm425_vm4, %v515_v37, %v511_v1  ;;  %v9052_v37 = vld [vmem:[%s9091_s5] sm:$0xff]  ;;  %v7086_v1 = vmov 1  }
0x109c   : > { %v333_v43 = vpop.xlane.xlu0 %332  ;;  %v520_v47 = vrot.slane %v363_v36, %v8977_v22  ;;  %v577_v63 = vsel %vm564_vm6, %v516_v12, %v576_v55 }
0x109d   : > { %v452_v7 = vrot.slane %v333_v43, %v8975_v17 }
0x109f   : > { %v335_v39 = vpop.xlane.xlu1 %334  ;;  %v453_v62 = vsel %vm425_vm4, %v452_v7, %v448_v25 }
0x10a0   : > { %v365_v13 = vpop.xlane.xlu0 %364  ;;  %v457_v0 = vrot.slane %v335_v39, %v8977_v22  ;;  %v567_v23 = vsel %vm566_vm7, %v453_v62, %v565_v5 }
0x10a1   : > { %v524_v6 = vrot.slane %v365_v13, %v8975_v17 }
0x10a3   : > { %v367_v41 = vpop.xlane.xlu1 %366  ;;  %v525_v31 = vsel %vm425_vm4, %v524_v6, %v520_v47 }
0x10a4   : > { %v337_v20 = vpop.xlane.xlu0 %336  ;;  %v529_v46 = vrot.slane %v367_v41, %v8977_v22  ;;  %v578_v8 = vsel %vm566_vm7, %v525_v31, %v577_v63 }
0x10a5   : > { %v461_v57 = vrot.slane %v337_v20, %v8975_v17 }
0x10a7   : > { %v339_v27 = vpop.xlane.xlu1 %338  ;;  %v462_v53 = vsel %vm425_vm4, %v461_v57, %v457_v0 }
0x10a8   : > { %v369_v34 = vpop.xlane.xlu0 %368  ;;  %v466_v61 = vrot.slane %v339_v27, %v8977_v22  ;;  %v569_v35 = vsel %vm568_vm8, %v462_v53, %v567_v23 }
0x10a9   : > { %v533_v30 = vrot.slane %v369_v34, %v8975_v17 }
0x10ab   : > { %v371_v3 = vpop.xlane.xlu1 %370  ;;  %v534_v60 = vsel %vm425_vm4, %v533_v30, %v529_v46 }
0x10ac   : > { %v341_v40 = vpop.xlane.xlu0 %340  ;;  %v538_v38 = vrot.slane %v371_v3, %v8977_v22  ;;  %v579_v44 = vsel %vm568_vm8, %v534_v60, %v578_v8 }
0x10ad   : > { %v470_v32 = vrot.slane %v341_v40, %v8975_v17 }
0x10af   : > { %v343_v4 = vpop.xlane.xlu1 %342  ;;  %v471_v36 = vsel %vm425_vm4, %v470_v32, %v466_v61 }
0x10b0   : > { %v373_v24 = vpop.xlane.xlu0 %372  ;;  %v475_v9 = vrot.slane %v343_v4, %v8977_v22  ;;  %v571_v19 = vsel %vm570_vm9, %v471_v36, %v569_v35 }
0x10b1   : > { %v542_v43 = vrot.slane %v373_v24, %v8975_v17 }
0x10b3   : > { %v375_v28 = vpop.xlane.xlu1 %374  ;;  %v543_v27 = vsel %vm425_vm4, %v542_v43, %v538_v38 }
0x10b4   : > { %v345_v29 = vpop.xlane.xlu0 %344  ;;  %v547_v41 = vrot.slane %v375_v28, %v8977_v22  ;;  %v580_v21 = vsel %vm570_vm9, %v543_v27, %v579_v44 }
0x10b5   : > { %v479_v15 = vrot.slane %v345_v29, %v8975_v17 }
0x10b7   : > { %v347_v48 = vpop.xlane.xlu1 %346  ;;  %v480_v39 = vsel %vm425_vm4, %v479_v15, %v475_v9 }
0x10b8   : > { %v377_v26 = vpop.xlane.xlu0 %376  ;;  %v484_v10 = vrot.slane %v347_v48, %v8977_v22  ;;  %v573_v59 = vsel %vm572_vm10, %v480_v39, %v571_v19 }
0x10b9   : > { %v551_v13 = vrot.slane %v377_v26, %v8975_v17 }
0x10bb   : > { %v379_v45 = vpop.xlane.xlu1 %378  ;;  %v552_v11 = vsel %vm425_vm4, %v551_v13, %v547_v41 }
0x10bc   : > { %v349_v20 = vpop.xlane.xlu0 %348  ;;  %v556_v34 = vrot.slane %v379_v45, %v8977_v22  ;;  %v581_v22 = vsel %vm572_vm10, %v552_v11, %v580_v21 }
0x10bd   : > { %v488_v49 = vrot.slane %v349_v20, %v8975_v17 }
0x10bf   : > { %v489_v58 = vsel %vm425_vm4, %v488_v49, %v484_v10 }
0x10c0   : > { %v381_v50 = vpop.xlane.xlu0 %380  ;;  %v575_v14 = vsel %vm574_vm11, %v489_v58, %v573_v59 }
0x10c1   : > { %v560_v33 = vrot.slane %v381_v50, %v8975_v17  ;;  %v586_v52 = vsel %vm585_vm0, %v575_v14, 0.0  ;;  %v659_v17 = vld [vmem:[%s9089_s3 + $0x8] sm:$0xff] }
0x10c2   : > { %587 = vadd.xlane.f32.xlu1 %v586_v52 }
0x10c3   : > { %v561_v3 = vsel %vm425_vm4, %v560_v33, %v556_v34 }
0x10c4   : > { %v582_v40 = vsel %vm574_vm11, %v561_v3, %v581_v22 }
0x10c5   : > { %v589_v2 = vsel %vm585_vm0, %v582_v40, 0.0 }
0x10c6   : > { %590 = vadd.xlane.f32.xlu0 %v589_v2 }
0x10d3   : > { %668 = vperm.xlu1 %6526, %v658_v51   ;;  %v7087_v51 = vmov 2  }
0x10d7   : > { %6527 = vset.pattern.permute.xlu1 %v7086_v1 }
0x10d8   : > { %5159 = vperm.xlu1 %6527, %v9052_v37  }
0x10dc   : > { %673 = vperm.xlu0 %6525, %v659_v17   ;;  %5164 = vperm.xlu1 %6527, %v9058_v56   ;;  %v7088_v17 = vmov 3  }
0x10e0   : > { %6528 = vset.pattern.permute.xlu1 %v9133_v16 }
0x114f   : > { %v588_v7 = vpop.xlane.xlu1 %587 }
0x1150   : > { %v594_v25 = vadd.f32 %v9052_v37, %v588_v7  ;;  %v9134_v7 = vld [vmem:[#allocation2_spill] sm:$0xff] }
0x1151   : > { %v5065_v4 = vpop.f32.mrb[72].mxu1 }
0x1152   : > { %v598_v24 = vmul.f32 0.70710677, %v594_v25  ;;  %v6287_v55 = vpop.f32.mrb[73].mxu1  ;;  %6288 = vmatprep.subr.msk.mxu1 %vm972_vm1, %v5065_v4  ;;  %v596_v14 = vmul.f32 0.5, %v594_v25 }
0x1153   : > { %6289 = vmatpush3.msk.msra.mxu1 %vm972_vm1, %v5065_v4  ;;  %v591_v5 = vpop.xlane.xlu0 %590  ;;  %v669_v16 = vpop.permute.xlu1 %668  ;;  %v9135_v4 = vld [vmem:[#allocation3_spill] sm:$0xff] }
0x1154   : > { %v600_v12 = vand.u32 2147483647, %v598_v24  ;;  %v595_v47 = vadd.f32 %v9058_v56, %v591_v5  ;;  %6291 = vmatmul.mubr.msk.f32.vlgmr.msra.gmra.mrb[36].mxu1 %vm923_vm2, %v8973_v42  ;;  %vm640_vm12 = vcmp.lt.f32.partialorder %v598_v24, 0.0  ;;  %v797_v24 = vadd.f32 %v9135_v4, %v669_v16 }
0x1156   : > { %v602_v62 = vmul.f32 0.3275911, %v600_v12  ;;  %v599_v6 = vmul.f32 0.70710677, %v595_v47  ;;  %v628_v63 = vsub.f32 0.0, %v600_v12  ;;  %v597_v22 = vmul.f32 0.5, %v595_v47 }
0x1157   : > { %v837_v5 = vmul.f32 0.70710677, %v797_v24 }
0x1158   : > { %v604_v57 = vadd.f32 1.0, %v602_v62  ;;  %v601_v0 = vand.u32 2147483647, %v599_v6  ;;  %v630_v30 = vmul.f32 %v628_v63, %v600_v12  ;;  %vm641_vm13 = vcmp.lt.f32.partialorder %v599_v6, 0.0 }
0x1159   : > { %v839_v47 = vand.u32 2147483647, %v837_v5  ;;  %vm879_vm15 = vcmp.lt.f32.partialorder %v837_v5, 0.0 }
0x115a   : > { %7045 = vrcp.f32 %v604_v57  ;;  %v603_v28 = vmul.f32 0.3275911, %v601_v0  ;;  %v629_v46 = vsub.f32 0.0, %v601_v0  ;;  %v632_v61 = vmul.f32 1.442695, %v630_v30 }
0x115b   : > { %v674_v1 = vpop.permute.xlu0 %673  ;;  %v841_v6 = vmul.f32 0.3275911, %v839_v47 }
0x115c   : > { %v605_v29 = vadd.f32 1.0, %v603_v28  ;;  %v631_v48 = vmul.f32 %v629_v46, %v601_v0  ;;  %v802_v25 = vadd.f32 %v9134_v7, %v674_v1  ;;  %v9137_v7 = vld [vmem:[#allocation10_spill] sm:$0xff] }
0x115d   : > { %v843_v0 = vadd.f32 1.0, %v841_v6 }
0x115e   : > { %7047 = vrcp.f32 %v605_v29  ;;  %v634_v8 = vmul.f32 1.442695, %v631_v48  ;;  %v838_v55 = vmul.f32 0.70710677, %v802_v25 }
0x115f   : > { %7049 = vpow2.f32 %v632_v61  ;;  %v867_v61 = vsub.f32 0.0, %v839_v47 }
0x1160   : > { %7051 = vpow2.f32 %v634_v8  ;;  %v840_v12 = vand.u32 2147483647, %v838_v55  ;;  %vm880_vm14 = vcmp.lt.f32.partialorder %v838_v55, 0.0 }
0x1162   : > { %v842_v62 = vmul.f32 0.3275911, %v840_v12 }
0x1164   : > { %v7046_v23 = vpop.eup %7045  ;;  %v844_v57 = vadd.f32 1.0, %v842_v62 }
0x1165   : > { %v610_v31 = vmul.f32 1.0614054, %v7046_v23 }
0x1166   : > { %7053 = vrcp.f32 %v844_v57 }
0x1167   : > { %v612_v53 = vadd.f32 -1.4531521, %v610_v31  ;;  %7055 = vrcp.f32 %v843_v0 }
0x1168   : > { %v7048_v32 = vpop.eup %7047 }
0x1169   : > { %v614_v15 = vmul.f32 %v7046_v23, %v612_v53  ;;  %v611_v9 = vmul.f32 1.0614054, %v7048_v32  ;;  %v7050_v45 = vpop.eup %7049  ;;  %v868_v53 = vsub.f32 0.0, %v840_v12 }
0x116a   : > { %v7052_v34 = vpop.eup %7051 }
0x116b   : > { %v616_v42 = vadd.f32 1.4214138, %v614_v15  ;;  %v613_v26 = vadd.f32 -1.4531521, %v611_v9  ;;  %v870_v15 = vmul.f32 %v868_v53, %v840_v12 }
0x116d   : > { %v618_v35 = vmul.f32 %v7046_v23, %v616_v42  ;;  %v615_v60 = vmul.f32 %v7048_v32, %v613_v26  ;;  %v869_v42 = vmul.f32 %v867_v61, %v839_v47  ;;  %v873_v8 = vmul.f32 1.442695, %v870_v15 }
0x116f   : > { %v620_v36 = vadd.f32 -0.28449672, %v618_v35  ;;  %v617_v43 = vadd.f32 1.4214138, %v615_v60  ;;  %v871_v60 = vmul.f32 1.442695, %v869_v42  ;;  %7057 = vpow2.f32 %v873_v8 }
0x1171   : > { %v622_v38 = vmul.f32 %v7046_v23, %v620_v36  ;;  %v619_v10 = vmul.f32 %v7048_v32, %v617_v43  ;;  %7059 = vpow2.f32 %v871_v60 }
0x1173   : > { %v624_v39 = vadd.f32 0.2548296, %v622_v38  ;;  %v621_v13 = vadd.f32 -0.28449672, %v619_v10 }
0x1175   : > { %v626_v41 = vmul.f32 %v7046_v23, %v624_v39  ;;  %v623_v20 = vmul.f32 %v7048_v32, %v621_v13 }
0x1177   : > { %v636_v49 = vmul.f32 %v7050_v45, %v626_v41  ;;  %v625_v44 = vadd.f32 0.2548296, %v623_v20 }
0x1179   : > { %v638_v19 = vsub.f32 1.0, %v636_v49  ;;  %v627_v27 = vmul.f32 %v7048_v32, %v625_v44 }
0x117b   : > { %v642_v58 = vsub.f32 0.0, %v638_v19  ;;  %v637_v59 = vmul.f32 %v7052_v34, %v627_v27 }
0x117d   : > { %v644_v11 = vsel %vm640_vm12, %v642_v58, %v638_v19  ;;  %v639_v50 = vsub.f32 1.0, %v637_v59  ;;  %v5160_v19 = vpop.permute.xlu1 %5159 }
0x117e   : > { %v646_v33 = vadd.f32 1.0, %v644_v11 }
0x117f   : > { %v643_v52 = vsub.f32 0.0, %v639_v50 }
0x1180   : > { %v648_v21 = vmul.f32 %v646_v33, %v596_v14 }
0x1181   : > { %v645_v3 = vsel %vm641_vm13, %v643_v52, %v639_v50  ;;  %v5165_v59 = vpop.permute.xlu1 %5164 }
0x1182   : > { %v647_v40 = vadd.f32 1.0, %v645_v3  ;;  %5171 = vperm.xlu0 %6525, %v648_v21   ;;  %v836_v21 = vmul.f32 0.5, %v802_v25 }
0x1184   : > { %v649_v2 = vmul.f32 %v647_v40, %v597_v22  ;;  %v835_v22 = vmul.f32 0.5, %v797_v24 }
0x1186   : > { %5176 = vperm.xlu1 %6528, %v649_v2   ;;  %6529 = vset.pattern.permute.xlu0 %v7087_v51 }
0x1187   : > { %5186 = vperm.xlu0 %6529, %v9052_v37  }
0x118a   : > { %6530 = vset.pattern.permute.xlu1 %v7087_v51  ;;  %v9136_v51 = vld [vmem:[#allocation9_spill] sm:$0xff] }
0x118b   : > { %5190 = vperm.xlu1 %6530, %v9058_v56   ;;  %6532 = vset.pattern.permute.xlu0 %v7088_v17 }
0x118c   : > { %5200 = vperm.xlu0 %6532, %v9058_v56   ;;  %v7054_v56 = vpop.eup %7053 }
0x118d   : > { %v7056_v28 = vpop.eup %7055  ;;  %v850_v29 = vmul.f32 1.0614054, %v7054_v56 }
0x118e   : > { %v7058_v41 = vpop.eup %7057 }
0x118f   : > { %6531 = vset.pattern.permute.xlu1 %v7088_v17  ;;  %v852_v63 = vadd.f32 -1.4531521, %v850_v29  ;;  %v7060_v20 = vpop.eup %7059 }
0x1190   : > { %5196 = vperm.xlu1 %6531, %v9052_v37   ;;  %v849_v37 = vmul.f32 1.0614054, %v7056_v28 }
0x1191   : > { %v854_v30 = vmul.f32 %v7054_v56, %v852_v63 }
0x1192   : > { %v851_v23 = vadd.f32 -1.4531521, %v849_v37 }
0x1193   : > { %v856_v31 = vadd.f32 1.4214138, %v854_v30 }
0x1194   : > { %v853_v46 = vmul.f32 %v7056_v28, %v851_v23 }
0x1195   : > { %v858_v48 = vmul.f32 %v7054_v56, %v856_v31 }
0x1196   : > { %v855_v32 = vadd.f32 1.4214138, %v853_v46 }
0x1197   : > { %v860_v26 = vadd.f32 -0.28449672, %v858_v48 }
0x1198   : > { %v857_v9 = vmul.f32 %v7056_v28, %v855_v32 }
0x1199   : > { %v862_v36 = vmul.f32 %v7054_v56, %v860_v26 }
0x119a   : > { %v859_v35 = vadd.f32 -0.28449672, %v857_v9 }
0x119b   : > { %v864_v38 = vadd.f32 0.2548296, %v862_v36 }
0x119c   : > { %v861_v43 = vmul.f32 %v7056_v28, %v859_v35 }
0x119d   : > { %v866_v39 = vmul.f32 %v7054_v56, %v864_v38 }
0x119e   : > { %v863_v10 = vadd.f32 0.2548296, %v861_v43 }
0x119f   : > { %v876_v45 = vmul.f32 %v7058_v41, %v866_v39 }
0x11a0   : > { %v865_v13 = vmul.f32 %v7056_v28, %v863_v10 }
0x11a1   : > { %v878_v44 = vsub.f32 1.0, %v876_v45 }
0x11a2   : > { %v875_v49 = vmul.f32 %v7060_v20, %v865_v13 }
0x11a3   : > { %v882_v34 = vsub.f32 0.0, %v878_v44 }
0x11a4   : > { %v877_v27 = vsub.f32 1.0, %v875_v49 }
0x11a5   : > { %v884_v11 = vsel %vm880_vm14, %v882_v34, %v878_v44 }
0x11a6   : > { %v881_v58 = vsub.f32 0.0, %v877_v27  ;;  %v886_v14 = vadd.f32 1.0, %v884_v11 }
0x11a8   : > { %v883_v50 = vsel %vm879_vm15, %v881_v58, %v877_v27  ;;  %v888_v2 = vmul.f32 %v886_v14, %v836_v21 }
0x11a9   : > { %v885_v52 = vadd.f32 1.0, %v883_v50 }
0x11ab   : > { %v887_v16 = vmul.f32 %v885_v52, %v835_v22 }
0x1201   : > { %v5172_v33 = vpop.permute.xlu0 %5171 }
0x1202   : > { %v5179_v62 = vadd.f32 %v5172_v33, %v887_v16 }
0x1205   : > { %v5177_v3 = vpop.permute.xlu1 %5176 }
0x1206   : > { %v5187_v55 = vpop.permute.xlu0 %5186  ;;  %v5180_v12 = vadd.f32 %v5177_v3, %v888_v2 }
0x120a   : > { %v5191_v47 = vpop.permute.xlu1 %5190 }
0x120b   : > { %v5201_v56 = vpop.permute.xlu0 %5200 }
0x120f   : > { %v5197_v29 = vpop.permute.xlu1 %5196 }
0x1227   : > { %v6292_v40 = vpop.f32.mrb[36].mxu1 }
0x1228   : > { %v6489_v17 = vadd.f32 %v6292_v40, %v9136_v51  ;;  %v5146_v1 = vpop.f32.mrb[37].mxu1 }
0x1229   : > { %v6490_v4 = vadd.f32 %v5146_v1, %v9137_v7 }
0x122a   : > { %v5168_v5 = vadd.f32 %v6489_v17, %v5165_v59 }
0x122b   : > { %v5167_v6 = vadd.f32 %v6490_v4, %v5160_v19 }
0x122c   : > { %v5182_v57 = vadd.f32 %v5180_v12, %v5168_v5 }
0x122d   : > { %v5181_v0 = vadd.f32 %v5179_v62, %v5167_v6 }
0x122e   : > { %v5184_v25 = vadd.f32 %v8829_v18, %v5182_v57 }
0x122f   : > { %v5183_v24 = vadd.f32 %v8818_v54, %v5181_v0 }
0x1230   : > { %v5194_v28 = vmul.f32 %v5191_v47, %v5184_v25 }
0x1231   : > { %v5193_v37 = vmul.f32 %v5187_v55, %v5183_v24 }
0x1232   : > { %v5204_v63 = vadd.f32 %v5201_v56, %v5194_v28 }
0x1233   : > { %v5203_v23 = vadd.f32 %v5197_v29, %v5193_v37 }
0x1234   : > { %5206 = vst [vmem:[%s251_s23 + $0x8] sm:$0xff] %v5204_v63 }
0x1235   : > { %5205 = vst [vmem:[%s251_s23] sm:$0xff] %v5203_v23 }
0x1236 PF: > { %s16_s21 = sadd.s32 1, %s7073_s21  }
0x1237   : > { %p13_p4 = scmp.ge.s32.totalorder %s16_s21, 4  }
0x1239   :  { %15 = sbr.rel (!%p13_p4) target bundleno = 1 (0x1), region = 74 }

</bundles_post_ra>
